<compile_context>
chip_gen: v6e
topology: v6e:2x2x1
jax: 0.10.0
libtpu: 0.0.40
codegen_flags: <defaults>
</compile_context>

<pallas_src>
import functools

import jax
import jax.numpy as jnp
from jax.experimental import pallas as pl
from jax.experimental.pallas import tpu as pltpu

# ---- model dims (match the module's __init__) -------------------------------------
NUM_CLASSES = 17
TEXT_FEATURE_DIM = 1000
IMAGE_FEATURE_DIM = 512      # resnet34.num_features
TEXT_H1 = 512                # Linear(text_feature_dim, 512)
TEXT_H2 = 256                # Linear(512, 256)
FUSION_DIM = IMAGE_FEATURE_DIM + TEXT_H2   # 768
CLS_H = 512                  # Linear(fusion_dim, 512)
CONV_CH = 32                 # stand-in backbone stem channels

# ---- alignment padding -------------------------------------------------------------
C_PAD = 8                    # conv contraction per tap: Cin 3 -> 8 (sublane aligned)
TEXT_PAD = 1024              # text contraction: 1000 -> 1024 (lane aligned)
OUT_PAD = 128                # classifier output: 17 -> 128 (lane-dense stores)


# =====================================================================================
# Kernel 1: stand-in image stem  (conv3x3 as 9 accumulating tap-matmuls + ReLU + GAP)
# grid = (B,): one padded image per step, batch axis "parallel" (megacore on v7x).
# =====================================================================================
def conv_stem_kernel(img_ref, w_ref, b_ref, out_ref, *, H, W):
    P = H * W
    xp = img_ref[0]                                      # (H+2, W+2, C_PAD) bf16
    acc = jnp.zeros((P, CONV_CH), jnp.float32)
    for kh in range(3):
        for kw in range(3):
            tap = xp[kh:kh + H, kw:kw + W, :].reshape(P, C_PAD)          # bf16
            acc = acc + jnp.dot(tap, w_ref[kh * 3 + kw],
                                preferred_element_type=jnp.float32)
    relu = jnp.maximum(acc + b_ref[...], 0.0)            # (P, CONV_CH) f32
    # global average pool as a ones-row matmul on the MXU (keeps reduce off VPU/XLU)
    ones = jnp.full((1, P), 1.0 / P, dtype=jnp.float32)
    pooled = jnp.dot(ones, relu, preferred_element_type=jnp.float32)     # (1, CONV_CH)
    out_ref[...] = pooled.reshape(1, 1, CONV_CH)


# =====================================================================================
# Kernel 2: projection + text MLP + fusion + classifier (tiny, single block, M=B_pad)
# =====================================================================================
def tail_kernel(pooled_ref, proj_w_ref, proj_b_ref,
                txt_ref, t1_w_ref, t1_b_ref, t2_w_ref, t2_b_ref,
                c1_wi_ref, c1_wt_ref, c1_b_ref, c2_w_ref, c2_b_ref,
                out_ref):
    # ---- image feature projection (stand-in stem -> 512) ----
    img = jnp.dot(pooled_ref[...].astype(jnp.bfloat16), proj_w_ref[...],
                  preferred_element_type=jnp.float32)
    img = jnp.maximum(img + proj_b_ref[...], 0.0)                        # [Bp, 512]

    # ---- text branch: Linear+ReLU(+Dropout=identity) x2 ----
    t = jnp.dot(txt_ref[...], t1_w_ref[...], preferred_element_type=jnp.float32)
    t = jnp.maximum(t + t1_b_ref[...], 0.0)                              # [Bp, 512]
    t = jnp.dot(t.astype(jnp.bfloat16), t2_w_ref[...],
                preferred_element_type=jnp.float32)
    t = jnp.maximum(t + t2_b_ref[...], 0.0)                              # [Bp, 256]

    # ---- fusion without a lane-dim concat: split-weight matmuls, one f32 accumulator
    h = jnp.dot(img.astype(jnp.bfloat16), c1_wi_ref[...],
                preferred_element_type=jnp.float32)
    h = h + jnp.dot(t.astype(jnp.bfloat16), c1_wt_ref[...],
                    preferred_element_type=jnp.float32)
    h = jnp.maximum(h + c1_b_ref[...], 0.0)                              # [Bp, 512]

    # ---- classifier, lane-dense padded output (17 -> 128, zero cols) ----
    logits = jnp.dot(h.astype(jnp.bfloat16), c2_w_ref[...],
                     preferred_element_type=jnp.float32) + c2_b_ref[...]
    out_ref[...] = logits.astype(out_ref.dtype)                          # [Bp, 128]


# =====================================================================================
# Parameters (uniform +-1/sqrt(fan_in), like nn.Linear / nn.Conv2d defaults)
# =====================================================================================
def init_params(key):
    def lin(k, fan_in, shape_w, shape_b):
        kw, kb = jax.random.split(k)
        bound = 1.0 / jnp.sqrt(jnp.float32(fan_in))
        w = jax.random.uniform(kw, shape_w, jnp.float32, -bound, bound)
        b = jax.random.uniform(kb, shape_b, jnp.float32, -bound, bound)
        return w, b

    ks = jax.random.split(key, 6)
    conv_w, conv_b = lin(ks[0], 9 * 3, (3, 3, 3, CONV_CH), (1, CONV_CH))     # 3x3, Cin=3
    proj_w, proj_b = lin(ks[1], CONV_CH, (CONV_CH, IMAGE_FEATURE_DIM), (1, IMAGE_FEATURE_DIM))
    t1_w, t1_b = lin(ks[2], TEXT_FEATURE_DIM, (TEXT_FEATURE_DIM, TEXT_H1), (1, TEXT_H1))
    t2_w, t2_b = lin(ks[3], TEXT_H1, (TEXT_H1, TEXT_H2), (1, TEXT_H2))
    c1_w, c1_b = lin(ks[4], FUSION_DIM, (FUSION_DIM, CLS_H), (1, CLS_H))
    c2_w, c2_b = lin(ks[5], CLS_H, (CLS_H, NUM_CLASSES), (1, NUM_CLASSES))
    return (conv_w, conv_b, proj_w, proj_b,
            t1_w, t1_b, t2_w, t2_b,
            c1_w, c1_b, c2_w, c2_b)


# =====================================================================================
# Wrapper
# =====================================================================================
@jax.jit
def multimodal_forward(images_nchw, text_features, params):
    (conv_w, conv_b, proj_w, proj_b,
     t1_w, t1_b, t2_w, t2_b,
     c1_w, c1_b, c2_w, c2_b) = params

    B, C, H, W = images_nchw.shape
    P = H * W
    b_pad = max(8, -(-B // 8) * 8)            # pad batch to a sublane multiple

    # ---- glue: NCHW -> NHWC, zero-pad spatially (3x3 "same") and channels 3 -> 8 ----
    x = jnp.transpose(images_nchw, (0, 2, 3, 1))
    xp = jnp.pad(x, ((0, 0), (1, 1), (1, 1), (0, C_PAD - C))).astype(jnp.bfloat16)

    # per-tap conv weights [9, C_PAD, CONV_CH] (zero rows for padded channels), bf16
    w_taps = jnp.pad(conv_w, ((0, 0), (0, 0), (0, C_PAD - C), (0, 0)))
    w_taps = w_taps.reshape(9, C_PAD, CONV_CH).astype(jnp.bfloat16)

    pooled = pl.pallas_call(
        functools.partial(conv_stem_kernel, H=H, W=W),
        out_shape=jax.ShapeDtypeStruct((B, 1, CONV_CH), jnp.float32),
        grid=(B,),
        in_specs=[
            pl.BlockSpec((1, H + 2, W + 2, C_PAD), lambda b: (b, 0, 0, 0)),
            pl.BlockSpec((9, C_PAD, CONV_CH), lambda b: (0, 0, 0)),   # weights resident
            pl.BlockSpec((1, CONV_CH), lambda b: (0, 0)),
        ],
        out_specs=pl.BlockSpec((1, 1, CONV_CH), lambda b: (b, 0, 0)),
        compiler_params=pltpu.CompilerParams(
            dimension_semantics=("parallel",),
            vmem_limit_bytes=32 * 1024 * 1024),
        cost_estimate=pl.CostEstimate(
            flops=B * (9 * 2 * P * C_PAD * CONV_CH + 2 * P * CONV_CH),
            transcendentals=0,
            bytes_accessed=(xp.size * 2 + w_taps.size * 2
                            + conv_b.size * 4 + B * CONV_CH * 4)),
    )(xp, w_taps, conv_b)
    pooled = pooled.reshape(B, CONV_CH)

    # ---- pad/align the tiny tail operands (M=B -> 8 rows, K=1000 -> 1024, N=17 -> 128)
    pooled_pad = jnp.pad(pooled, ((0, b_pad - B), (0, 0)))                   # f32
    txt = jnp.pad(text_features,
                  ((0, b_pad - B), (0, TEXT_PAD - TEXT_FEATURE_DIM))).astype(jnp.bfloat16)
    t1_w_p = jnp.pad(t1_w, ((0, TEXT_PAD - TEXT_FEATURE_DIM), (0, 0))).astype(jnp.bfloat16)
    c1_w_img = c1_w[:IMAGE_FEATURE_DIM].astype(jnp.bfloat16)                 # [512, 512]
    c1_w_txt = c1_w[IMAGE_FEATURE_DIM:].astype(jnp.bfloat16)                 # [256, 512]
    c2_w_p = jnp.pad(c2_w, ((0, 0), (0, OUT_PAD - NUM_CLASSES))).astype(jnp.bfloat16)
    c2_b_p = jnp.pad(c2_b, ((0, 0), (0, OUT_PAD - NUM_CLASSES)))

    inputs = (pooled_pad, proj_w.astype(jnp.bfloat16), proj_b,
              txt, t1_w_p, t1_b, t2_w.astype(jnp.bfloat16), t2_b,
              c1_w_img, c1_w_txt, c1_b, c2_w_p, c2_b_p)
    vmem = pl.BlockSpec(memory_space=pltpu.MemorySpace.VMEM)

    logits_pad = pl.pallas_call(
        tail_kernel,
        out_shape=jax.ShapeDtypeStruct((b_pad, OUT_PAD), jnp.float32),
        in_specs=[vmem] * len(inputs),
        out_specs=vmem,
        compiler_params=pltpu.CompilerParams(vmem_limit_bytes=32 * 1024 * 1024),
    )(*inputs)

    return logits_pad[:B, :NUM_CLASSES]


if __name__ == "__main__":
    key = jax.random.PRNGKey(0)
    k_img, k_txt, k_par = jax.random.split(key, 3)

    B, C, H, W = 2, 3, 16, 16
    images = jax.random.normal(k_img, (B, C, H, W), jnp.float32)        # NCHW like PyTorch
    text_features = jax.random.normal(k_txt, (B, TEXT_FEATURE_DIM), jnp.float32)
    params = init_params(k_par)

    logits = multimodal_forward(images, text_features, params)
    jax.block_until_ready(logits)
    assert logits.shape == (B, NUM_CLASSES)
    print("KERNEL_OK")
</pallas_src>

<mosaic_0001>
module attributes {stable_mosaic.version = 11 : i64} {
  func.func @conv_stem_kernel(%arg0: i32, %arg1: memref<1x18x18x8xbf16, #tpu.memory_space<vmem>>, %arg2: memref<9x8x32xbf16, #tpu.memory_space<vmem>>, %arg3: memref<1x32xf32, #tpu.memory_space<vmem>>, %arg4: memref<1x1x32xf32, #tpu.memory_space<vmem>>) attributes {dimension_semantics = [#tpu.dimension_semantics<parallel>], iteration_bounds = array<i64: 2>, scalar_prefetch = 0 : i64, scratch_operands = 0 : i64, tpu.core_type = #tpu.core_type<tc>, window_params = [{transform_indices = @transform_0, window_bounds = array<i64: 1, 18, 18, 8>}, {pipeline_mode = #tpu.pipeline_mode<synchronous>, transform_indices = @transform_1, window_bounds = array<i64: 9, 8, 32>}, {pipeline_mode = #tpu.pipeline_mode<synchronous>, transform_indices = @transform_2, window_bounds = array<i64: 1, 32>}, {transform_indices = @transform_3, window_bounds = array<i64: 1, 1, 32>}]} {
    %c0 = arith.constant 0 : index
    %c0_0 = arith.constant 0 : index
    %c0_1 = arith.constant 0 : index
    %c0_2 = arith.constant 0 : index
    %0 = vector.load %arg1[%c0, %c0_0, %c0_1, %c0_2] : memref<1x18x18x8xbf16, #tpu.memory_space<vmem>>, vector<1x18x18x8xbf16>
    %1 = vector.shape_cast %0 : vector<1x18x18x8xbf16> to vector<18x18x8xbf16>
    %cst = arith.constant 0.000000e+00 : f32
    %2 = vector.broadcast %cst : f32 to vector<256x32xf32>
    %3 = vector.extract_strided_slice %1 {offsets = [0, 0, 0], sizes = [16, 16, 8], strides = [1, 1, 1]} : vector<18x18x8xbf16> to vector<16x16x8xbf16>
    %4 = vector.shape_cast %3 : vector<16x16x8xbf16> to vector<256x8xbf16>
    %c0_3 = arith.constant 0 : index
    %c0_4 = arith.constant 0 : index
    %c0_5 = arith.constant 0 : index
    %5 = vector.load %arg2[%c0_3, %c0_4, %c0_5] : memref<9x8x32xbf16, #tpu.memory_space<vmem>>, vector<1x8x32xbf16>
    %6 = vector.shape_cast %5 : vector<1x8x32xbf16> to vector<8x32xbf16>
    %cst_6 = arith.constant dense<0.000000e+00> : vector<256x32xf32>
    %7 = tpu.matmul %4, %6, %cst_6 {dimension_numbers = #tpu.dot_dimension_numbers<[1], [0], [0], [1], [0, 0, 1, 1], [], []>} : vector<256x8xbf16>, vector<8x32xbf16>, vector<256x32xf32> -> vector<256x32xf32>
    %8 = arith.addf %2, %7 : vector<256x32xf32>
    %9 = vector.extract_strided_slice %1 {offsets = [0, 1, 0], sizes = [16, 16, 8], strides = [1, 1, 1]} : vector<18x18x8xbf16> to vector<16x16x8xbf16>
    %10 = vector.shape_cast %9 : vector<16x16x8xbf16> to vector<256x8xbf16>
    %c1 = arith.constant 1 : index
    %c0_7 = arith.constant 0 : index
    %c0_8 = arith.constant 0 : index
    %11 = vector.load %arg2[%c1, %c0_7, %c0_8] : memref<9x8x32xbf16, #tpu.memory_space<vmem>>, vector<1x8x32xbf16>
    %12 = vector.shape_cast %11 : vector<1x8x32xbf16> to vector<8x32xbf16>
    %cst_9 = arith.constant dense<0.000000e+00> : vector<256x32xf32>
    %13 = tpu.matmul %10, %12, %cst_9 {dimension_numbers = #tpu.dot_dimension_numbers<[1], [0], [0], [1], [0, 0, 1, 1], [], []>} : vector<256x8xbf16>, vector<8x32xbf16>, vector<256x32xf32> -> vector<256x32xf32>
    %14 = arith.addf %8, %13 : vector<256x32xf32>
    %15 = vector.extract_strided_slice %1 {offsets = [0, 2, 0], sizes = [16, 16, 8], strides = [1, 1, 1]} : vector<18x18x8xbf16> to vector<16x16x8xbf16>
    %16 = vector.shape_cast %15 : vector<16x16x8xbf16> to vector<256x8xbf16>
    %c2 = arith.constant 2 : index
    %c0_10 = arith.constant 0 : index
    %c0_11 = arith.constant 0 : index
    %17 = vector.load %arg2[%c2, %c0_10, %c0_11] : memref<9x8x32xbf16, #tpu.memory_space<vmem>>, vector<1x8x32xbf16>
    %18 = vector.shape_cast %17 : vector<1x8x32xbf16> to vector<8x32xbf16>
    %cst_12 = arith.constant dense<0.000000e+00> : vector<256x32xf32>
    %19 = tpu.matmul %16, %18, %cst_12 {dimension_numbers = #tpu.dot_dimension_numbers<[1], [0], [0], [1], [0, 0, 1, 1], [], []>} : vector<256x8xbf16>, vector<8x32xbf16>, vector<256x32xf32> -> vector<256x32xf32>
    %20 = arith.addf %14, %19 : vector<256x32xf32>
    %21 = vector.extract_strided_slice %1 {offsets = [1, 0, 0], sizes = [16, 16, 8], strides = [1, 1, 1]} : vector<18x18x8xbf16> to vector<16x16x8xbf16>
    %22 = vector.shape_cast %21 : vector<16x16x8xbf16> to vector<256x8xbf16>
    %c3 = arith.constant 3 : index
    %c0_13 = arith.constant 0 : index
    %c0_14 = arith.constant 0 : index
    %23 = vector.load %arg2[%c3, %c0_13, %c0_14] : memref<9x8x32xbf16, #tpu.memory_space<vmem>>, vector<1x8x32xbf16>
    %24 = vector.shape_cast %23 : vector<1x8x32xbf16> to vector<8x32xbf16>
    %cst_15 = arith.constant dense<0.000000e+00> : vector<256x32xf32>
    %25 = tpu.matmul %22, %24, %cst_15 {dimension_numbers = #tpu.dot_dimension_numbers<[1], [0], [0], [1], [0, 0, 1, 1], [], []>} : vector<256x8xbf16>, vector<8x32xbf16>, vector<256x32xf32> -> vector<256x32xf32>
    %26 = arith.addf %20, %25 : vector<256x32xf32>
    %27 = vector.extract_strided_slice %1 {offsets = [1, 1, 0], sizes = [16, 16, 8], strides = [1, 1, 1]} : vector<18x18x8xbf16> to vector<16x16x8xbf16>
    %28 = vector.shape_cast %27 : vector<16x16x8xbf16> to vector<256x8xbf16>
    %c4 = arith.constant 4 : index
    %c0_16 = arith.constant 0 : index
    %c0_17 = arith.constant 0 : index
    %29 = vector.load %arg2[%c4, %c0_16, %c0_17] : memref<9x8x32xbf16, #tpu.memory_space<vmem>>, vector<1x8x32xbf16>
    %30 = vector.shape_cast %29 : vector<1x8x32xbf16> to vector<8x32xbf16>
    %cst_18 = arith.constant dense<0.000000e+00> : vector<256x32xf32>
    %31 = tpu.matmul %28, %30, %cst_18 {dimension_numbers = #tpu.dot_dimension_numbers<[1], [0], [0], [1], [0, 0, 1, 1], [], []>} : vector<256x8xbf16>, vector<8x32xbf16>, vector<256x32xf32> -> vector<256x32xf32>
    %32 = arith.addf %26, %31 : vector<256x32xf32>
    %33 = vector.extract_strided_slice %1 {offsets = [1, 2, 0], sizes = [16, 16, 8], strides = [1, 1, 1]} : vector<18x18x8xbf16> to vector<16x16x8xbf16>
    %34 = vector.shape_cast %33 : vector<16x16x8xbf16> to vector<256x8xbf16>
    %c5 = arith.constant 5 : index
    %c0_19 = arith.constant 0 : index
    %c0_20 = arith.constant 0 : index
    %35 = vector.load %arg2[%c5, %c0_19, %c0_20] : memref<9x8x32xbf16, #tpu.memory_space<vmem>>, vector<1x8x32xbf16>
    %36 = vector.shape_cast %35 : vector<1x8x32xbf16> to vector<8x32xbf16>
    %cst_21 = arith.constant dense<0.000000e+00> : vector<256x32xf32>
    %37 = tpu.matmul %34, %36, %cst_21 {dimension_numbers = #tpu.dot_dimension_numbers<[1], [0], [0], [1], [0, 0, 1, 1], [], []>} : vector<256x8xbf16>, vector<8x32xbf16>, vector<256x32xf32> -> vector<256x32xf32>
    %38 = arith.addf %32, %37 : vector<256x32xf32>
    %39 = vector.extract_strided_slice %1 {offsets = [2, 0, 0], sizes = [16, 16, 8], strides = [1, 1, 1]} : vector<18x18x8xbf16> to vector<16x16x8xbf16>
    %40 = vector.shape_cast %39 : vector<16x16x8xbf16> to vector<256x8xbf16>
    %c6 = arith.constant 6 : index
    %c0_22 = arith.constant 0 : index
    %c0_23 = arith.constant 0 : index
    %41 = vector.load %arg2[%c6, %c0_22, %c0_23] : memref<9x8x32xbf16, #tpu.memory_space<vmem>>, vector<1x8x32xbf16>
    %42 = vector.shape_cast %41 : vector<1x8x32xbf16> to vector<8x32xbf16>
    %cst_24 = arith.constant dense<0.000000e+00> : vector<256x32xf32>
    %43 = tpu.matmul %40, %42, %cst_24 {dimension_numbers = #tpu.dot_dimension_numbers<[1], [0], [0], [1], [0, 0, 1, 1], [], []>} : vector<256x8xbf16>, vector<8x32xbf16>, vector<256x32xf32> -> vector<256x32xf32>
    %44 = arith.addf %38, %43 : vector<256x32xf32>
    %45 = vector.extract_strided_slice %1 {offsets = [2, 1, 0], sizes = [16, 16, 8], strides = [1, 1, 1]} : vector<18x18x8xbf16> to vector<16x16x8xbf16>
    %46 = vector.shape_cast %45 : vector<16x16x8xbf16> to vector<256x8xbf16>
    %c7 = arith.constant 7 : index
    %c0_25 = arith.constant 0 : index
    %c0_26 = arith.constant 0 : index
    %47 = vector.load %arg2[%c7, %c0_25, %c0_26] : memref<9x8x32xbf16, #tpu.memory_space<vmem>>, vector<1x8x32xbf16>
    %48 = vector.shape_cast %47 : vector<1x8x32xbf16> to vector<8x32xbf16>
    %cst_27 = arith.constant dense<0.000000e+00> : vector<256x32xf32>
    %49 = tpu.matmul %46, %48, %cst_27 {dimension_numbers = #tpu.dot_dimension_numbers<[1], [0], [0], [1], [0, 0, 1, 1], [], []>} : vector<256x8xbf16>, vector<8x32xbf16>, vector<256x32xf32> -> vector<256x32xf32>
    %50 = arith.addf %44, %49 : vector<256x32xf32>
    %51 = vector.extract_strided_slice %1 {offsets = [2, 2, 0], sizes = [16, 16, 8], strides = [1, 1, 1]} : vector<18x18x8xbf16> to vector<16x16x8xbf16>
    %52 = vector.shape_cast %51 : vector<16x16x8xbf16> to vector<256x8xbf16>
    %c8 = arith.constant 8 : index
    %c0_28 = arith.constant 0 : index
    %c0_29 = arith.constant 0 : index
    %53 = vector.load %arg2[%c8, %c0_28, %c0_29] : memref<9x8x32xbf16, #tpu.memory_space<vmem>>, vector<1x8x32xbf16>
    %54 = vector.shape_cast %53 : vector<1x8x32xbf16> to vector<8x32xbf16>
    %cst_30 = arith.constant dense<0.000000e+00> : vector<256x32xf32>
    %55 = tpu.matmul %52, %54, %cst_30 {dimension_numbers = #tpu.dot_dimension_numbers<[1], [0], [0], [1], [0, 0, 1, 1], [], []>} : vector<256x8xbf16>, vector<8x32xbf16>, vector<256x32xf32> -> vector<256x32xf32>
    %56 = arith.addf %50, %55 : vector<256x32xf32>
    %c0_31 = arith.constant 0 : index
    %c0_32 = arith.constant 0 : index
    %57 = vector.load %arg3[%c0_31, %c0_32] : memref<1x32xf32, #tpu.memory_space<vmem>>, vector<1x32xf32>
    %58 = vector.broadcast %57 : vector<1x32xf32> to vector<256x32xf32>
    %59 = arith.addf %56, %58 : vector<256x32xf32>
    %cst_33 = arith.constant 0.000000e+00 : f32
    %60 = vector.broadcast %cst_33 : f32 to vector<256x32xf32>
    %61 = arith.maximumf %59, %60 : vector<256x32xf32>
    %cst_34 = arith.constant 3.906250e-03 : f32
    %62 = vector.broadcast %cst_34 : f32 to vector<1x256xf32>
    %cst_35 = arith.constant dense<0.000000e+00> : vector<1x32xf32>
    %63 = tpu.matmul %62, %61, %cst_35 {dimension_numbers = #tpu.dot_dimension_numbers<[1], [0], [0], [1], [0, 0, 1, 1], [], []>} : vector<1x256xf32>, vector<256x32xf32>, vector<1x32xf32> -> vector<1x32xf32>
    %64 = vector.shape_cast %63 : vector<1x32xf32> to vector<1x1x32xf32>
    %c0_36 = arith.constant 0 : index
    %c0_37 = arith.constant 0 : index
    %c0_38 = arith.constant 0 : index
    %65 = vector.load %arg4[%c0_36, %c0_37, %c0_38] : memref<1x1x32xf32, #tpu.memory_space<vmem>>, vector<1x1x32xf32>
    tpu.vector_store %arg4[%c0_36, %c0_37, %c0_38], %64 {strides = array<i32>} : memref<1x1x32xf32, #tpu.memory_space<vmem>>, vector<1x1x32xf32>,
    return
  }
  func.func @transform_0(%arg0: i32) -> (i32, i32, i32, i32) {
    %c0_i32 = arith.constant 0 : i32
    %c0_i32_0 = arith.constant 0 : i32
    %c0_i32_1 = arith.constant 0 : i32
    %c0_i32_2 = arith.constant 0 : i32
    return %arg0, %c0_i32, %c0_i32_0, %c0_i32_1 : i32, i32, i32, i32
  }
  func.func @transform_1(%arg0: i32) -> (i32, i32, i32) {
    %c0_i32 = arith.constant 0 : i32
    %c0_i32_0 = arith.constant 0 : i32
    %c0_i32_1 = arith.constant 0 : i32
    %c0_i32_2 = arith.constant 0 : i32
    return %c0_i32, %c0_i32_0, %c0_i32_1 : i32, i32, i32
  }
  func.func @transform_2(%arg0: i32) -> (i32, i32) {
    %c0_i32 = arith.constant 0 : i32
    %c0_i32_0 = arith.constant 0 : i32
    %c0_i32_1 = arith.constant 0 : i32
    return %c0_i32, %c0_i32_0 : i32, i32
  }
  func.func @transform_3(%arg0: i32) -> (i32, i32, i32) {
    %c0_i32 = arith.constant 0 : i32
    %c0_i32_0 = arith.constant 0 : i32
    %c0_i32_1 = arith.constant 0 : i32
    return %arg0, %c0_i32, %c0_i32_0 : i32, i32, i32
  }
}

module attributes {stable_mosaic.version = 11 : i64} {
  func.func @tail_kernel(%arg0: memref<8x32xf32, #tpu.memory_space<vmem>>, %arg1: memref<32x512xbf16, #tpu.memory_space<vmem>>, %arg2: memref<1x512xf32, #tpu.memory_space<vmem>>, %arg3: memref<8x1024xbf16, #tpu.memory_space<vmem>>, %arg4: memref<1024x512xbf16, #tpu.memory_space<vmem>>, %arg5: memref<1x512xf32, #tpu.memory_space<vmem>>, %arg6: memref<512x256xbf16, #tpu.memory_space<vmem>>, %arg7: memref<1x256xf32, #tpu.memory_space<vmem>>, %arg8: memref<512x512xbf16, #tpu.memory_space<vmem>>, %arg9: memref<256x512xbf16, #tpu.memory_space<vmem>>, %arg10: memref<1x512xf32, #tpu.memory_space<vmem>>, %arg11: memref<512x128xbf16, #tpu.memory_space<vmem>>, %arg12: memref<1x128xf32, #tpu.memory_space<vmem>>, %arg13: memref<8x128xf32, #tpu.memory_space<vmem>>) attributes {dimension_semantics = [], scalar_prefetch = 0 : i64, scratch_operands = 0 : i64, tpu.core_type = #tpu.core_type<tc>} {
    %c0 = arith.constant 0 : index
    %c0_0 = arith.constant 0 : index
    %0 = vector.load %arg0[%c0, %c0_0] : memref<8x32xf32, #tpu.memory_space<vmem>>, vector<8x32xf32>
    %1 = arith.truncf %0 : vector<8x32xf32> to vector<8x32xbf16>
    %c0_1 = arith.constant 0 : index
    %c0_2 = arith.constant 0 : index
    %2 = vector.load %arg1[%c0_1, %c0_2] : memref<32x512xbf16, #tpu.memory_space<vmem>>, vector<32x512xbf16>
    %cst = arith.constant dense<0.000000e+00> : vector<8x512xf32>
    %3 = tpu.matmul %1, %2, %cst {dimension_numbers = #tpu.dot_dimension_numbers<[1], [0], [0], [1], [0, 0, 1, 1], [], []>} : vector<8x32xbf16>, vector<32x512xbf16>, vector<8x512xf32> -> vector<8x512xf32>
    %c0_3 = arith.constant 0 : index
    %c0_4 = arith.constant 0 : index
    %4 = vector.load %arg2[%c0_3, %c0_4] : memref<1x512xf32, #tpu.memory_space<vmem>>, vector<1x512xf32>
    %5 = vector.broadcast %4 : vector<1x512xf32> to vector<8x512xf32>
    %6 = arith.addf %3, %5 : vector<8x512xf32>
    %cst_5 = arith.constant 0.000000e+00 : f32
    %7 = vector.broadcast %cst_5 : f32 to vector<8x512xf32>
    %8 = arith.maximumf %6, %7 : vector<8x512xf32>
    %c0_6 = arith.constant 0 : index
    %c0_7 = arith.constant 0 : index
    %9 = vector.load %arg3[%c0_6, %c0_7] : memref<8x1024xbf16, #tpu.memory_space<vmem>>, vector<8x1024xbf16>
    %c0_8 = arith.constant 0 : index
    %c0_9 = arith.constant 0 : index
    %10 = vector.load %arg4[%c0_8, %c0_9] : memref<1024x512xbf16, #tpu.memory_space<vmem>>, vector<1024x512xbf16>
    %cst_10 = arith.constant dense<0.000000e+00> : vector<8x512xf32>
    %11 = tpu.matmul %9, %10, %cst_10 {dimension_numbers = #tpu.dot_dimension_numbers<[1], [0], [0], [1], [0, 0, 1, 1], [], []>} : vector<8x1024xbf16>, vector<1024x512xbf16>, vector<8x512xf32> -> vector<8x512xf32>
    %c0_11 = arith.constant 0 : index
    %c0_12 = arith.constant 0 : index
    %12 = vector.load %arg5[%c0_11, %c0_12] : memref<1x512xf32, #tpu.memory_space<vmem>>, vector<1x512xf32>
    %13 = vector.broadcast %12 : vector<1x512xf32> to vector<8x512xf32>
    %14 = arith.addf %11, %13 : vector<8x512xf32>
    %cst_13 = arith.constant 0.000000e+00 : f32
    %15 = vector.broadcast %cst_13 : f32 to vector<8x512xf32>
    %16 = arith.maximumf %14, %15 : vector<8x512xf32>
    %17 = arith.truncf %16 : vector<8x512xf32> to vector<8x512xbf16>
    %c0_14 = arith.constant 0 : index
    %c0_15 = arith.constant 0 : index
    %18 = vector.load %arg6[%c0_14, %c0_15] : memref<512x256xbf16, #tpu.memory_space<vmem>>, vector<512x256xbf16>
    %cst_16 = arith.constant dense<0.000000e+00> : vector<8x256xf32>
    %19 = tpu.matmul %17, %18, %cst_16 {dimension_numbers = #tpu.dot_dimension_numbers<[1], [0], [0], [1], [0, 0, 1, 1], [], []>} : vector<8x512xbf16>, vector<512x256xbf16>, vector<8x256xf32> -> vector<8x256xf32>
    %c0_17 = arith.constant 0 : index
    %c0_18 = arith.constant 0 : index
    %20 = vector.load %arg7[%c0_17, %c0_18] : memref<1x256xf32, #tpu.memory_space<vmem>>, vector<1x256xf32>
    %21 = vector.broadcast %20 : vector<1x256xf32> to vector<8x256xf32>
    %22 = arith.addf %19, %21 : vector<8x256xf32>
    %cst_19 = arith.constant 0.000000e+00 : f32
    %23 = vector.broadcast %cst_19 : f32 to vector<8x256xf32>
    %24 = arith.maximumf %22, %23 : vector<8x256xf32>
    %25 = arith.truncf %8 : vector<8x512xf32> to vector<8x512xbf16>
    %c0_20 = arith.constant 0 : index
    %c0_21 = arith.constant 0 : index
    %26 = vector.load %arg8[%c0_20, %c0_21] : memref<512x512xbf16, #tpu.memory_space<vmem>>, vector<512x512xbf16>
    %cst_22 = arith.constant dense<0.000000e+00> : vector<8x512xf32>
    %27 = tpu.matmul %25, %26, %cst_22 {dimension_numbers = #tpu.dot_dimension_numbers<[1], [0], [0], [1], [0, 0, 1, 1], [], []>} : vector<8x512xbf16>, vector<512x512xbf16>, vector<8x512xf32> -> vector<8x512xf32>
    %28 = arith.truncf %24 : vector<8x256xf32> to vector<8x256xbf16>
    %c0_23 = arith.constant 0 : index
    %c0_24 = arith.constant 0 : index
    %29 = vector.load %arg9[%c0_23, %c0_24] : memref<256x512xbf16, #tpu.memory_space<vmem>>, vector<256x512xbf16>
    %cst_25 = arith.constant dense<0.000000e+00> : vector<8x512xf32>
    %30 = tpu.matmul %28, %29, %cst_25 {dimension_numbers = #tpu.dot_dimension_numbers<[1], [0], [0], [1], [0, 0, 1, 1], [], []>} : vector<8x256xbf16>, vector<256x512xbf16>, vector<8x512xf32> -> vector<8x512xf32>
    %31 = arith.addf %27, %30 : vector<8x512xf32>
    %c0_26 = arith.constant 0 : index
    %c0_27 = arith.constant 0 : index
    %32 = vector.load %arg10[%c0_26, %c0_27] : memref<1x512xf32, #tpu.memory_space<vmem>>, vector<1x512xf32>
    %33 = vector.broadcast %32 : vector<1x512xf32> to vector<8x512xf32>
    %34 = arith.addf %31, %33 : vector<8x512xf32>
    %cst_28 = arith.constant 0.000000e+00 : f32
    %35 = vector.broadcast %cst_28 : f32 to vector<8x512xf32>
    %36 = arith.maximumf %34, %35 : vector<8x512xf32>
    %37 = arith.truncf %36 : vector<8x512xf32> to vector<8x512xbf16>
    %c0_29 = arith.constant 0 : index
    %c0_30 = arith.constant 0 : index
    %38 = vector.load %arg11[%c0_29, %c0_30] : memref<512x128xbf16, #tpu.memory_space<vmem>>, vector<512x128xbf16>
    %cst_31 = arith.constant dense<0.000000e+00> : vector<8x128xf32>
    %39 = tpu.matmul %37, %38, %cst_31 {dimension_numbers = #tpu.dot_dimension_numbers<[1], [0], [0], [1], [0, 0, 1, 1], [], []>} : vector<8x512xbf16>, vector<512x128xbf16>, vector<8x128xf32> -> vector<8x128xf32>
    %c0_32 = arith.constant 0 : index
    %c0_33 = arith.constant 0 : index
    %40 = vector.load %arg12[%c0_32, %c0_33] : memref<1x128xf32, #tpu.memory_space<vmem>>, vector<1x128xf32>
    %41 = vector.broadcast %40 : vector<1x128xf32> to vector<8x128xf32>
    %42 = arith.addf %39, %41 : vector<8x128xf32>
    %c0_34 = arith.constant 0 : index
    %c0_35 = arith.constant 0 : index
    %43 = vector.load %arg13[%c0_34, %c0_35] : memref<8x128xf32, #tpu.memory_space<vmem>>, vector<8x128xf32>
    tpu.vector_store %arg13[%c0_34, %c0_35], %42 {strides = array<i32>} : memref<8x128xf32, #tpu.memory_space<vmem>>, vector<8x128xf32>,
    return
  }
}

</mosaic_0001>

<bundles_post_ra>
// kernel: multimodal_forward.2
= control target key start
LH: loop header
LB: loop body
LE: loop exit
PB: predicated region body
PF: predicated region fallthrough
CT: control target
= control target key end

     0   :  { %s3869_s12 = smov 0   ;;  %s5332_s0 = inlined_call_operand.vmem [shape: bf16[2,18,18,8], index: 0, kind: input, shape index: {}]   ;;  %s5333_s1 = inlined_call_operand.vmem [shape: bf16[9,8,32], index: 1, kind: input, shape index: {}]   ;;  %s5334_s2 = inlined_call_operand.vmem [shape: f32[1,32], index: 2, kind: input, shape index: {}]   ;;  %s5335_s3 = inlined_call_operand.vmem [shape: f32[2,1,32], index: 3, kind: output, shape index: {}]  }
   0x1 LB: > { %s3073_s13 = sadd.s32 4294967295, %s3846_s12   ;;  %p3077_p0 = scmp.ge.s32.totalorder %s3846_s12, 1  ;;  %s3846_s12 = sphi %s3869_s12, %s13_s12  }
   0x2   : > { %p137_p1 = scmp.lt.s32.totalorder %s3846_s12, 3 }
   0x4   : > { %p138_p2 = pnand %p3077_p0, %p137_p1 }
   0x6   : > { %141 = sbr.rel (%p138_p2) target bundleno = 782 (0x30e), region = 32 }
   0xb   : > { %v3079_v0 = vld [vmem:[%s5333_s1 + $0x4] sm:$0xf]  ;;  %vm709_vm0 = vcmask 1043456   ;;  %p159_p3 = scmp.lt.s32.totalorder %s3073_s13, 1  ;;  %v222_v2 = vld [vmem:[%s5333_s1] sm:$0xf] }
   0xc   : > { %3802 = vmatprep.subr.msk.bf16.mxu0 %vm709_vm0, %v3079_v0  ;;  %3803 = vmatprep.subr.msk.bf16.mxu1 %vm709_vm0, %v3079_v0  ;;  %v711_v1 = vsel %vm709_vm0, %v3079_v0, 0  ;;  %v3160_v3 = vld [vmem:[%s5333_s1 + $0x8] sm:$0xf]  ;;  %vm223_vm1 = vsmask.f32 3328  ;;  %v3900_v4 = vsel %vm709_vm0, %v222_v2, 0 }
   0xd   : > { %3495 = vmatpush3.bf16.msra.mxu0 %v711_v1  ;;  %3801 = vmatpush3.bf16.msra.mxu1 %v711_v1  ;;  %s5503_s13 = smov (!%p159_p3, %s3073_s13), 1  ;;  %vm224_vm2 = vsmask.f32 7440  ;;  %vm660_vm3 = vcmask 64512   ;;  %v3926_v16 = vsel %vm709_vm0, %v3160_v3, 0  ;;  %vm1182_vm5 = vcmask 1042432  }
   0xe   : > { %3804 = vmatprep.subr.msk.bf16.mxu1 %vm709_vm0, %v222_v2  ;;  %3805 = vmatprep.subr.msk.bf16.mxu0 %vm709_vm0, %v3160_v3  ;;  %s3812_s20 = smul.u32 216, %s5503_s13  ;;  %v3931_v21 = vld [vmem:[%s5333_s1 + $0xc] sm:$0xf]  ;;  %vm3946_vm4 = vmor %vm223_vm1, %vm224_vm2  ;;  %vm1183_vm6 = vcmask 1046532   ;;  %s166_s15 = scalar_lea.vmem %s5335_s3, %s5503_s13  ;;  %vm3024_vm8 = vcmask 253952  }
   0xf   : > { %v3952_v36 = vsel %vm709_vm0, %v3931_v21, 0  ;;  %vm4294_vm7 = vmor %vm1182_vm5, %vm1183_vm6 }
  0x10   : > { %s3897_s23 = scalar_lea.vmem %s5332_s0, %s3812_s20 }
  0x11   : > { %v3903_v5 = vld [vmem:[%s3897_s23] sm:$0xf]  ;;  %v3906_v6 = vld [vmem:[%s3897_s23 + $0x4] sm:$0xf]  ;;  %v3909_v7 = vld [vmem:[%s3897_s23 + $0x8] sm:$0x1] }
  0x12   : > { %v227_v8 = vshrl.u32 %v3903_v5, 16  ;;  %v230_v9 = vshll.u32 %v3903_v5, 16  ;;  %v236_v10 = vshll.u32 %v3906_v6, 16  ;;  %v240_v11 = vshrl.u32 %v3906_v6, 16  ;;  %v3916_v12 = vld [vmem:[%s3897_s23 + $0x78] sm:$0xf] }
  0x13   : > { %v246_v13 = vshll.u32 %v3909_v7, 16  ;;  %v3920_v14 = vld [vmem:[%s3897_s23 + $0x7c] sm:$0xf]  ;;  %v3923_v15 = vld [vmem:[%s3897_s23 + $0x80] sm:$0x1]  ;;  %v467_v23 = vshrl.u32 %v3916_v12, 16 }
  0x14   : > { %5380 = vst [vmem:[#allocation2_spill] sm:$0xff] %v3923_v15  ;;  %v229_v17 = vrot.slane %v227_v8, 4  ;;  %v232_v18 = vrot.slane %v230_v9, 5  ;;  %v238_v19 = vrot.slane %v236_v10, 5  ;;  %v242_v20 = vrot.slane %v240_v11, 4 }
  0x15   : > { %v248_v22 = vrot.slane %v246_v13, 5  ;;  %v470_v24 = vshll.u32 %v3916_v12, 16  ;;  %v476_v25 = vshll.u32 %v3920_v14, 16  ;;  %v480_v28 = vshrl.u32 %v3920_v14, 16  ;;  %v3939_v30 = vld [vmem:[%s3897_s23 + $0xc] sm:$0xf] }
  0x16   : > { %v233_v26 = vor.u32 %v232_v18, %v229_v17  ;;  %v243_v27 = vor.u32 %v242_v20, %v238_v19  ;;  %v486_v29 = vshll.u32 %v3923_v15, 16  ;;  %v3942_v31 = vld [vmem:[%s3897_s23 + $0x10] sm:$0xf]  ;;  %v469_v33 = vrot.slane %v467_v23, 4  ;;  %v3955_v42 = vld [vmem:[%s3897_s23 + $0x14] sm:$0x1] }
  0x17   : > { %v472_v34 = vrot.slane %v470_v24, 5  ;;  %v478_v35 = vrot.slane %v476_v25, 5  ;;  %v482_v39 = vrot.slane %v480_v28, 4  ;;  %v251_v43 = vshrl.u32 %v3939_v30, 16  ;;  %v3966_v54 = vld [vmem:[%s3897_s23 + $0x84] sm:$0xf] }
  0x18   : > { %v234_v37 = vrot.slane %v233_v26, 4  ;;  %v244_v38 = vrot.slane %v243_v27, 4  ;;  %v488_v40 = vrot.slane %v486_v29, 5  ;;  %v254_v44 = vshll.u32 %v3939_v30, 16  ;;  %5383 = vst [vmem:[#allocation3_spill] sm:$0xff] %v3966_v54 }
  0x19   : > { %v473_v41 = vor.u32 %v472_v34, %v469_v33  ;;  %v260_v45 = vshll.u32 %v3942_v31, 16  ;;  %v483_v48 = vor.u32 %v482_v39, %v478_v35  ;;  %v264_v49 = vshrl.u32 %v3942_v31, 16  ;;  %v3970_v59 = vld [vmem:[%s3897_s23 + $0x88] sm:$0xf]  ;;  %v3977_v63 = vld [vmem:[%s3897_s23 + $0x8c] sm:$0x1] }
  0x1a   : > { %v239_v46 = vsel %vm3946_vm4, %v234_v37, %v238_v19  ;;  %v249_v47 = vsel %vm3946_vm4, %v244_v38, %v248_v22  ;;  %v253_v52 = vrot.slane %v251_v43, 4  ;;  %v256_v53 = vrot.slane %v254_v44, 5  ;;  %5384 = vst [vmem:[#allocation4_spill] sm:$0xff] %v3970_v59  ;;  %5385 = vst [vmem:[#allocation5_spill] sm:$0xff] %v3977_v63  ;;  %v3985_v9 = vld [vmem:[%s3897_s23 + $0x18] sm:$0xf] }
  0x1b   : > { %v3080_v50 = vcombine.low %v239_v46, %v249_v47  ;;  %v474_v51 = vrot.slane %v473_v41, 4  ;;  %v484_v55 = vrot.slane %v483_v48, 4  ;;  %v262_v56 = vrot.slane %v260_v45, 5  ;;  %v3994_v23 = vld [vmem:[%s3897_s23 + $0x1c] sm:$0xf] }
  0x1c   : > { %v266_v57 = vrot.slane %v264_v49, 4  ;;  %v270_v58 = vshll.u32 %v3955_v42, 16  ;;  %v257_v61 = vor.u32 %v256_v53, %v253_v52  ;;  %v491_v8 = vshrl.u32 %v3966_v54, 16  ;;  %v4001_v27 = vld [vmem:[%s3897_s23 + $0x20] sm:$0x1] }
  0x1d   : > { %3496 = vmatprep.mubr.msk.bf16.mxu0 %vm660_vm3, %v3080_v50  ;;  %v479_v60 = vsel %vm3946_vm4, %v474_v51, %v478_v35  ;;  %v489_v1 = vsel %vm3946_vm4, %v484_v55, %v488_v40  ;;  %v494_v13 = vshll.u32 %v3966_v54, 16  ;;  %v500_v17 = vshll.u32 %v3970_v59, 16  ;;  %v4008_v37 = vld [vmem:[%s3897_s23 + $0x90] sm:$0xf]  ;;  %v4021_v48 = vld [vmem:[%s3897_s23 + $0x94] sm:$0xf] }
  0x1e   : > { %v267_v2 = vor.u32 %v266_v57, %v262_v56  ;;  %v272_v3 = vrot.slane %v270_v58, 5  ;;  %v3987_v10 = vcombine.low %v479_v60, %v489_v1  ;;  %v258_v11 = vrot.slane %v257_v61, 4  ;;  %5387 = vst [vmem:[#allocation7_spill] sm:$0xff] %v4008_v37  ;;  %v4016_v43 = vld [vmem:[%s5333_s1 + $0x10] sm:$0xf]  ;;  %5389 = vst [vmem:[#allocation9_spill] sm:$0xff] %v4021_v48 }
  0x1f   : > { %v493_v19 = vrot.slane %v491_v8, 4  ;;  %v504_v20 = vshrl.u32 %v3970_v59, 16  ;;  %v510_v22 = vshll.u32 %v3977_v63, 16  ;;  %v496_v25 = vrot.slane %v494_v13, 5  ;;  %v4028_v58 = vld [vmem:[%s3897_s23 + $0x98] sm:$0x1] }
  0x20   : > { %5386 = vst [vmem:[#allocation6_spill] sm:$0xff] %v3987_v10  ;;  %v268_v18 = vrot.slane %v267_v2, 4  ;;  %3516 = vmatprep.mubr.msk.bf16.mxu1 %vm660_vm3, %v3987_v10  ;;  %v263_v24 = vsel %vm3946_vm4, %v258_v11, %v262_v56  ;;  %v502_v26 = vrot.slane %v500_v17, 5  ;;  %v275_v28 = vshrl.u32 %v3985_v9, 16  ;;  %5390 = vst [vmem:[#allocation10_spill] sm:$0xff] %v4028_v58 }
  0x21   : > { %v506_v33 = vrot.slane %v504_v20, 4  ;;  %v512_v34 = vrot.slane %v510_v22, 5  ;;  %v278_v35 = vshll.u32 %v3985_v9, 16  ;;  %v497_v39 = vor.u32 %v496_v25, %v493_v19  ;;  %v4043_v17 = vld [vmem:[%s3897_s23 + $0x28] sm:$0xf] }
  0x22   : > { %v273_v29 = vsel %vm3946_vm4, %v268_v18, %v272_v3  ;;  %v277_v40 = vrot.slane %v275_v28, 4  ;;  %v284_v41 = vshll.u32 %v3994_v23, 16  ;;  %v288_v46 = vshrl.u32 %v3994_v23, 16  ;;  %v4035_v3 = vld [vmem:[%s3897_s23 + $0x24] sm:$0xf] }
  0x23   : > { %v4010_v38 = vcombine.low %v263_v24, %v273_v29  ;;  %v507_v44 = vor.u32 %v506_v33, %v502_v26  ;;  %v280_v45 = vrot.slane %v278_v35, 5  ;;  %v294_v47 = vshll.u32 %v4001_v27, 16  ;;  %v4051_v28 = vld [vmem:[%s3897_s23 + $0x2c] sm:$0x1] }
  0x24   : > { %v498_v49 = vrot.slane %v497_v39, 4  ;;  %v286_v50 = vrot.slane %v284_v41, 5  ;;  %v515_v51 = vshrl.u32 %v4008_v37, 16  ;;  %v518_v52 = vshll.u32 %v4008_v37, 16 }
  0x25   : > { %5388 = vst [vmem:[#allocation8_spill] sm:$0xff] %v4010_v38  ;;  %3497 = vmatmul.mubr.msk.bf16.vlgmr.msra.gmra.mxu0 %vm660_vm3, %v4010_v38  ;;  %v508_v53 = vrot.slane %v507_v44, 4  ;;  %v281_v55 = vor.u32 %v280_v45, %v277_v40  ;;  %v290_v56 = vrot.slane %v288_v46, 4  ;;  %v296_v57 = vrot.slane %v294_v47, 5  ;;  %v4059_v40 = vld [vmem:[%s3897_s23 + $0x9c] sm:$0xf] }
  0x26   : > { %3563 = vmatpush3.bf16.msra.mxu0 %v3926_v16  ;;  %v503_v60 = vsel %vm3946_vm4, %v498_v49, %v502_v26  ;;  %v517_v61 = vrot.slane %v515_v51, 4  ;;  %v520_v1 = vrot.slane %v518_v52, 5  ;;  %v524_v2 = vshll.u32 %v4021_v48, 16  ;;  %5392 = vst [vmem:[#allocation12_spill] sm:$0xff] %v4059_v40  ;;  %v4065_v47 = vld [vmem:[%s3897_s23 + $0xa0] sm:$0xf] }
  0x27   : > { %3807 = vmatprep.subr.msk.bf16.mxu0 %vm709_vm0, %v4016_v43  ;;  %v513_v8 = vsel %vm3946_vm4, %v508_v53, %v512_v34  ;;  %v282_v11 = vrot.slane %v281_v55, 4  ;;  %v291_v13 = vor.u32 %v290_v56, %v286_v50  ;;  %v528_v16 = vshrl.u32 %v4021_v48, 16  ;;  %5393 = vst [vmem:[#allocation13_spill] sm:$0xff] %v4065_v47  ;;  %v4206_v38 = vld [vmem:[%s3897_s23 + $0x5c] sm:$0x1] }
  0x28   : > { %v4045_v18 = vcombine.low %v503_v60, %v513_v8  ;;  %v521_v19 = vor.u32 %v520_v1, %v517_v61  ;;  %v526_v20 = vrot.slane %v524_v2, 5  ;;  %v534_v22 = vshll.u32 %v4028_v58, 16 }
  0x29   : > { %v287_v24 = vsel %vm3946_vm4, %v282_v11, %v286_v50  ;;  %v292_v25 = vrot.slane %v291_v13, 4  ;;  %v530_v26 = vrot.slane %v528_v16, 4  ;;  %v299_v29 = vshrl.u32 %v4035_v3, 16 }
  0x2a   : > { %5391 = vst [vmem:[#allocation11_spill] sm:$0xff] %v4045_v18  ;;  %3517 = vmatmul.mubr.msk.bf16.vlgmr.msra.gmra.mxu1 %vm660_vm3, %v4045_v18  ;;  %v522_v33 = vrot.slane %v521_v19, 4  ;;  %v536_v34 = vrot.slane %v534_v22, 5  ;;  %v302_v35 = vshll.u32 %v4035_v3, 16  ;;  %v308_v39 = vshll.u32 %v4043_v17, 16 }
  0x2b   : > { %v297_v41 = vsel %vm3946_vm4, %v292_v25, %v296_v57  ;;  %v531_v44 = vor.u32 %v530_v26, %v526_v20  ;;  %v301_v45 = vrot.slane %v299_v29, 4  ;;  %v312_v46 = vshrl.u32 %v4043_v17, 16  ;;  %3529 = vmatpush3.bf16.msra.mxu1 %v3900_v4  ;;  %v4076_v57 = vld [vmem:[%s3897_s23 + $0xa4] sm:$0x1]  ;;  %v4090_v19 = vld [vmem:[%s3897_s23 + $0x34] sm:$0xf] }
  0x2c   : > { %v4068_v49 = vcombine.low %v287_v24, %v297_v41  ;;  %v527_v50 = vsel %vm3946_vm4, %v522_v33, %v526_v20  ;;  %v304_v51 = vrot.slane %v302_v35, 5  ;;  %v310_v52 = vrot.slane %v308_v39, 5  ;;  %3806 = vmatprep.subr.msk.bf16.mxu1 %vm709_vm0, %v3931_v21  ;;  %5395 = vst [vmem:[#allocation15_spill] sm:$0xff] %v4076_v57  ;;  %v4085_v21 = vld [vmem:[%s3897_s23 + $0x30] sm:$0xf] }
  0x2d   : > { %v532_v53 = vrot.slane %v531_v44, 4  ;;  %v314_v55 = vrot.slane %v312_v46, 4  ;;  %v318_v56 = vshll.u32 %v4051_v28, 16  ;;  %v539_v4 = vshrl.u32 %v4059_v40, 16  ;;  %v4101_v41 = vld [vmem:[%s3897_s23 + $0x38] sm:$0x1] }
  0x2e   : > { %5394 = vst [vmem:[#allocation14_spill] sm:$0xff] %v4068_v49  ;;  %3500 = vmatprep.mubr.msk.bf16.mxu0 %vm660_vm3, %v4068_v49  ;;  %v305_v60 = vor.u32 %v304_v51, %v301_v45  ;;  %v542_v61 = vshll.u32 %v4059_v40, 16  ;;  %v548_v1 = vshll.u32 %v4065_v47, 16  ;;  %v552_v2 = vshrl.u32 %v4065_v47, 16  ;;  %v4106_v46 = vld [vmem:[%s3897_s23 + $0xa8] sm:$0xf] }
  0x2f   : > { %v537_v8 = vsel %vm3946_vm4, %v532_v53, %v536_v34  ;;  %v315_v11 = vor.u32 %v314_v55, %v310_v52  ;;  %v320_v13 = vrot.slane %v318_v56, 5  ;;  %v541_v16 = vrot.slane %v539_v4, 4  ;;  %v4111_v56 = vld [vmem:[%s3897_s23 + $0xac] sm:$0xf]  ;;  %v4266_v47 = vld [vmem:[%s3897_s23 + $0x74] sm:$0x1] }
  0x30   : > { %v4092_v20 = vcombine.low %v527_v50, %v537_v8  ;;  %v306_v22 = vrot.slane %v305_v60, 4  ;;  %v544_v24 = vrot.slane %v542_v61, 5  ;;  %v550_v25 = vrot.slane %v548_v1, 5 }
  0x31   : > { %v316_v26 = vrot.slane %v315_v11, 4  ;;  %v554_v29 = vrot.slane %v552_v2, 4  ;;  %v558_v33 = vshll.u32 %v4076_v57, 16  ;;  %v323_v35 = vshrl.u32 %v4085_v21, 16 }
  0x32   : > { %5396 = vst [vmem:[#allocation16_spill] sm:$0xff] %v4092_v20  ;;  %3520 = vmatprep.mubr.msk.bf16.mxu1 %vm660_vm3, %v4092_v20  ;;  %v311_v34 = vsel %vm3946_vm4, %v306_v22, %v310_v52  ;;  %v545_v39 = vor.u32 %v544_v24, %v541_v16  ;;  %v326_v44 = vshll.u32 %v4085_v21, 16  ;;  %v332_v45 = vshll.u32 %v4090_v19, 16  ;;  %v4123_v22 = vld [vmem:[%s3897_s23 + $0xb0] sm:$0x1] }
  0x33   : > { %v321_v50 = vsel %vm3946_vm4, %v316_v26, %v320_v13  ;;  %v555_v51 = vor.u32 %v554_v29, %v550_v25  ;;  %v560_v53 = vrot.slane %v558_v33, 5  ;;  %v325_v55 = vrot.slane %v323_v35, 4  ;;  %v4128_v29 = vld [vmem:[%s3897_s23 + $0x3c] sm:$0xf]  ;;  %v4157_v20 = vld [vmem:[%s3897_s23 + $0xb8] sm:$0xf] }
  0x34   : > { %v4113_v52 = vcombine.low %v311_v34, %v321_v50  ;;  %v546_v4 = vrot.slane %v545_v39, 4  ;;  %v328_v60 = vrot.slane %v326_v44, 5  ;;  %v334_v61 = vrot.slane %v332_v45, 5  ;;  %v4133_v44 = vld [vmem:[%s3897_s23 + $0x40] sm:$0xf] }
  0x35   : > { %v556_v1 = vrot.slane %v555_v51, 4  ;;  %v336_v2 = vshrl.u32 %v4090_v19, 16  ;;  %v342_v8 = vshll.u32 %v4101_v41, 16  ;;  %v563_v11 = vshrl.u32 %v4106_v46, 16 }
  0x36   : > { %5397 = vst [vmem:[#allocation17_spill] sm:$0xff] %v4113_v52  ;;  %3501 = vmatmul.mubr.msk.bf16.gmra.mxu0 %vm660_vm3, %v4113_v52  ;;  %v551_v13 = vsel %vm3946_vm4, %v546_v4, %v550_v25  ;;  %v329_v16 = vor.u32 %v328_v60, %v325_v55  ;;  %v566_v24 = vshll.u32 %v4106_v46, 16  ;;  %v572_v26 = vshll.u32 %v4111_v56, 16 }
  0x37   : > { %v561_v33 = vsel %vm3946_vm4, %v556_v1, %v560_v53  ;;  %v338_v35 = vrot.slane %v336_v2, 4  ;;  %v344_v34 = vrot.slane %v342_v8, 5  ;;  %v565_v39 = vrot.slane %v563_v11, 4  ;;  %v4145_v2 = vld [vmem:[%s3897_s23 + $0x44] sm:$0x1] }
  0x38   : > { %v4135_v25 = vcombine.low %v551_v13, %v561_v33  ;;  %v330_v45 = vrot.slane %v329_v16, 4  ;;  %v568_v50 = vrot.slane %v566_v24, 5  ;;  %v574_v51 = vrot.slane %v572_v26, 5  ;;  %v4150_v13 = vld [vmem:[%s3897_s23 + $0xb4] sm:$0xf] }
  0x39   : > { %v339_v55 = vor.u32 %v338_v35, %v334_v61  ;;  %v576_v4 = vshrl.u32 %v4111_v56, 16  ;;  %v582_v60 = vshll.u32 %v4123_v22, 16  ;;  %v347_v62 = vshrl.u32 %v4128_v29, 16 }
  0x3a   : > { %5398 = vst [vmem:[#allocation18_spill] sm:$0xff] %v4135_v25  ;;  %3521 = vmatmul.mubr.msk.bf16.gmra.mxu1 %vm660_vm3, %v4135_v25  ;;  %v335_v53 = vsel %vm3946_vm4, %v330_v45, %v334_v61  ;;  %v569_v1 = vor.u32 %v568_v50, %v565_v39  ;;  %v350_v8 = vshll.u32 %v4128_v29, 16  ;;  %v356_v11 = vshll.u32 %v4133_v44, 16 }
  0x3b   : > { %v340_v16 = vrot.slane %v339_v55, 4  ;;  %v578_v24 = vrot.slane %v576_v4, 4  ;;  %v584_v26 = vrot.slane %v582_v60, 5  ;;  %v349_v33 = vrot.slane %v347_v62, 4 }
  0x3c   : > { %v570_v35 = vrot.slane %v569_v1, 4  ;;  %v352_v0 = vrot.slane %v350_v8, 5  ;;  %v358_v25 = vrot.slane %v356_v11, 5  ;;  %v360_v61 = vshrl.u32 %v4133_v44, 16  ;;  %v4165_v8 = vld [vmem:[%s3897_s23 + $0xbc] sm:$0x1] }
  0x3d   : > { %v345_v39 = vsel %vm3946_vm4, %v340_v16, %v344_v34  ;;  %v579_v45 = vor.u32 %v578_v24, %v574_v51  ;;  %v366_v50 = vshll.u32 %v4145_v2, 16  ;;  %v587_v55 = vshrl.u32 %v4150_v13, 16  ;;  %v4168_v11 = vld [vmem:[%s3897_s23 + $0x48] sm:$0xf] }
  0x3e   : > { %v4160_v4 = vcombine.low %v335_v53, %v345_v39  ;;  %v575_v62 = vsel %vm3946_vm4, %v570_v35, %v574_v51  ;;  %v353_v60 = vor.u32 %v352_v0, %v349_v33  ;;  %v362_v1 = vrot.slane %v360_v61, 4 }
  0x3f   : > { %v580_v34 = vrot.slane %v579_v45, 4  ;;  %v368_v16 = vrot.slane %v366_v50, 5  ;;  %v589_v24 = vrot.slane %v587_v55, 4  ;;  %v590_v18 = vshll.u32 %v4150_v13, 16  ;;  %v4179_v45 = vld [vmem:[%s3897_s23 + $0x4c] sm:$0xf] }
  0x40   : > { %5399 = vst [vmem:[#allocation19_spill] sm:$0xff] %v4160_v4  ;;  %3504 = vmatprep.mubr.msk.bf16.mxu0 %vm660_vm3, %v4160_v4  ;;  %v354_v53 = vrot.slane %v353_v60, 4  ;;  %v363_v39 = vor.u32 %v362_v1, %v358_v25  ;;  %v596_v51 = vshll.u32 %v4157_v20, 16  ;;  %v600_v0 = vshrl.u32 %v4157_v20, 16  ;;  %v4187_v4 = vld [vmem:[%s3897_s23 + $0x50] sm:$0x1] }
  0x41   : > { %v585_v33 = vsel %vm3946_vm4, %v580_v34, %v584_v26  ;;  %v592_v35 = vrot.slane %v590_v18, 5  ;;  %v606_v61 = vshll.u32 %v4165_v8, 16  ;;  %v371_v50 = vshrl.u32 %v4168_v11, 16  ;;  %v4190_v34 = vld [vmem:[%s3897_s23 + $0x54] sm:$0xf] }
  0x42   : > { %v4182_v55 = vcombine.low %v575_v62, %v585_v33  ;;  %v359_v60 = vsel %vm3946_vm4, %v354_v53, %v358_v25  ;;  %v364_v1 = vrot.slane %v363_v39, 4  ;;  %v598_v10 = vrot.slane %v596_v51, 5 }
  0x43   : > { %v593_v52 = vor.u32 %v592_v35, %v589_v24  ;;  %v602_v49 = vrot.slane %v600_v0, 4  ;;  %v608_v26 = vrot.slane %v606_v61, 5  ;;  %v373_v18 = vrot.slane %v371_v50, 4  ;;  %v4203_v35 = vld [vmem:[%s3897_s23 + $0x58] sm:$0xf] }
  0x44   : > { %5400 = vst [vmem:[#allocation20_spill] sm:$0xff] %v4182_v55  ;;  %3524 = vmatprep.mubr.msk.bf16.mxu1 %vm660_vm3, %v4182_v55  ;;  %v369_v62 = vsel %vm3946_vm4, %v364_v1, %v368_v16  ;;  %v374_v25 = vshll.u32 %v4168_v11, 16  ;;  %v380_v53 = vshll.u32 %v4179_v45, 16  ;;  %v384_v39 = vshrl.u32 %v4179_v45, 16 }
  0x45   : > { %v4199_v51 = vcombine.low %v359_v60, %v369_v62  ;;  %v594_v24 = vrot.slane %v593_v52, 4  ;;  %v603_v0 = vor.u32 %v602_v49, %v598_v10  ;;  %v390_v33 = vshll.u32 %v4187_v4, 16 }
  0x46   : > { %v376_v61 = vrot.slane %v374_v25, 5  ;;  %v382_v50 = vrot.slane %v380_v53, 5  ;;  %v386_v55 = vrot.slane %v384_v39, 4  ;;  %v395_v16 = vshrl.u32 %v4190_v34, 16 }
  0x47   : > { %5401 = vst [vmem:[#allocation21_spill] sm:$0xff] %v4199_v51  ;;  %3505 = vmatmul.mubr.msk.bf16.gmra.mxu0 %vm660_vm3, %v4199_v51  ;;  %v599_v60 = vsel %vm3946_vm4, %v594_v24, %v598_v10  ;;  %v604_v52 = vrot.slane %v603_v0, 4  ;;  %v392_v49 = vrot.slane %v390_v33, 5  ;;  %v398_v1 = vshll.u32 %v4190_v34, 16  ;;  %v4220_v10 = vld [vmem:[%s3897_s23 + $0x60] sm:$0xf] }
  0x48   : > { %v377_v62 = vor.u32 %v376_v61, %v373_v18  ;;  %v387_v25 = vor.u32 %v386_v55, %v382_v50  ;;  %v397_v53 = vrot.slane %v395_v16, 4  ;;  %v404_v39 = vshll.u32 %v4203_v35, 16  ;;  %v4225_v55 = vld [vmem:[%s3897_s23 + $0x64] sm:$0xf] }
  0x49   : > { %v609_v57 = vsel %vm3946_vm4, %v604_v52, %v608_v26  ;;  %v400_v58 = vrot.slane %v398_v1, 5  ;;  %v408_v51 = vshrl.u32 %v4203_v35, 16  ;;  %v414_v63 = vshll.u32 %v4206_v38, 16  ;;  %v4232_v1 = vld [vmem:[%s3897_s23 + $0x68] sm:$0x1] }
  0x4a   : > { %v4222_v24 = vcombine.low %v599_v60, %v609_v57  ;;  %v378_v0 = vrot.slane %v377_v62, 4  ;;  %v388_v33 = vrot.slane %v387_v25, 4  ;;  %v406_v18 = vrot.slane %v404_v39, 5 }
  0x4b   : > { %v401_v61 = vor.u32 %v400_v58, %v397_v53  ;;  %v410_v26 = vrot.slane %v408_v51, 4  ;;  %v416_v16 = vrot.slane %v414_v63, 5  ;;  %v4229_v52 = vcombine.low %v3939_v30, %v3942_v31 }
  0x4c   : > { %5402 = vst [vmem:[#allocation22_spill] sm:$0xff] %v4222_v24  ;;  %3525 = vmatmul.mubr.msk.bf16.gmra.mxu1 %vm660_vm3, %v4222_v24  ;;  %v383_v57 = vsel %vm3946_vm4, %v378_v0, %v382_v50  ;;  %v393_v60 = vsel %vm3946_vm4, %v388_v33, %v392_v49  ;;  %v419_v58 = vshrl.u32 %v4220_v10, 16  ;;  %v422_v63 = vshll.u32 %v4220_v10, 16  ;;  %v4250_v50 = vld [vmem:[%s3897_s23 + $0x6c] sm:$0xf] }
  0x4d   : > { %v4242_v51 = vcombine.low %v383_v57, %v393_v60  ;;  %v5404_v62 = vcombine.low %v3903_v5, %v3906_v6  ;;  %v402_v25 = vrot.slane %v401_v61, 4  ;;  %v411_v53 = vor.u32 %v410_v26, %v406_v18  ;;  %v4255_v57 = vld [vmem:[%s3897_s23 + $0x70] sm:$0xf] }
  0x4e   : > { %v428_v39 = vshll.u32 %v4225_v55, 16  ;;  %v421_v0 = vrot.slane %v419_v58, 4  ;;  %v424_v49 = vrot.slane %v422_v63, 5  ;;  %v432_v33 = vshrl.u32 %v4225_v55, 16 }
  0x4f   : > { %5403 = vst [vmem:[#allocation23_spill] sm:$0xff] %v4242_v51  ;;  %3530 = vmatprep.mubr.msk.bf16.mxu1 %vm660_vm3, %v5404_v62  ;;  %v438_v24 = vshll.u32 %v4232_v1, 16  ;;  %3508 = vmatprep.mubr.msk.bf16.mxu0 %vm660_vm3, %v4242_v51  ;;  %v407_v61 = vsel %vm3946_vm4, %v402_v25, %v406_v18  ;;  %v412_v26 = vrot.slane %v411_v53, 4  ;;  %v4263_v62 = vcombine.low %v3985_v9, %v3994_v23 }
  0x50   : > { %v430_v60 = vrot.slane %v428_v39, 5  ;;  %v425_v58 = vor.u32 %v424_v49, %v421_v0  ;;  %v434_v63 = vrot.slane %v432_v33, 4  ;;  %v443_v15 = vshrl.u32 %v4250_v50, 16 }
  0x51   : > { %v440_v40 = vrot.slane %v438_v24, 5  ;;  %v417_v37 = vsel %vm3946_vm4, %v412_v26, %v416_v16  ;;  %v446_v51 = vshll.u32 %v4250_v50, 16  ;;  %v452_v18 = vshll.u32 %v4255_v57, 16  ;;  %v4280_v16 = vld [vmem:[%s5333_s1 + $0x14] sm:$0xf] }
  0x52   : > { %v456_v25 = vshrl.u32 %v4255_v57, 16  ;;  %v4274_v53 = vcombine.low %v407_v61, %v417_v37  ;;  %v426_v39 = vrot.slane %v425_v58, 4  ;;  %v435_v48 = vor.u32 %v434_v63, %v430_v60 }
  0x53   : > { %v445_v0 = vrot.slane %v443_v15, 4  ;;  %v448_v49 = vrot.slane %v446_v51, 5  ;;  %v454_v24 = vrot.slane %v452_v18, 5  ;;  %v462_v54 = vshll.u32 %v4266_v47, 16 }
  0x54   : > { %v458_v33 = vrot.slane %v456_v25, 4  ;;  %v1190_v26 = vrot.slane %v3909_v7, 5  ;;  %v1197_v59 = vrot.slane %v3955_v42, 5  ;;  %3509 = vmatmul.mubr.msk.bf16.gmra.mxu0 %vm660_vm3, %v4274_v53  ;;  %3531 = vmatmul.mubr.msk.bf16.vlgmr.msra.gmra.mxu1 %vm660_vm3, %v4229_v52  ;;  %v431_v15 = vsel %vm3946_vm4, %v426_v39, %v430_v60 }
  0x55   : > { %v436_v37 = vrot.slane %v435_v48, 4  ;;  %3534 = vmatprep.mubr.msk.bf16.mxu1 %vm660_vm3, %v4263_v62  ;;  %v449_v51 = vor.u32 %v448_v49, %v445_v0  ;;  %v464_v58 = vrot.slane %v462_v54, 5  ;;  %v5405_v7 = vmov 0  ;;  %3597 = vmatpush3.bf16.msra.mxu1 %v3952_v36 }
  0x56   : > { %v459_v61 = vor.u32 %v458_v33, %v454_v24  ;;  %v5406_v7 = vsel %vm4294_vm7, 4294967295, %v5405_v7  ;;  %v3144_v42 = vrot.slane %v3903_v5, 9  ;;  %v4304_v48 = vcombine.low %v4035_v3, %v4043_v17  ;;  %3808 = vmatprep.subr.msk.bf16.mxu1 %vm709_vm0, %v4280_v16 }
  0x57   : > { %5407 = vst [vmem:[#allocation24_spill] sm:$0xff] %v5406_v7  ;;  %v441_v60 = vsel %vm3946_vm4, %v436_v37, %v440_v40  ;;  %v1187_v63 = vrot.slane %v3906_v6, 5  ;;  %v3145_v54 = vrot.slane %v3939_v30, 9  ;;  %v450_v25 = vrot.slane %v449_v51, 4 }
  0x58   : > { %v4310_v18 = vcombine.low %v431_v15, %v441_v60  ;;  %v460_v5 = vrot.slane %v459_v61, 4  ;;  %v5408_v36 = vrot.slane %v3942_v31, 5  ;;  %v4316_v40 = vcombine.low %v4085_v21, %v4090_v19 }
  0x59   : > { %v1188_v0 = vsel %vm4294_vm7, %v3144_v42, %v1187_v63  ;;  %v1189_v6 = vrot.slane %v1187_v63, 4  ;;  %v455_v33 = vsel %vm3946_vm4, %v450_v25, %v454_v24  ;;  %v3146_v51 = vrot.slane %v3985_v9, 9 }
  0x5a   : > { %v1196_v39 = vrot.slane %v5408_v36, 4  ;;  %v5409_v30 = vmov %v5408_v36  ;;  %3512 = vmatprep.mubr.msk.bf16.mxu0 %vm660_vm3, %v4310_v18  ;;  %v465_v15 = vsel %vm3946_vm4, %v460_v5, %v464_v58  ;;  %v1201_v60 = vrot.slane %v3994_v23, 5 }
  0x5b   : > { %v1195_v49 = vsel %vm4294_vm7, %v3145_v54, %v5409_v30  ;;  %v4333_v61 = vcombine.low %v455_v33, %v465_v15  ;;  %v1191_v31 = vsel %vm4294_vm7, %v1189_v6, %v1190_v26  ;;  %v1204_v24 = vrot.slane %v4001_v27, 5 }
  0x5c   : > { %v1198_v37 = vsel %vm4294_vm7, %v1196_v39, %v1197_v59  ;;  %v3161_v63 = vcombine.low %v1188_v0, %v1191_v31  ;;  %3535 = vmatmul.mubr.msk.bf16.gmra.mxu1 %vm660_vm3, %v4304_v48  ;;  %v1203_v59 = vrot.slane %v1201_v60, 4  ;;  %v1208_v9 = vrot.slane %v4043_v17, 5 }
  0x5d   : > { %v4337_v42 = vcombine.low %v1195_v49, %v1198_v37  ;;  %3513 = vmatmul.mubr.msk.bf16.gmra.mxu0 %vm660_vm3, %v4333_v61  ;;  %3538 = vmatprep.mubr.msk.bf16.mxu1 %vm660_vm3, %v4316_v40  ;;  %v1202_v23 = vsel %vm4294_vm7, %v3146_v51, %v1201_v60  ;;  %v1215_v26 = vrot.slane %v4090_v19, 5  ;;  %v4356_v58 = vcombine.low %v4128_v29, %v4133_v44 }
  0x5e   : > { %3564 = vmatprep.mubr.msk.bf16.mxu0 %vm660_vm3, %v3161_v63  ;;  %v1205_v27 = vsel %vm4294_vm7, %v1203_v59, %v1204_v24  ;;  %v4360_v54 = vcombine.low %v4168_v11, %v4179_v45  ;;  %v3147_v17 = vrot.slane %v4035_v3, 9  ;;  %v1210_v5 = vrot.slane %v1208_v9, 4  ;;  %v4378_v3 = vld [vmem:[%s5333_s1 + $0x18] sm:$0xf] }
  0x5f   : > { %v4362_v25 = vcombine.low %v1202_v23, %v1205_v27  ;;  %v1211_v36 = vrot.slane %v4051_v28, 5  ;;  %v3148_v39 = vrot.slane %v4085_v21, 9  ;;  %v1217_v0 = vrot.slane %v1215_v26, 4 }
  0x60   : > { %v1218_v19 = vrot.slane %v4101_v41, 5  ;;  %v1830_v6 = vsel %vm709_vm0, %v4016_v43, 0  ;;  %v1222_v30 = vrot.slane %v4133_v44, 5  ;;  %v1209_v43 = vsel %vm4294_vm7, %v3147_v17, %v1208_v9 }
  0x61   : > { %v1212_v28 = vsel %vm4294_vm7, %v1210_v5, %v1211_v36  ;;  %v1229_v21 = vrot.slane %v4179_v45, 5  ;;  %v1216_v41 = vsel %vm4294_vm7, %v3148_v39, %v1215_v26  ;;  %v4395_v49 = vcombine.low %v4190_v34, %v4203_v35 }
  0x62   : > { %v1219_v44 = vsel %vm4294_vm7, %v1217_v0, %v1218_v19  ;;  %v4399_v33 = vcombine.low %v4220_v10, %v4225_v55  ;;  %v3149_v15 = vrot.slane %v4128_v29, 9  ;;  %v4404_v45 = vcombine.low %v1209_v43, %v1212_v28 }
  0x63   : > { %v1224_v37 = vrot.slane %v1222_v30, 4  ;;  %v1225_v51 = vrot.slane %v4145_v2, 5  ;;  %v4409_v31 = vcombine.low %v4106_v46, %v4111_v56  ;;  %v4411_v60 = vcombine.low %v1216_v41, %v1219_v44 }
  0x64   : > { %3539 = vmatmul.mubr.msk.bf16.gmra.mxu1 %vm660_vm3, %v4356_v58  ;;  %v3150_v63 = vrot.slane %v4168_v11, 9  ;;  %v1231_v24 = vrot.slane %v1229_v21, 4  ;;  %v1232_v59 = vrot.slane %v4187_v4, 5  ;;  %v4417_v29 = vcombine.low %v4150_v13, %v4157_v20 }
  0x65   : > { %3565 = vmatmul.mubr.msk.bf16.vlgmr.msra.gmra.mxu0 %vm660_vm3, %v4337_v42  ;;  %3542 = vmatprep.mubr.msk.bf16.mxu1 %vm660_vm3, %v4360_v54  ;;  %v1223_v2 = vsel %vm4294_vm7, %v3149_v15, %v1222_v30  ;;  %v1226_v9 = vsel %vm4294_vm7, %v1224_v37, %v1225_v51  ;;  %v1236_v23 = vrot.slane %v4203_v35, 5  ;;  %v1243_v27 = vrot.slane %v4225_v55, 5 }
  0x66   : > { %3568 = vmatprep.mubr.msk.bf16.mxu0 %vm660_vm3, %v4362_v25  ;;  %3631 = vmatpush3.bf16.msra.mxu0 %v1830_v6  ;;  %v1230_v4 = vsel %vm4294_vm7, %v3150_v63, %v1229_v21  ;;  %v1233_v11 = vsel %vm4294_vm7, %v1231_v24, %v1232_v59  ;;  %v4439_v26 = vcombine.low %v4250_v50, %v4255_v57  ;;  %v3151_v36 = vrot.slane %v4190_v34, 9  ;;  %v5411_v24 = vld [vmem:[#allocation4_spill] sm:$0xff]  ;;  %v5412_v59 = vld [vmem:[#allocation3_spill] sm:$0xff] }
  0x67   : > { %3809 = vmatprep.subr.msk.bf16.mxu0 %vm709_vm0, %v4378_v3  ;;  %v4441_v17 = vcombine.low %v1223_v2, %v1226_v9  ;;  %v4445_v5 = vcombine.low %v3916_v12, %v3920_v14  ;;  %v1239_v39 = vrot.slane %v4206_v38, 5  ;;  %v4449_v0 = vcombine.low %v1230_v4, %v1233_v11  ;;  %v5413_v9 = vld [vmem:[#allocation9_spill] sm:$0xff]  ;;  %v5414_v4 = vld [vmem:[#allocation7_spill] sm:$0xff] }
  0x68   : > { %v3152_v35 = vrot.slane %v4220_v10, 9  ;;  %v3158_v55 = vrot.slane %v4106_v46, 9  ;;  %v1285_v19 = vrot.slane %v4111_v56, 5  ;;  %v1238_v6 = vrot.slane %v1236_v23, 4 }
  0x69   : > { %v1245_v30 = vrot.slane %v1243_v27, 4  ;;  %v1246_v43 = vrot.slane %v4232_v1, 5  ;;  %v1288_v28 = vrot.slane %v4123_v22, 5  ;;  %v3159_v38 = vrot.slane %v4150_v13, 9 }
  0x6a   : > { %v1286_v21 = vsel %vm4294_vm7, %v3158_v55, %v1285_v19  ;;  %v1287_v34 = vrot.slane %v1285_v19, 4  ;;  %v1292_v41 = vrot.slane %v4157_v20, 5  ;;  %v1295_v10 = vrot.slane %v4165_v8, 5 }
  0x6b   : > { %v1237_v20 = vsel %vm4294_vm7, %v3151_v36, %v1236_v23  ;;  %v1240_v13 = vsel %vm4294_vm7, %v1238_v6, %v1239_v39  ;;  %v1250_v8 = vrot.slane %v4255_v57, 5  ;;  %v1244_v44 = vsel %vm4294_vm7, %v3152_v35, %v1243_v27  ;;  %v5415_v39 = vld [vmem:[#allocation2_spill] sm:$0xff] }
  0x6c   : > { %3543 = vmatmul.mubr.msk.bf16.gmra.mxu1 %vm660_vm3, %v4395_v49  ;;  %v1289_v46 = vsel %vm4294_vm7, %v1287_v34, %v1288_v28  ;;  %v1293_v56 = vsel %vm4294_vm7, %v3159_v38, %v1292_v41  ;;  %v1294_v22 = vrot.slane %v1292_v41, 4  ;;  %v1247_v15 = vsel %vm4294_vm7, %v1245_v30, %v1246_v43  ;;  %v5416_v28 = vld [vmem:[#allocation13_spill] sm:$0xff] }
  0x6d   : > { %3569 = vmatmul.mubr.msk.bf16.gmra.mxu0 %vm660_vm3, %v4404_v45  ;;  %3546 = vmatprep.mubr.msk.bf16.mxu1 %vm660_vm3, %v4399_v33  ;;  %v4478_v1 = vcombine.low %v1286_v21, %v1289_v46  ;;  %v1257_v37 = vrot.slane %v3920_v14, 5  ;;  %v4491_v2 = vcombine.low %v5412_v59, %v5411_v24  ;;  %v4493_v57 = vcombine.low %v1237_v20, %v1240_v13  ;;  %v5417_v21 = vld [vmem:[#allocation12_spill] sm:$0xff] }
  0x6e   : > { %3572 = vmatprep.mubr.msk.bf16.mxu0 %vm660_vm3, %v4411_v60  ;;  %v1296_v51 = vsel %vm4294_vm7, %v1294_v22, %v1295_v10  ;;  %v4497_v11 = vcombine.low %v5414_v4, %v5413_v9  ;;  %v4499_v23 = vcombine.low %v1244_v44, %v1247_v15  ;;  %v3153_v27 = vrot.slane %v4250_v50, 9 }
  0x6f   : > { %v4487_v63 = vcombine.low %v1293_v56, %v1296_v51  ;;  %v1252_v14 = vrot.slane %v1250_v8, 4  ;;  %v1253_v36 = vrot.slane %v4266_v47, 5  ;;  %v1260_v35 = vrot.slane %v5415_v39, 5  ;;  %v5418_v56 = vld [vmem:[#allocation5_spill] sm:$0xff] }
  0x70   : > { %v3154_v55 = vrot.slane %v3916_v12, 9  ;;  %v1259_v19 = vrot.slane %v1257_v37, 4  ;;  %v1251_v47 = vsel %vm4294_vm7, %v3153_v27, %v1250_v8  ;;  %v1264_v12 = vrot.slane %v5411_v24, 5  ;;  %v5419_v8 = vld [vmem:[#allocation10_spill] sm:$0xff] }
  0x71   : > { %5410 = vst [vmem:[#allocation25_spill] sm:$0xff] %v4487_v63  ;;  %v1254_v50 = vsel %vm4294_vm7, %v1252_v14, %v1253_v36  ;;  %v1271_v43 = vrot.slane %v5413_v9, 5  ;;  %v4525_v34 = vcombine.low %v5417_v21, %v5416_v28  ;;  %v3155_v10 = vrot.slane %v5412_v59, 9  ;;  %v5420_v36 = vld [vmem:[#allocation15_spill] sm:$0xff] }
  0x72   : > { %v1258_v6 = vsel %vm4294_vm7, %v3154_v55, %v1257_v37  ;;  %v1261_v30 = vsel %vm4294_vm7, %v1259_v19, %v1260_v35  ;;  %v4527_v38 = vcombine.low %v1251_v47, %v1254_v50  ;;  %v1266_v46 = vrot.slane %v1264_v12, 4 }
  0x73   : > { %v4529_v41 = vcombine.low %v1258_v6, %v1261_v30  ;;  %v1267_v22 = vrot.slane %v5418_v56, 5  ;;  %v3156_v20 = vrot.slane %v5414_v4, 9  ;;  %v1273_v13 = vrot.slane %v1271_v43, 4  ;;  %v3285_v6 = vld [vmem:[%s5333_s1 + $0x20] sm:$0xf]  ;;  %v5423_v30 = vld [vmem:[#allocation17_spill] sm:$0xff] }
  0x74   : > { %3547 = vmatmul.mubr.msk.bf16.gmra.mxu1 %vm660_vm3, %v4439_v26  ;;  %v1274_v44 = vrot.slane %v5419_v8, 5  ;;  %v1265_v15 = vsel %vm4294_vm7, %v3155_v10, %v1264_v12  ;;  %v1278_v51 = vrot.slane %v5416_v28, 5  ;;  %v3157_v27 = vrot.slane %v5417_v21, 9  ;;  %v5422_v12 = vld [vmem:[#allocation14_spill] sm:$0xff]  ;;  %v5426_v28 = vld [vmem:[#allocation23_spill] sm:$0xff] }
  0x75   : > { %3573 = vmatmul.mubr.msk.bf16.gmra.mxu0 %vm660_vm3, %v4441_v17  ;;  %3550 = vmatprep.mubr.msk.bf16.mxu1 %vm660_vm3, %v4445_v5  ;;  %v1268_v37 = vsel %vm4294_vm7, %v1266_v46, %v1267_v22  ;;  %v1272_v24 = vsel %vm4294_vm7, %v3156_v20, %v1271_v43  ;;  %v1281_v39 = vrot.slane %v5420_v36, 5  ;;  %v2042_v47 = vsel %vm709_vm0, %v4280_v16, 0  ;;  %v5421_v16 = vld [vmem:[#allocation8_spill] sm:$0xff]  ;;  %v5425_v43 = vld [vmem:[#allocation21_spill] sm:$0xff]  ;;  %v5427_v21 = vld [vmem:[#allocation6_spill] sm:$0xff] }
  0x76   : > { %3576 = vmatprep.mubr.msk.bf16.mxu0 %vm660_vm3, %v4449_v0  ;;  %v1275_v59 = vsel %vm4294_vm7, %v1273_v13, %v1274_v44  ;;  %v4552_v9 = vcombine.low %v1265_v15, %v1268_v37  ;;  %v1280_v14 = vrot.slane %v1278_v51, 4  ;;  %v1279_v35 = vsel %vm4294_vm7, %v3157_v27, %v1278_v51  ;;  %v4637_v10 = vld [vmem:[%s3897_s23 + $0xc0] sm:$0xf]  ;;  %v4640_v46 = vld [vmem:[%s3897_s23 + $0xc4] sm:$0xf]  ;;  %v5428_v56 = vld [vmem:[#allocation11_spill] sm:$0xff] }
  0x77   : > { %v4554_v4 = vcombine.low %v1272_v24, %v1275_v59  ;;  %v2248_v50 = vsel %vm709_vm0, %v4378_v3, 0  ;;  %v5424_v3 = vld [vmem:[#allocation19_spill] sm:$0xff]  ;;  %v1798_v22 = vshrl.u32 %v4637_v10, 16  ;;  %v1801_v20 = vshll.u32 %v4637_v10, 16  ;;  %v5429_v27 = vld [vmem:[#allocation16_spill] sm:$0xff] }
  0x78   : > { %v1282_v55 = vsel %vm4294_vm7, %v1280_v14, %v1281_v39  ;;  %v1811_v13 = vshrl.u32 %v4640_v46, 16  ;;  %v1807_v8 = vshll.u32 %v4640_v46, 16  ;;  %v4652_v44 = vcombine.low %v4637_v10, %v4640_v46  ;;  %v4655_v59 = vld [vmem:[%s3897_s23 + $0xc8] sm:$0x1]  ;;  %v5430_v14 = vld [vmem:[#allocation18_spill] sm:$0xff] }
  0x79   : > { %v4570_v19 = vcombine.low %v1279_v35, %v1282_v55  ;;  %v1800_v15 = vrot.slane %v1798_v22, 4  ;;  %v1803_v37 = vrot.slane %v1801_v20, 5  ;;  %v1817_v35 = vshll.u32 %v4655_v59, 16  ;;  %v5431_v22 = vld [vmem:[#allocation20_spill] sm:$0xff]  ;;  %v5432_v20 = vld [vmem:[#allocation22_spill] sm:$0xff] }
  0x7a   : > { %v1809_v51 = vrot.slane %v1807_v8, 5  ;;  %v1813_v24 = vrot.slane %v1811_v13, 4  ;;  %v2688_v8 = vsel %vm709_vm0, %v3285_v6, 0 }
  0x7b   : > { %v1804_v36 = vor.u32 %v1803_v37, %v1800_v15 }
  0x7c   : > { %3551 = vmatmul.mubr.msk.bf16.gmra.mxu1 %vm660_vm3, %v4491_v2  ;;  %v1814_v39 = vor.u32 %v1813_v24, %v1809_v51 }
  0x7d   : > { %3577 = vmatmul.mubr.msk.bf16.gmra.mxu0 %vm660_vm3, %v4493_v57  ;;  %3554 = vmatprep.mubr.msk.bf16.mxu1 %vm660_vm3, %v4497_v11  ;;  %v1805_v55 = vrot.slane %v1804_v36, 4 }
  0x7e   : > { %3580 = vmatprep.mubr.msk.bf16.mxu0 %vm660_vm3, %v4499_v23 }
  0x84   : > { %3555 = vmatmul.mubr.msk.bf16.gmra.mxu1 %vm660_vm3, %v4525_v34 }
  0x85   : > { %3581 = vmatmul.mubr.msk.bf16.gmra.mxu0 %vm660_vm3, %v4527_v38  ;;  %3558 = vmatprep.mubr.msk.bf16.mxu1 %vm660_vm3, %v4409_v31 }
  0x86   : > { %3584 = vmatprep.mubr.msk.bf16.mxu0 %vm660_vm3, %v4529_v41 }
  0x8c   : > { %3559 = vmatmul.mubr.msk.bf16.gmra.mxu1 %vm660_vm3, %v4417_v29 }
  0x8d   : > { %3585 = vmatmul.mubr.msk.bf16.gmra.mxu0 %vm660_vm3, %v4552_v9  ;;  %3598 = vmatprep.mubr.msk.bf16.mxu1 %vm660_vm3, %v4229_v52  ;;  %v3266_v52 = vld [vmem:[%s5333_s1 + $0x1c] sm:$0xf] }
  0x8e   : > { %3588 = vmatprep.mubr.msk.bf16.mxu0 %vm660_vm3, %v4554_v4 }
  0x94   : > { %3599 = vmatmul.mubr.msk.bf16.vlgmr.msra.gmra.mxu1 %vm660_vm3, %v4263_v62 }
  0x95   : > { %3589 = vmatmul.mubr.msk.bf16.gmra.mxu0 %vm660_vm3, %v4570_v19  ;;  %3602 = vmatprep.mubr.msk.bf16.mxu1 %vm660_vm3, %v4304_v48 }
  0x96   : > { %3592 = vmatprep.mubr.msk.bf16.mxu0 %vm660_vm3, %v4478_v1  ;;  %3665 = vmatpush3.bf16.msra.mxu1 %v2042_v47  ;;  %v1815_v47 = vrot.slane %v1814_v39, 4 }
  0x97   : > { %3810 = vmatprep.subr.msk.bf16.mxu1 %vm709_vm0, %v3266_v52 }
  0x9c   : > { %3603 = vmatmul.mubr.msk.bf16.gmra.mxu1 %vm660_vm3, %v4316_v40 }
  0x9d   : > { %3593 = vmatmul.mubr.msk.bf16.gmra.mxu0 %vm660_vm3, %v4487_v63  ;;  %3606 = vmatprep.mubr.msk.bf16.mxu1 %vm660_vm3, %v4356_v58 }
  0x9e   : > { %3632 = vmatprep.mubr.msk.bf16.mxu0 %vm660_vm3, %v5421_v16  ;;  %v1819_v16 = vrot.slane %v1817_v35, 5  ;;  %v3229_v35 = vrot.slane %v4637_v10, 9 }
  0xa0   : > { %v1820_v13 = vsel %vm3946_vm4, %v1815_v47, %v1819_v16  ;;  %v2031_v47 = vrot.slane %v4655_v59, 5 }
  0xa4   : > { %3607 = vmatmul.mubr.msk.bf16.gmra.mxu1 %vm660_vm3, %v4360_v54 }
  0xa5   : > { %3633 = vmatmul.mubr.msk.bf16.vlgmr.msra.gmra.mxu0 %vm660_vm3, %v5422_v12  ;;  %3610 = vmatprep.mubr.msk.bf16.mxu1 %vm660_vm3, %v4395_v49 }
  0xa6   : > { %3636 = vmatprep.mubr.msk.bf16.mxu0 %vm660_vm3, %v5423_v30  ;;  %3699 = vmatpush3.bf16.msra.mxu0 %v2248_v50  ;;  %v2476_v50 = vsel %vm709_vm0, %v3266_v52, 0 }
  0xa7   : > { %3811 = vmatprep.subr.msk.bf16.mxu0 %vm709_vm0, %v3285_v6 }
  0xac   : > { %3611 = vmatmul.mubr.msk.bf16.gmra.mxu1 %vm660_vm3, %v4399_v33 }
  0xad   : > { %3637 = vmatmul.mubr.msk.bf16.gmra.mxu0 %vm660_vm3, %v5424_v3  ;;  %3614 = vmatprep.mubr.msk.bf16.mxu1 %vm660_vm3, %v4439_v26 }
  0xae   : > { %3640 = vmatprep.mubr.msk.bf16.mxu0 %vm660_vm3, %v5425_v43 }
  0xb4   : > { %3615 = vmatmul.mubr.msk.bf16.gmra.mxu1 %vm660_vm3, %v4445_v5 }
  0xb5   : > { %3641 = vmatmul.mubr.msk.bf16.gmra.mxu0 %vm660_vm3, %v5426_v28  ;;  %3618 = vmatprep.mubr.msk.bf16.mxu1 %vm660_vm3, %v4491_v2 }
  0xb6   : > { %3644 = vmatprep.mubr.msk.bf16.mxu0 %vm660_vm3, %v4274_v53 }
  0xbc   : > { %3619 = vmatmul.mubr.msk.bf16.gmra.mxu1 %vm660_vm3, %v4497_v11 }
  0xbd   : > { %3645 = vmatmul.mubr.msk.bf16.gmra.mxu0 %vm660_vm3, %v4310_v18  ;;  %3622 = vmatprep.mubr.msk.bf16.mxu1 %vm660_vm3, %v4525_v34 }
  0xbe   : > { %3648 = vmatprep.mubr.msk.bf16.mxu0 %vm660_vm3, %v4333_v61 }
  0xc4   : > { %3623 = vmatmul.mubr.msk.bf16.gmra.mxu1 %vm660_vm3, %v4409_v31 }
  0xc5   : > { %3649 = vmatmul.mubr.msk.bf16.gmra.mxu0 %vm660_vm3, %v5427_v21  ;;  %3626 = vmatprep.mubr.msk.bf16.mxu1 %vm660_vm3, %v4417_v29 }
  0xc6   : > { %3652 = vmatprep.mubr.msk.bf16.mxu0 %vm660_vm3, %v5428_v56 }
  0xcc   : > { %3627 = vmatmul.mubr.msk.bf16.gmra.mxu1 %vm660_vm3, %v4652_v44 }
  0xcd   : > { %3653 = vmatmul.mubr.msk.bf16.gmra.mxu0 %vm660_vm3, %v5429_v27  ;;  %3666 = vmatprep.mubr.msk.bf16.mxu1 %vm660_vm3, %v4337_v42  ;;  %v1810_v42 = vsel %vm3946_vm4, %v1805_v55, %v1809_v51 }
  0xce   : > { %3656 = vmatprep.mubr.msk.bf16.mxu0 %vm660_vm3, %v5430_v14  ;;  %v4679_v52 = vcombine.low %v1810_v42, %v1820_v13 }
  0xd4   : > { %3667 = vmatmul.mubr.msk.bf16.vlgmr.msra.gmra.mxu1 %vm660_vm3, %v4362_v25 }
  0xd5   : > { %3657 = vmatmul.mubr.msk.bf16.gmra.mxu0 %vm660_vm3, %v5431_v22  ;;  %3670 = vmatprep.mubr.msk.bf16.mxu1 %vm660_vm3, %v4404_v45 }
  0xd6   : > { %3660 = vmatprep.mubr.msk.bf16.mxu0 %vm660_vm3, %v5432_v20  ;;  %3733 = vmatpush3.bf16.msra.mxu1 %v2476_v50 }
  0xdc   : > { %3671 = vmatmul.mubr.msk.bf16.gmra.mxu1 %vm660_vm3, %v4411_v60 }
  0xdd   : > { %3661 = vmatmul.mubr.msk.bf16.gmra.mxu0 %vm660_vm3, %v4679_v52  ;;  %3674 = vmatprep.mubr.msk.bf16.mxu1 %vm660_vm3, %v4441_v17 }
  0xde   : > { %3700 = vmatprep.mubr.msk.bf16.mxu0 %vm660_vm3, %v4263_v62 }
  0xe4   : > { %3675 = vmatmul.mubr.msk.bf16.gmra.mxu1 %vm660_vm3, %v4449_v0 }
  0xe5   : > { %3701 = vmatmul.mubr.msk.bf16.vlgmr.msra.gmra.mxu0 %vm660_vm3, %v4304_v48  ;;  %3678 = vmatprep.mubr.msk.bf16.mxu1 %vm660_vm3, %v4493_v57  ;;  %v3498_v15 = vpop.f32.mrf.mxu0 }
  0xe6   : > { %3704 = vmatprep.mubr.msk.bf16.mxu0 %vm660_vm3, %v4316_v40  ;;  %3767 = vmatpush3.bf16.msra.mxu0 %v2688_v8 }
  0xe7   : > { %v747_v37 = vpop.f32.mrf.mxu0 }
  0xe9   : > { %v3499_v48 = vpop.f32.mrf.mxu0 }
  0xea   : > { %v4702_v62 = vpop.f32.mrf.mxu1 }
  0xeb   : > { %v750_v40 = vpop.f32.mrf.mxu0 }
  0xec   : > { %3679 = vmatmul.mubr.msk.bf16.gmra.mxu1 %vm660_vm3, %v4499_v23  ;;  %v4708_v6 = vpop.f32.mrf.mxu1 }
  0xed   : > { %3705 = vmatmul.mubr.msk.bf16.gmra.mxu0 %vm660_vm3, %v4356_v58  ;;  %3682 = vmatprep.mubr.msk.bf16.mxu1 %vm660_vm3, %v4527_v38 }
  0xee   : > { %3708 = vmatprep.mubr.msk.bf16.mxu0 %vm660_vm3, %v4360_v54  ;;  %v4714_v51 = vpop.f32.mrf.mxu1 }
  0xf0   : > { %v4720_v54 = vpop.f32.mrf.mxu1 }
  0xf4   : > { %3683 = vmatmul.mubr.msk.bf16.gmra.mxu1 %vm660_vm3, %v4529_v41 }
  0xf5   : > { %3709 = vmatmul.mubr.msk.bf16.gmra.mxu0 %vm660_vm3, %v4395_v49  ;;  %3686 = vmatprep.mubr.msk.bf16.mxu1 %vm660_vm3, %v4552_v9  ;;  %v2028_v49 = vrot.slane %v4640_v46, 5 }
  0xf6   : > { %3712 = vmatprep.mubr.msk.bf16.mxu0 %vm660_vm3, %v4399_v33  ;;  %v3502_v58 = vpop.f32.mrf.mxu0 }
  0xf7   : > { %v2030_v55 = vrot.slane %v2028_v49, 4 }
  0xf8   : > { %v763_v24 = vpop.f32.mrf.mxu0 }
  0xf9   : > { %v2032_v10 = vsel %vm4294_vm7, %v2030_v55, %v2031_v47 }
  0xfa   : > { %v4726_v36 = vpop.f32.mrf.mxu1  ;;  %v3503_v33 = vpop.f32.mrf.mxu0 }
  0xfb   : > { %5433 = vst [vmem:[#allocation4_spill] sm:$0xff] %v4726_v36 }
  0xfc   : > { %3687 = vmatmul.mubr.msk.bf16.gmra.mxu1 %vm660_vm3, %v4554_v4  ;;  %v4733_v39 = vpop.f32.mrf.mxu1  ;;  %v766_v16 = vpop.f32.mrf.mxu0 }
  0xfd   : > { %3713 = vmatmul.mubr.msk.bf16.gmra.mxu0 %vm660_vm3, %v4439_v26  ;;  %3690 = vmatprep.mubr.msk.bf16.mxu1 %vm660_vm3, %v4570_v19  ;;  %5434 = vst [vmem:[#allocation3_spill] sm:$0xff] %v4733_v39 }
  0xfe   : > { %3716 = vmatprep.mubr.msk.bf16.mxu0 %vm660_vm3, %v4445_v5  ;;  %v4741_v26 = vpop.f32.mrf.mxu1  ;;  %v2029_v5 = vsel %vm4294_vm7, %v3229_v35, %v2028_v49 }
  0xff   : > { %5435 = vst [vmem:[#allocation9_spill] sm:$0xff] %v4741_v26  ;;  %v4753_v50 = vcombine.low %v2029_v5, %v2032_v10 }
 0x100   : > { %v4751_v59 = vpop.f32.mrf.mxu1 }
 0x101   : > { %5436 = vst [vmem:[#allocation7_spill] sm:$0xff] %v4753_v50 }
 0x104   : > { %3691 = vmatmul.mubr.msk.bf16.gmra.mxu1 %vm660_vm3, %v4478_v1 }
 0x105   : > { %3717 = vmatmul.mubr.msk.bf16.gmra.mxu0 %vm660_vm3, %v4491_v2  ;;  %3694 = vmatprep.mubr.msk.bf16.mxu1 %vm660_vm3, %v4487_v63 }
 0x106   : > { %3720 = vmatprep.mubr.msk.bf16.mxu0 %vm660_vm3, %v4497_v11 }
 0x107   : > { %v3506_v46 = vpop.f32.mrf.mxu0 }
 0x109   : > { %v779_v2 = vpop.f32.mrf.mxu0 }
 0x10b   : > { %v3507_v11 = vpop.f32.mrf.mxu0 }
 0x10c   : > { %v4755_v42 = vpop.f32.mrf.mxu1  ;;  %3695 = vmatmul.mubr.msk.bf16.gmra.mxu1 %vm660_vm3, %v4753_v50 }
 0x10d   : > { %3721 = vmatmul.mubr.msk.bf16.gmra.mxu0 %vm660_vm3, %v4525_v34  ;;  %3734 = vmatprep.mubr.msk.bf16.mxu1 %vm660_vm3, %v5422_v12  ;;  %v782_v49 = vpop.f32.mrf.mxu0  ;;  %v4783_v12 = vld [vmem:[%s3897_s23 + $0xd0] sm:$0xf] }
 0x10e   : > { %3724 = vmatprep.mubr.msk.bf16.mxu0 %vm660_vm3, %v4409_v31  ;;  %v4765_v13 = vpop.f32.mrf.mxu1  ;;  %v4780_v31 = vld [vmem:[%s3897_s23 + $0xcc] sm:$0xf] }
 0x110   : > { %v4767_v8 = vpop.f32.mrf.mxu1 }
 0x112   : > { %v4769_v35 = vpop.f32.mrf.mxu1 }
 0x113   : > { %5437 = vst [vmem:[#allocation2_spill] sm:$0xff] %v4769_v35 }
 0x114   : > { %v3510_v55 = vpop.f32.mrf.mxu0  ;;  %v3532_v47 = vpop.f32.mrf.mxu1  ;;  %3735 = vmatmul.mubr.msk.bf16.vlgmr.msra.gmra.mxu1 %vm660_vm3, %v5423_v30 }
 0x115   : > { %3725 = vmatmul.mubr.msk.bf16.gmra.mxu0 %vm660_vm3, %v4417_v29  ;;  %v1048_v34 = vadd.f32 %v3532_v47, %v3498_v15  ;;  %3738 = vmatprep.mubr.msk.bf16.mxu1 %vm660_vm3, %v5424_v3  ;;  %v3249_v29 = vcombine.low %v4780_v31, %v4783_v12 }
 0x116   : > { %3728 = vmatprep.mubr.msk.bf16.mxu0 %vm660_vm3, %v4652_v44  ;;  %v795_v5 = vpop.f32.mrf.mxu0  ;;  %v1039_v10 = vpop.f32.mrf.mxu1 }
 0x117   : > { %v1040_v26 = vadd.f32 %v1039_v10, %v747_v37 }
 0x118   : > { %v3511_v50 = vpop.f32.mrf.mxu0  ;;  %v3533_v39 = vpop.f32.mrf.mxu1 }
 0x119   : > { %v1051_v30 = vadd.f32 %v3533_v39, %v3499_v48 }
 0x11a   : > { %v798_v15 = vpop.f32.mrf.mxu0  ;;  %v1042_v47 = vpop.f32.mrf.mxu1 }
 0x11b   : > { %v1043_v7 = vadd.f32 %v1042_v47, %v750_v40 }
 0x11c   : > { %v3536_v63 = vpop.f32.mrf.mxu1  ;;  %3739 = vmatmul.mubr.msk.bf16.gmra.mxu1 %vm660_vm3, %v5425_v43 }
 0x11d   : > { %v4787_v44 = vpop.f32.mrf.mxu0  ;;  %3729 = vmatmul.mubr.msk.bf16.gmra.mxu0 %vm660_vm3, %v3249_v29  ;;  %v1064_v3 = vadd.f32 %v3536_v63, %v3502_v58  ;;  %3742 = vmatprep.mubr.msk.bf16.mxu1 %vm660_vm3, %v5426_v28 }
 0x11e   : > { %3768 = vmatprep.mubr.msk.bf16.mxu0 %vm660_vm3, %v4362_v25  ;;  %v1055_v48 = vpop.f32.mrf.mxu1 }
 0x11f   : > { %v4796_v37 = vpop.f32.mrf.mxu0  ;;  %v1056_v39 = vadd.f32 %v1055_v48, %v763_v24 }
 0x120   : > { %v3537_v10 = vpop.f32.mrf.mxu1 }
 0x121   : > { %v4798_v40 = vpop.f32.mrf.mxu0  ;;  %v1067_v47 = vadd.f32 %v3537_v10, %v3503_v33 }
 0x122   : > { %v1058_v29 = vpop.f32.mrf.mxu1 }
 0x123   : > { %v4800_v35 = vpop.f32.mrf.mxu0  ;;  %v1059_v36 = vadd.f32 %v1058_v29, %v766_v16 }
 0x124   : > { %v3540_v43 = vpop.f32.mrf.mxu1  ;;  %3743 = vmatmul.mubr.msk.bf16.gmra.mxu1 %vm660_vm3, %v4274_v53 }
 0x125   : > { %v3566_v63 = vpop.f32.mrf.mxu0  ;;  %3769 = vmatmul.mubr.msk.bf16.vlgmr.msra.gmra.mxu0 %vm660_vm3, %v4404_v45  ;;  %v1080_v25 = vadd.f32 %v3540_v43, %v3506_v46  ;;  %3746 = vmatprep.mubr.msk.bf16.mxu1 %vm660_vm3, %v4310_v18 }
 0x126   : > { %v4806_v28 = vadd.f32 %v3566_v63, %v1048_v34  ;;  %3772 = vmatprep.mubr.msk.bf16.mxu0 %vm660_vm3, %v4411_v60  ;;  %v1071_v58 = vpop.f32.mrf.mxu1 }
 0x127   : > { %v1432_v24 = vpop.f32.mrf.mxu0  ;;  %v1072_v33 = vadd.f32 %v1071_v58, %v779_v2 }
 0x128   : > { %v4812_v16 = vadd.f32 %v1432_v24, %v1040_v26  ;;  %v3541_v48 = vpop.f32.mrf.mxu1 }
 0x129   : > { %v3567_v10 = vpop.f32.mrf.mxu0  ;;  %v1083_v53 = vadd.f32 %v3541_v48, %v3507_v11 }
 0x12a   : > { %v4814_v29 = vadd.f32 %v3567_v10, %v1051_v30  ;;  %v1074_v45 = vpop.f32.mrf.mxu1  ;;  %v2447_v10 = vshll.u32 %v4780_v31, 16 }
 0x12b   : > { %v1435_v46 = vpop.f32.mrf.mxu0  ;;  %v1075_v34 = vadd.f32 %v1074_v45, %v782_v49 }
 0x12c   : > { %v4816_v43 = vadd.f32 %v1435_v46, %v1043_v7  ;;  %v3544_v63 = vpop.f32.mrf.mxu1  ;;  %3747 = vmatmul.mubr.msk.bf16.gmra.mxu1 %vm660_vm3, %v4333_v61 }
 0x12d   : > { %v3570_v18 = vpop.f32.mrf.mxu0  ;;  %3773 = vmatmul.mubr.msk.bf16.gmra.mxu0 %vm660_vm3, %v4441_v17  ;;  %v1096_v60 = vadd.f32 %v3544_v63, %v3510_v55  ;;  %3750 = vmatprep.mubr.msk.bf16.mxu1 %vm660_vm3, %v5427_v21  ;;  %v2444_v21 = vshrl.u32 %v4780_v31, 16 }
 0x12e   : > { %v4822_v26 = vadd.f32 %v3570_v18, %v1064_v3  ;;  %3776 = vmatprep.mubr.msk.bf16.mxu0 %vm660_vm3, %v4449_v0  ;;  %v1087_v2 = vpop.f32.mrf.mxu1  ;;  %v2449_v18 = vrot.slane %v2447_v10, 5 }
 0x12f   : > { %v1448_v7 = vpop.f32.mrf.mxu0  ;;  %v1088_v11 = vadd.f32 %v1087_v2, %v795_v5  ;;  %v2446_v63 = vrot.slane %v2444_v21, 4 }
 0x130   : > { %v4828_v49 = vadd.f32 %v1448_v7, %v1056_v39  ;;  %v3545_v30 = vpop.f32.mrf.mxu1 }
 0x131   : > { %v3571_v58 = vpop.f32.mrf.mxu0  ;;  %v1099_v61 = vadd.f32 %v3545_v30, %v3511_v50  ;;  %v2457_v50 = vshrl.u32 %v4783_v12, 16 }
 0x132   : > { %v4830_v24 = vadd.f32 %v3571_v58, %v1067_v47  ;;  %v1090_v17 = vpop.f32.mrf.mxu1  ;;  %v4855_v58 = vld [vmem:[%s3897_s23 + $0xd4] sm:$0x1] }
 0x133   : > { %v1451_v55 = vpop.f32.mrf.mxu0  ;;  %v1091_v3 = vadd.f32 %v1090_v17, %v798_v15 }
 0x134   : > { %v4832_v48 = vadd.f32 %v1451_v55, %v1059_v36  ;;  %v3548_v0 = vpop.f32.mrf.mxu1  ;;  %3751 = vmatmul.mubr.msk.bf16.gmra.mxu1 %vm660_vm3, %v5428_v56  ;;  %v2453_v36 = vshll.u32 %v4783_v12, 16 }
 0x135   : > { %v3574_v45 = vpop.f32.mrf.mxu0  ;;  %3777 = vmatmul.mubr.msk.bf16.gmra.mxu0 %vm660_vm3, %v4493_v57  ;;  %v1112_v5 = vadd.f32 %v3548_v0, %v4787_v44  ;;  %3754 = vmatprep.mubr.msk.bf16.mxu1 %vm660_vm3, %v5429_v27  ;;  %v2459_v27 = vrot.slane %v2457_v50, 4 }
 0x136   : > { %v4842_v39 = vadd.f32 %v3574_v45, %v1080_v25  ;;  %3780 = vmatprep.mubr.msk.bf16.mxu0 %vm660_vm3, %v4499_v23  ;;  %v1103_v15 = vpop.f32.mrf.mxu1  ;;  %v2455_v2 = vrot.slane %v2453_v36, 5 }
 0x137   : > { %v1464_v56 = vpop.f32.mrf.mxu0 }
 0x138   : > { %v4849_v47 = vadd.f32 %v1464_v56, %v1072_v33  ;;  %v3549_v57 = vpop.f32.mrf.mxu1 }
 0x139   : > { %v3575_v46 = vpop.f32.mrf.mxu0  ;;  %v1115_v44 = vadd.f32 %v3549_v57, %v4798_v40  ;;  %v2450_v40 = vor.u32 %v2449_v18, %v2446_v63 }
 0x13a   : > { %v4852_v25 = vadd.f32 %v3575_v46, %v1083_v53  ;;  %v1106_v7 = vpop.f32.mrf.mxu1 }
 0x13b   : > { %v1467_v30 = vpop.f32.mrf.mxu0  ;;  %v1107_v23 = vadd.f32 %v1106_v7, %v4800_v35  ;;  %v2460_v35 = vor.u32 %v2459_v27, %v2455_v2  ;;  %v2451_v50 = vrot.slane %v2450_v40, 4  ;;  %v2674_v40 = vrot.slane %v4783_v12, 5 }
 0x13c   : > { %v4858_v17 = vadd.f32 %v1467_v30, %v1075_v34  ;;  %v3552_v33 = vpop.f32.mrf.mxu1  ;;  %3755 = vmatmul.mubr.msk.bf16.gmra.mxu1 %vm660_vm3, %v5430_v14  ;;  %v2463_v34 = vshll.u32 %v4855_v58, 16  ;;  %v3284_v12 = vrot.slane %v4780_v31, 9  ;;  %v5440_v31 = vld [vmem:[#allocation25_spill] sm:$0xff] }
 0x13d   : > { %v3578_v55 = vpop.f32.mrf.mxu0  ;;  %3781 = vmatmul.mubr.msk.bf16.gmra.mxu0 %vm660_vm3, %v4527_v38  ;;  %3758 = vmatprep.mubr.msk.bf16.mxu1 %vm660_vm3, %v5431_v22 }
 0x13e   : > { %v4864_v53 = vadd.f32 %v3578_v55, %v1096_v60  ;;  %3784 = vmatprep.mubr.msk.bf16.mxu0 %vm660_vm3, %v4529_v41  ;;  %v1119_v21 = vpop.f32.mrf.mxu1  ;;  %v2461_v60 = vrot.slane %v2460_v35, 4  ;;  %v2465_v36 = vrot.slane %v2463_v34, 5 }
 0x13f   : > { %v1480_v10 = vpop.f32.mrf.mxu0 }
 0x140   : > { %v4871_v0 = vadd.f32 %v1480_v10, %v1088_v11  ;;  %v3553_v14 = vpop.f32.mrf.mxu1  ;;  %v2456_v11 = vsel %vm3946_vm4, %v2451_v50, %v2455_v2 }
 0x141   : > { %v3579_v45 = vpop.f32.mrf.mxu0 }
 0x142   : > { %v4873_v38 = vadd.f32 %v3579_v45, %v1099_v61  ;;  %v1122_v56 = vpop.f32.mrf.mxu1  ;;  %v1104_v61 = vadd.f32 %v1103_v15, %v4796_v37  ;;  %v1128_v15 = vadd.f32 %v3552_v33, %v4702_v62 }
 0x143   : > { %v1483_v57 = vpop.f32.mrf.mxu0 }
 0x144   : > { %v4875_v22 = vadd.f32 %v1483_v57, %v1091_v3  ;;  %v3556_v46 = vpop.f32.mrf.mxu1  ;;  %3759 = vmatmul.mubr.msk.bf16.gmra.mxu1 %vm660_vm3, %v5432_v20  ;;  %v2466_v3 = vsel %vm3946_vm4, %v2461_v60, %v2465_v36 }
 0x145   : > { %v3582_v41 = vpop.f32.mrf.mxu0  ;;  %3785 = vmatmul.mubr.msk.bf16.gmra.mxu0 %vm660_vm3, %v4552_v9  ;;  %3762 = vmatprep.mubr.msk.bf16.mxu1 %vm660_vm3, %v4679_v52  ;;  %v3267_v2 = vcombine.low %v2456_v11, %v2466_v3 }
 0x146   : > { %v4884_v63 = vadd.f32 %v3582_v41, %v1112_v5  ;;  %3788 = vmatprep.mubr.msk.bf16.mxu0 %vm660_vm3, %v4554_v4  ;;  %v1135_v20 = vpop.f32.mrf.mxu1 }
 0x147   : > { %v1496_v18 = vpop.f32.mrf.mxu0 }
 0x148   : > { %v4892_v27 = vadd.f32 %v1496_v18, %v1104_v61  ;;  %v3557_v9 = vpop.f32.mrf.mxu1 }
 0x149   : > { %v3583_v7 = vpop.f32.mrf.mxu0 }
 0x14a   : > { %v4894_v30 = vadd.f32 %v3583_v7, %v1115_v44  ;;  %v1138_v37 = vpop.f32.mrf.mxu1  ;;  %v1120_v44 = vadd.f32 %v1119_v21, %v4708_v6  ;;  %v2676_v6 = vrot.slane %v2674_v40, 4  ;;  %v5443_v7 = vld [vmem:[#allocation7_spill] sm:$0xff] }
 0x14b   : > { %v1499_v5 = vpop.f32.mrf.mxu0  ;;  %v1139_v52 = vadd.f32 %v1138_v37, %v4751_v59 }
 0x14c   : > { %v4898_v55 = vadd.f32 %v1499_v5, %v1107_v23  ;;  %v3560_v4 = vpop.f32.mrf.mxu1  ;;  %3763 = vmatmul.mubr.msk.bf16.gmra.mxu1 %vm660_vm3, %v3267_v2  ;;  %v1131_v23 = vadd.f32 %v3553_v14, %v4714_v51  ;;  %v5438_v51 = vld [vmem:[#allocation4_spill] sm:$0xff]  ;;  %v5444_v5 = vld [vmem:[#allocation9_spill] sm:$0xff] }
 0x14d   : > { %v3586_v32 = vpop.f32.mrf.mxu0  ;;  %3789 = vmatmul.mubr.msk.bf16.gmra.mxu0 %vm660_vm3, %v4570_v19  ;;  %v1160_v35 = vadd.f32 %v3560_v4, %v4755_v42  ;;  %v1123_v42 = vadd.f32 %v1122_v56, %v4720_v54  ;;  %v1144_v14 = vadd.f32 %v3556_v46, %v5438_v51  ;;  %v5442_v56 = vld [vmem:[#allocation3_spill] sm:$0xff] }
 0x14e   : > { %v4906_v34 = vadd.f32 %v3586_v32, %v1128_v15  ;;  %3792 = vmatprep.mubr.msk.bf16.mxu0 %vm660_vm3, %v4478_v1  ;;  %v1151_v62 = vpop.f32.mrf.mxu1  ;;  %v2677_v1 = vrot.slane %v4855_v58, 5  ;;  %v1136_v3 = vadd.f32 %v1135_v20, %v5442_v56  ;;  %v1147_v15 = vadd.f32 %v3557_v9, %v5444_v5 }
 0x14f   : > { %v1512_v59 = vpop.f32.mrf.mxu0  ;;  %v1152_v33 = vadd.f32 %v1151_v62, %v4765_v13  ;;  %v5439_v13 = vld [vmem:[#allocation2_spill] sm:$0xff] }
 0x150   : > { %v4912_v10 = vadd.f32 %v1512_v59, %v1120_v44  ;;  %v3561_v19 = vpop.f32.mrf.mxu1  ;;  %v2678_v46 = vsel %vm4294_vm7, %v2676_v6, %v2677_v1 }
 0x151   : > { %v3587_v45 = vpop.f32.mrf.mxu0  ;;  %v1163_v21 = vadd.f32 %v3561_v19, %v4767_v8  ;;  %v2675_v8 = vsel %vm4294_vm7, %v3284_v12, %v2674_v40 }
 0x152   : > { %v4917_v50 = vadd.f32 %v3587_v45, %v1131_v23  ;;  %v1154_v60 = vpop.f32.mrf.mxu1  ;;  %v3286_v44 = vcombine.low %v2675_v8, %v2678_v46 }
 0x153   : > { %v1515_v36 = vpop.f32.mrf.mxu0  ;;  %v1155_v57 = vadd.f32 %v1154_v60, %v5439_v13 }
 0x154   : > { %v4922_v41 = vadd.f32 %v1515_v36, %v1123_v42  ;;  %v3600_v61 = vpop.f32.mrf.mxu1 }
 0x155   : > { %v3590_v11 = vpop.f32.mrf.mxu0  ;;  %3793 = vmatmul.mubr.msk.bf16.gmra.mxu0 %vm660_vm3, %v5440_v31  ;;  %v1767_v58 = vadd.f32 %v3600_v61, %v4806_v28 }
 0x156   : > { %v4929_v18 = vadd.f32 %v3590_v11, %v1144_v14  ;;  %3796 = vmatprep.mubr.msk.bf16.mxu0 %vm660_vm3, %v5443_v7  ;;  %v1638_v37 = vpop.f32.mrf.mxu1 }
 0x157   : > { %v1528_v2 = vpop.f32.mrf.mxu0  ;;  %v1765_v32 = vadd.f32 %v1638_v37, %v4812_v16 }
 0x158   : > { %v4937_v4 = vadd.f32 %v1528_v2, %v1136_v3  ;;  %v3601_v20 = vpop.f32.mrf.mxu1 }
 0x159   : > { %v3591_v40 = vpop.f32.mrf.mxu0  ;;  %v1768_v28 = vadd.f32 %v3601_v20, %v4814_v29 }
 0x15a   : > { %v4940_v62 = vadd.f32 %v3591_v40, %v1147_v15  ;;  %v1641_v23 = vpop.f32.mrf.mxu1 }
 0x15b   : > { %v1531_v59 = vpop.f32.mrf.mxu0  ;;  %v1766_v45 = vadd.f32 %v1641_v23, %v4816_v43 }
 0x15c   : > { %v4943_v19 = vadd.f32 %v1531_v59, %v1139_v52  ;;  %v3604_v6 = vpop.f32.mrf.mxu1 }
 0x15d   : > { %v3594_v12 = vpop.f32.mrf.mxu0  ;;  %3797 = vmatmul.mubr.msk.bf16.gmra.mxu0 %vm660_vm3, %v3286_v44  ;;  %v1771_v16 = vadd.f32 %v3604_v6, %v4822_v26 }
 0x15e   : > { %v4947_v9 = vadd.f32 %v3594_v12, %v1160_v35  ;;  %v1654_v1 = vpop.f32.mrf.mxu1 }
 0x15f   : > { %v1544_v42 = vpop.f32.mrf.mxu0  ;;  %v1769_v29 = vadd.f32 %v1654_v1, %v4828_v49 }
 0x160   : > { %v4950_v60 = vadd.f32 %v1544_v42, %v1152_v33  ;;  %v3605_v51 = vpop.f32.mrf.mxu1 }
 0x161   : > { %v3595_v36 = vpop.f32.mrf.mxu0  ;;  %v1772_v43 = vadd.f32 %v3605_v51, %v4830_v24 }
 0x162   : > { %v4953_v52 = vadd.f32 %v3595_v36, %v1163_v21  ;;  %v1657_v13 = vpop.f32.mrf.mxu1 }
 0x163   : > { %v1547_v14 = vpop.f32.mrf.mxu0  ;;  %v1770_v35 = vadd.f32 %v1657_v13, %v4832_v48 }
 0x164   : > { %v4956_v11 = vadd.f32 %v1547_v14, %v1155_v57  ;;  %v3608_v61 = vpop.f32.mrf.mxu1 }
 0x165   : > { %v3634_v26 = vpop.f32.mrf.mxu0  ;;  %v1775_v31 = vadd.f32 %v3608_v61, %v4842_v39 }
 0x166   : > { %v4960_v33 = vadd.f32 %v3634_v26, %v1767_v58  ;;  %v1670_v54 = vpop.f32.mrf.mxu1 }
 0x167   : > { %v1866_v49 = vpop.f32.mrf.mxu0  ;;  %v1773_v8 = vadd.f32 %v1670_v54, %v4849_v47 }
 0x168   : > { %v4963_v21 = vadd.f32 %v1866_v49, %v1765_v32  ;;  %v3609_v56 = vpop.f32.mrf.mxu1 }
 0x169   : > { %v3635_v24 = vpop.f32.mrf.mxu0  ;;  %v1776_v3 = vadd.f32 %v3609_v56, %v4852_v25 }
 0x16a   : > { %v4966_v57 = vadd.f32 %v3635_v24, %v1768_v28  ;;  %v1673_v7 = vpop.f32.mrf.mxu1 }
 0x16b   : > { %v1869_v48 = vpop.f32.mrf.mxu0  ;;  %v1774_v46 = vadd.f32 %v1673_v7, %v4858_v17 }
 0x16c   : > { %v4969_v2 = vadd.f32 %v1869_v48, %v1766_v45  ;;  %v3612_v39 = vpop.f32.mrf.mxu1 }
 0x16d   : > { %v3638_v58 = vpop.f32.mrf.mxu0  ;;  %v1779_v37 = vadd.f32 %v3612_v39, %v4864_v53 }
 0x16e   : > { %v4972_v5 = vadd.f32 %v3638_v58, %v1771_v16  ;;  %v1686_v47 = vpop.f32.mrf.mxu1 }
 0x16f   : > { %v1882_v15 = vpop.f32.mrf.mxu0  ;;  %v1777_v32 = vadd.f32 %v1686_v47, %v4871_v0 }
 0x170   : > { %v4975_v40 = vadd.f32 %v1882_v15, %v1769_v29  ;;  %v3613_v25 = vpop.f32.mrf.mxu1 }
 0x171   : > { %v3639_v20 = vpop.f32.mrf.mxu0  ;;  %v1780_v44 = vadd.f32 %v3613_v25, %v4873_v38 }
 0x172   : > { %v4978_v28 = vadd.f32 %v3639_v20, %v1772_v43  ;;  %v1689_v17 = vpop.f32.mrf.mxu1 }
 0x173   : > { %v1885_v59 = vpop.f32.mrf.mxu0  ;;  %v1778_v23 = vadd.f32 %v1689_v17, %v4875_v22 }
 0x174   : > { %v4981_v45 = vadd.f32 %v1885_v59, %v1770_v35  ;;  %v3616_v53 = vpop.f32.mrf.mxu1 }
 0x175   : > { %v3642_v12 = vpop.f32.mrf.mxu0  ;;  %v1783_v6 = vadd.f32 %v3616_v53, %v4884_v63 }
 0x176   : > { %v4984_v16 = vadd.f32 %v3642_v12, %v1775_v31  ;;  %v1702_v0 = vpop.f32.mrf.mxu1 }
 0x177   : > { %v1898_v42 = vpop.f32.mrf.mxu0  ;;  %v1781_v1 = vadd.f32 %v1702_v0, %v4892_v27 }
 0x178   : > { %v4987_v29 = vadd.f32 %v1898_v42, %v1773_v8  ;;  %v3617_v38 = vpop.f32.mrf.mxu1 }
 0x179   : > { %v3643_v36 = vpop.f32.mrf.mxu0  ;;  %v1784_v51 = vadd.f32 %v3617_v38, %v4894_v30 }
 0x17a   : > { %v4990_v43 = vadd.f32 %v3643_v36, %v1776_v3  ;;  %v1705_v22 = vpop.f32.mrf.mxu1 }
 0x17b   : > { %v1901_v14 = vpop.f32.mrf.mxu0  ;;  %v1782_v13 = vadd.f32 %v1705_v22, %v4898_v55 }
 0x17c   : > { %v4993_v35 = vadd.f32 %v1901_v14, %v1774_v46  ;;  %v3620_v63 = vpop.f32.mrf.mxu1 }
 0x17d   : > { %v3646_v61 = vpop.f32.mrf.mxu0  ;;  %v1787_v26 = vadd.f32 %v3620_v63, %v4906_v34 }
 0x17e   : > { %v4996_v31 = vadd.f32 %v3646_v61, %v1779_v37  ;;  %v1718_v27 = vpop.f32.mrf.mxu1 }
 0x17f   : > { %v1914_v54 = vpop.f32.mrf.mxu0  ;;  %v1785_v49 = vadd.f32 %v1718_v27, %v4912_v10 }
 0x180   : > { %v4999_v8 = vadd.f32 %v1914_v54, %v1777_v32  ;;  %v3621_v30 = vpop.f32.mrf.mxu1 }
 0x181   : > { %v3647_v56 = vpop.f32.mrf.mxu0  ;;  %v1788_v24 = vadd.f32 %v3621_v30, %v4917_v50 }
 0x182   : > { %v5002_v3 = vadd.f32 %v3647_v56, %v1780_v44  ;;  %v1721_v55 = vpop.f32.mrf.mxu1 }
 0x183   : > { %v1917_v7 = vpop.f32.mrf.mxu0  ;;  %v1786_v48 = vadd.f32 %v1721_v55, %v4922_v41 }
 0x184   : > { %v5005_v46 = vadd.f32 %v1917_v7, %v1778_v23  ;;  %v3624_v34 = vpop.f32.mrf.mxu1 }
 0x185   : > { %v3650_v39 = vpop.f32.mrf.mxu0  ;;  %v1791_v58 = vadd.f32 %v3624_v34, %v4929_v18 }
 0x186   : > { %v5008_v37 = vadd.f32 %v3650_v39, %v1783_v6  ;;  %v1734_v10 = vpop.f32.mrf.mxu1 }
 0x187   : > { %v1930_v47 = vpop.f32.mrf.mxu0  ;;  %v1789_v15 = vadd.f32 %v1734_v10, %v4937_v4 }
 0x188   : > { %v5011_v32 = vadd.f32 %v1930_v47, %v1781_v1  ;;  %v3625_v50 = vpop.f32.mrf.mxu1 }
 0x189   : > { %v3651_v25 = vpop.f32.mrf.mxu0  ;;  %v1792_v20 = vadd.f32 %v3625_v50, %v4940_v62 }
 0x18a   : > { %v5014_v44 = vadd.f32 %v3651_v25, %v1784_v51  ;;  %v1737_v41 = vpop.f32.mrf.mxu1 }
 0x18b   : > { %v1933_v17 = vpop.f32.mrf.mxu0  ;;  %v1790_v59 = vadd.f32 %v1737_v41, %v4943_v19 }
 0x18c   : > { %v5017_v23 = vadd.f32 %v1933_v17, %v1782_v13  ;;  %v3628_v18 = vpop.f32.mrf.mxu1 }
 0x18d   : > { %v3654_v53 = vpop.f32.mrf.mxu0  ;;  %v1795_v12 = vadd.f32 %v3628_v18, %v4947_v9 }
 0x18e   : > { %v5020_v6 = vadd.f32 %v3654_v53, %v1787_v26  ;;  %v1750_v4 = vpop.f32.mrf.mxu1 }
 0x18f   : > { %v1946_v0 = vpop.f32.mrf.mxu0  ;;  %v1793_v42 = vadd.f32 %v1750_v4, %v4950_v60 }
 0x190   : > { %v5023_v1 = vadd.f32 %v1946_v0, %v1785_v49  ;;  %v3629_v62 = vpop.f32.mrf.mxu1 }
 0x191   : > { %v3655_v38 = vpop.f32.mrf.mxu0  ;;  %v1796_v36 = vadd.f32 %v3629_v62, %v4953_v52 }
 0x192   : > { %v5026_v51 = vadd.f32 %v3655_v38, %v1788_v24  ;;  %v1753_v19 = vpop.f32.mrf.mxu1 }
 0x193   : > { %v1949_v22 = vpop.f32.mrf.mxu0  ;;  %v1794_v14 = vadd.f32 %v1753_v19, %v4956_v11 }
 0x194   : > { %v5029_v13 = vadd.f32 %v1949_v22, %v1786_v48  ;;  %v3668_v63 = vpop.f32.mrf.mxu1 }
 0x195   : > { %v3658_v9 = vpop.f32.mrf.mxu0  ;;  %v2207_v60 = vadd.f32 %v3668_v63, %v4960_v33 }
 0x196   : > { %v5031_v61 = vadd.f32 %v3658_v9, %v1791_v58  ;;  %v2078_v27 = vpop.f32.mrf.mxu1 }
 0x197   : > { %v1962_v26 = vpop.f32.mrf.mxu0  ;;  %v2205_v52 = vadd.f32 %v2078_v27, %v4963_v21 }
 0x198   : > { %v5034_v54 = vadd.f32 %v1962_v26, %v1789_v15  ;;  %v3669_v30 = vpop.f32.mrf.mxu1 }
 0x199   : > { %v3659_v49 = vpop.f32.mrf.mxu0  ;;  %v2208_v11 = vadd.f32 %v3669_v30, %v4966_v57 }
 0x19a   : > { %v5037_v56 = vadd.f32 %v3659_v49, %v1792_v20  ;;  %v2081_v55 = vpop.f32.mrf.mxu1 }
 0x19b   : > { %v1965_v24 = vpop.f32.mrf.mxu0  ;;  %v2206_v48 = vadd.f32 %v2081_v55, %v4969_v2 }
 0x19c   : > { %v5040_v7 = vadd.f32 %v1965_v24, %v1790_v59  ;;  %v3672_v33 = vpop.f32.mrf.mxu1 }
 0x19d   : > { %v3662_v34 = vpop.f32.mrf.mxu0  ;;  %v2211_v58 = vadd.f32 %v3672_v33, %v4972_v5 }
 0x19e   : > { %v5043_v39 = vadd.f32 %v3662_v34, %v1795_v12  ;;  %v2094_v21 = vpop.f32.mrf.mxu1 }
 0x19f   : > { %v1978_v10 = vpop.f32.mrf.mxu0  ;;  %v2209_v15 = vadd.f32 %v2094_v21, %v4975_v40 }
 0x1a0   : > { %v5046_v47 = vadd.f32 %v1978_v10, %v1793_v42  ;;  %v3673_v57 = vpop.f32.mrf.mxu1 }
 0x1a1   : > { %v3663_v50 = vpop.f32.mrf.mxu0  ;;  %v2212_v20 = vadd.f32 %v3673_v57, %v4978_v28 }
 0x1a2   : > { %v5049_v25 = vadd.f32 %v3663_v50, %v1796_v36  ;;  %v2097_v2 = vpop.f32.mrf.mxu1 }
 0x1a3   : > { %v1981_v41 = vpop.f32.mrf.mxu0  ;;  %v2210_v59 = vadd.f32 %v2097_v2, %v4981_v45 }
 0x1a4   : > { %v5052_v17 = vadd.f32 %v1981_v41, %v1794_v14  ;;  %v3676_v18 = vpop.f32.mrf.mxu1 }
 0x1a5   : > { %v3702_v5 = vpop.f32.mrf.mxu0  ;;  %v2215_v53 = vadd.f32 %v3676_v18, %v4984_v16 }
 0x1a6   : > { %v5056_v12 = vadd.f32 %v3702_v5, %v2207_v60  ;;  %v2110_v4 = vpop.f32.mrf.mxu1 }
 0x1a7   : > { %v2284_v40 = vpop.f32.mrf.mxu0  ;;  %v2213_v0 = vadd.f32 %v2110_v4, %v4987_v29 }
 0x1a8   : > { %v5059_v42 = vadd.f32 %v2284_v40, %v2205_v52  ;;  %v3677_v62 = vpop.f32.mrf.mxu1 }
 0x1a9   : > { %v3703_v28 = vpop.f32.mrf.mxu0  ;;  %v2216_v38 = vadd.f32 %v3677_v62, %v4990_v43 }
 0x1aa   : > { %v5062_v36 = vadd.f32 %v3703_v28, %v2208_v11  ;;  %v2113_v19 = vpop.f32.mrf.mxu1 }
 0x1ab   : > { %v2287_v45 = vpop.f32.mrf.mxu0  ;;  %v2214_v22 = vadd.f32 %v2113_v19, %v4993_v35 }
 0x1ac   : > { %v5065_v14 = vadd.f32 %v2287_v45, %v2206_v48  ;;  %v3680_v16 = vpop.f32.mrf.mxu1 }
 0x1ad   : > { %v3706_v9 = vpop.f32.mrf.mxu0  ;;  %v2219_v63 = vadd.f32 %v3680_v16, %v4996_v31 }
 0x1ae   : > { %v5068_v60 = vadd.f32 %v3706_v9, %v2211_v58  ;;  %v2126_v29 = vpop.f32.mrf.mxu1 }
 0x1af   : > { %v2300_v26 = vpop.f32.mrf.mxu0  ;;  %v2217_v27 = vadd.f32 %v2126_v29, %v4999_v8 }
 0x1b0   : > { %v5071_v52 = vadd.f32 %v2300_v26, %v2209_v15  ;;  %v3681_v43 = vpop.f32.mrf.mxu1  ;;  %v5379_v26 = vmov 0.00390625  }
 0x1b1   : > { %v3707_v49 = vpop.f32.mrf.mxu0  ;;  %v2220_v30 = vadd.f32 %v3681_v43, %v5002_v3  ;;  %3018 = vmatprep.mubr.f32.mxu1 %v5379_v26 }
 0x1b2   : > { %v5074_v11 = vadd.f32 %v3707_v49, %v2212_v20  ;;  %v2129_v35 = vpop.f32.mrf.mxu1 }
 0x1b3   : > { %v2303_v24 = vpop.f32.mrf.mxu0  ;;  %v2218_v55 = vadd.f32 %v2129_v35, %v5005_v46 }
 0x1b4   : > { %v5077_v48 = vadd.f32 %v2303_v24, %v2210_v59  ;;  %v3684_v31 = vpop.f32.mrf.mxu1 }
 0x1b5   : > { %v3710_v34 = vpop.f32.mrf.mxu0  ;;  %v2223_v33 = vadd.f32 %v3684_v31, %v5008_v37 }
 0x1b6   : > { %v5080_v58 = vadd.f32 %v3710_v34, %v2215_v53  ;;  %v2142_v8 = vpop.f32.mrf.mxu1 }
 0x1b7   : > { %v2316_v10 = vpop.f32.mrf.mxu0  ;;  %v2221_v21 = vadd.f32 %v2142_v8, %v5011_v32 }
 0x1b8   : > { %v5083_v15 = vadd.f32 %v2316_v10, %v2213_v0  ;;  %v3685_v3 = vpop.f32.mrf.mxu1 }
 0x1b9   : > { %v3711_v50 = vpop.f32.mrf.mxu0  ;;  %v2224_v57 = vadd.f32 %v3685_v3, %v5014_v44 }
 0x1ba   : > { %v5086_v20 = vadd.f32 %v3711_v50, %v2216_v38  ;;  %v2145_v46 = vpop.f32.mrf.mxu1 }
 0x1bb   : > { %v2319_v41 = vpop.f32.mrf.mxu0  ;;  %v2222_v2 = vadd.f32 %v2145_v46, %v5017_v23 }
 0x1bc   : > { %v5089_v59 = vadd.f32 %v2319_v41, %v2214_v22  ;;  %v3688_v37 = vpop.f32.mrf.mxu1 }
 0x1bd   : > { %v3714_v18 = vpop.f32.mrf.mxu0  ;;  %v2227_v5 = vadd.f32 %v3688_v37, %v5020_v6 }
 0x1be   : > { %v5092_v53 = vadd.f32 %v3714_v18, %v2219_v63  ;;  %v2158_v32 = vpop.f32.mrf.mxu1 }
 0x1bf   : > { %v2332_v4 = vpop.f32.mrf.mxu0  ;;  %v2225_v40 = vadd.f32 %v2158_v32, %v5023_v1 }
 0x1c0   : > { %v5095_v0 = vadd.f32 %v2332_v4, %v2217_v27  ;;  %v3689_v44 = vpop.f32.mrf.mxu1 }
 0x1c1   : > { %v3715_v62 = vpop.f32.mrf.mxu0  ;;  %v2228_v28 = vadd.f32 %v3689_v44, %v5026_v51 }
 0x1c2   : > { %v5098_v38 = vadd.f32 %v3715_v62, %v2220_v30  ;;  %v2161_v23 = vpop.f32.mrf.mxu1 }
 0x1c3   : > { %v2335_v19 = vpop.f32.mrf.mxu0  ;;  %v2226_v45 = vadd.f32 %v2161_v23, %v5029_v13 }
 0x1c4   : > { %v5101_v22 = vadd.f32 %v2335_v19, %v2218_v55  ;;  %v3692_v6 = vpop.f32.mrf.mxu1 }
 0x1c5   : > { %v3718_v16 = vpop.f32.mrf.mxu0  ;;  %v2231_v9 = vadd.f32 %v3692_v6, %v5031_v61 }
 0x1c6   : > { %v5104_v63 = vadd.f32 %v3718_v16, %v2223_v33  ;;  %v2174_v1 = vpop.f32.mrf.mxu1 }
 0x1c7   : > { %v2348_v29 = vpop.f32.mrf.mxu0  ;;  %v2229_v51 = vadd.f32 %v2174_v1, %v5034_v54 }
 0x1c8   : > { %5445 = vst [vmem:[#allocation13_spill] sm:$0xff] %v5104_v63  ;;  %v5108_v27 = vadd.f32 %v2348_v29, %v2221_v21  ;;  %v3693_v43 = vpop.f32.mrf.mxu1 }
 0x1c9   : > { %v3719_v49 = vpop.f32.mrf.mxu0  ;;  %v2232_v13 = vadd.f32 %v3693_v43, %v5037_v56 }
 0x1ca   : > { %5446 = vst [vmem:[#allocation12_spill] sm:$0xff] %v5108_v27  ;;  %v5111_v30 = vadd.f32 %v3719_v49, %v2224_v57  ;;  %v2177_v35 = vpop.f32.mrf.mxu1 }
 0x1cb   : > { %v2351_v24 = vpop.f32.mrf.mxu0  ;;  %v2230_v61 = vadd.f32 %v2177_v35, %v5040_v7 }
 0x1cc   : > { %5447 = vst [vmem:[#allocation5_spill] sm:$0xff] %v5111_v30  ;;  %v5114_v55 = vadd.f32 %v2351_v24, %v2222_v2  ;;  %v3696_v31 = vpop.f32.mrf.mxu1 }
 0x1cd   : > { %v3722_v34 = vpop.f32.mrf.mxu0  ;;  %v2235_v33 = vadd.f32 %v3696_v31, %v5043_v39 }
 0x1ce   : > { %5448 = vst [vmem:[#allocation10_spill] sm:$0xff] %v5114_v55  ;;  %v5117_v8 = vadd.f32 %v3722_v34, %v2227_v5  ;;  %v2190_v54 = vpop.f32.mrf.mxu1 }
 0x1cf   : > { %v2364_v10 = vpop.f32.mrf.mxu0  ;;  %v2233_v21 = vadd.f32 %v2190_v54, %v5046_v47 }
 0x1d0   : > { %v5120_v3 = vadd.f32 %v2364_v10, %v2225_v40  ;;  %v5122_v56 = vpop.f32.mrf.mxu1 }
 0x1d1   : > { %v3723_v50 = vpop.f32.mrf.mxu0 }
 0x1d2   : > { %5449 = vst [vmem:[#allocation15_spill] sm:$0xff] %v5120_v3  ;;  %v5124_v57 = vadd.f32 %v3723_v50, %v2228_v28  ;;  %v5126_v7 = vpop.f32.mrf.mxu1 }
 0x1d3   : > { %v2367_v46 = vpop.f32.mrf.mxu0 }
 0x1d4   : > { %v5128_v41 = vadd.f32 %v2367_v46, %v2226_v45  ;;  %v3736_v39 = vpop.f32.mrf.mxu1 }
 0x1d5   : > { %v3726_v2 = vpop.f32.mrf.mxu0  ;;  %v2641_v18 = vadd.f32 %v3736_v39, %v5056_v12 }
 0x1d6   : > { %5450 = vst [vmem:[#allocation8_spill] sm:$0xff] %v5128_v41  ;;  %v5130_v37 = vadd.f32 %v3726_v2, %v2231_v9  ;;  %v2512_v47 = vpop.f32.mrf.mxu1 }
 0x1d7   : > { %v2380_v5 = vpop.f32.mrf.mxu0  ;;  %v2639_v4 = vadd.f32 %v2512_v47, %v5059_v42 }
 0x1d8   : > { %v5133_v32 = vadd.f32 %v2380_v5, %v2229_v51  ;;  %v3737_v44 = vpop.f32.mrf.mxu1 }
 0x1d9   : > { %v3727_v40 = vpop.f32.mrf.mxu0  ;;  %v2642_v28 = vadd.f32 %v3737_v44, %v5062_v36 }
 0x1da   : > { %v5136_v62 = vadd.f32 %v3727_v40, %v2232_v13  ;;  %v2515_v19 = vpop.f32.mrf.mxu1 }
 0x1db   : > { %v2383_v23 = vpop.f32.mrf.mxu0  ;;  %v2640_v6 = vadd.f32 %v2515_v19, %v5065_v14 }
 0x1dc   : > { %v5139_v45 = vadd.f32 %v2383_v23, %v2230_v61  ;;  %v3740_v12 = vpop.f32.mrf.mxu1 }
 0x1dd   : > { %v3730_v16 = vpop.f32.mrf.mxu0  ;;  %v2645_v1 = vadd.f32 %v3740_v12, %v5068_v60 }
 0x1de   : > { %v5142_v9 = vadd.f32 %v3730_v16, %v2235_v33  ;;  %v2528_v42 = vpop.f32.mrf.mxu1 }
 0x1df   : > { %v2396_v29 = vpop.f32.mrf.mxu0  ;;  %v2643_v43 = vadd.f32 %v2528_v42, %v5071_v52 }
 0x1e0   : > { %v5145_v51 = vadd.f32 %v2396_v29, %v2233_v21  ;;  %v3741_v36 = vpop.f32.mrf.mxu1 }
 0x1e1   : > { %v5148_v49 = vpop.f32.mrf.mxu0  ;;  %v2646_v13 = vadd.f32 %v3741_v36, %v5074_v11 }
 0x1e2   : > { %v2531_v14 = vpop.f32.mrf.mxu1 }
 0x1e3   : > { %v5151_v35 = vpop.f32.mrf.mxu0  ;;  %v2644_v24 = vadd.f32 %v2531_v14, %v5077_v48 }
 0x1e4   : > { %v5154_v61 = vpop.f32.mrf.mxu1 }
 0x1e5   : > { %v3770_v31 = vpop.f32.mrf.mxu0 }
 0x1e6   : > { %v5156_v60 = vadd.f32 %v3770_v31, %v2641_v18  ;;  %v5158_v34 = vpop.f32.mrf.mxu1 }
 0x1e7   : > { %v2724_v33 = vpop.f32.mrf.mxu0 }
 0x1e8   : > { %5451 = vst [vmem:[#allocation14_spill] sm:$0xff] %v5156_v60  ;;  %v5160_v54 = vadd.f32 %v2724_v33, %v2639_v4  ;;  %v5162_v52 = vpop.f32.mrf.mxu1 }
 0x1e9   : > { %v3771_v10 = vpop.f32.mrf.mxu0 }
 0x1ea   : > { %5452 = vst [vmem:[#allocation17_spill] sm:$0xff] %v5160_v54  ;;  %v5164_v21 = vadd.f32 %v3771_v10, %v2642_v28  ;;  %v5166_v11 = vpop.f32.mrf.mxu1 }
 0x1eb   : > { %v2727_v50 = vpop.f32.mrf.mxu0 }
 0x1ec   : > { %5453 = vst [vmem:[#allocation19_spill] sm:$0xff] %v5164_v21  ;;  %v5168_v46 = vadd.f32 %v2727_v50, %v2640_v6  ;;  %v3748_v48 = vpop.f32.mrf.mxu1 }
 0x1ed   : > { %v3774_v2 = vpop.f32.mrf.mxu0 }
 0x1ee   : > { %5454 = vst [vmem:[#allocation21_spill] sm:$0xff] %v5168_v46  ;;  %v5170_v39 = vadd.f32 %v3774_v2, %v2645_v1  ;;  %v5172_v18 = vpop.f32.mrf.mxu1 }
 0x1ef   : > { %v2740_v5 = vpop.f32.mrf.mxu0 }
 0x1f0   : > { %5455 = vst [vmem:[#allocation23_spill] sm:$0xff] %v5170_v39  ;;  %v5174_v47 = vadd.f32 %v2740_v5, %v2643_v43  ;;  %v3749_v4 = vpop.f32.mrf.mxu1 }
 0x1f1   : > { %v3775_v40 = vpop.f32.mrf.mxu0  ;;  %v2654_v39 = vadd.f32 %v3749_v4, %v5098_v38 }
 0x1f2   : > { %5456 = vst [vmem:[#allocation6_spill] sm:$0xff] %v5174_v47  ;;  %v5176_v44 = vadd.f32 %v3775_v40, %v2646_v13  ;;  %v2563_v28 = vpop.f32.mrf.mxu1 }
 0x1f3   : > { %v2743_v23 = vpop.f32.mrf.mxu0 }
 0x1f4   : > { %5457 = vst [vmem:[#allocation11_spill] sm:$0xff] %v5176_v44  ;;  %v5178_v19 = vadd.f32 %v2743_v23, %v2644_v24  ;;  %v5180_v16 = vpop.f32.mrf.mxu1 }
 0x1f5   : > { %5459 = vst [vmem:[#allocation18_spill] sm:$0xff] %v5180_v16  ;;  %v5182_v6 = vpop.f32.mrf.mxu0 }
 0x1f6   : > { %5458 = vst [vmem:[#allocation16_spill] sm:$0xff] %v5178_v19  ;;  %v5184_v12 = vpop.f32.mrf.mxu1 }
 0x1f7   : > { %5460 = vst [vmem:[#allocation20_spill] sm:$0xff] %v5184_v12  ;;  %v5186_v1 = vpop.f32.mrf.mxu0 }
 0x1f8   : > { %v5188_v29 = vpop.f32.mrf.mxu1 }
 0x1f9   : > { %5461 = vst [vmem:[#allocation22_spill] sm:$0xff] %v5188_v29  ;;  %v5190_v42 = vpop.f32.mrf.mxu0 }
 0x1fa   : > { %v5192_v43 = vpop.f32.mrf.mxu1 }
 0x1fb   : > { %5462 = vst [vmem:[#allocation4_spill] sm:$0xff] %v5192_v43  ;;  %v5194_v36 = vpop.f32.mrf.mxu0 }
 0x1fc   : > { %v5196_v13 = vpop.f32.mrf.mxu1 }
 0x1fd   : > { %v3782_v14 = vpop.f32.mrf.mxu0 }
 0x1fe   : > { %v5198_v24 = vpop.f32.mrf.mxu1 }
 0x1ff   : > { %5463 = vst [vmem:[#allocation2_spill] sm:$0xff] %v5198_v24  ;;  %v2772_v31 = vpop.f32.mrf.mxu0 }
 0x200   : > { %v5200_v33 = vpop.f32.mrf.mxu1 }
 0x201   : > { %v3783_v10 = vpop.f32.mrf.mxu0 }
 0x202   : > { %v5202_v50 = vpop.f32.mrf.mxu1  ;;  %v2866_v24 = vadd.f32 %v3783_v10, %v2654_v39 }
 0x203   : > { %5464 = vst [vmem:[#allocation25_spill] sm:$0xff] %v5202_v50  ;;  %v2775_v2 = vpop.f32.mrf.mxu0 }
 0x204   : > { %v3760_v5 = vpop.f32.mrf.mxu1 }
 0x205   : > { %v5204_v40 = vpop.f32.mrf.mxu0 }
 0x206   : > { %5465 = vst [vmem:[#allocation24_spill] sm:$0xff] %v5204_v40  ;;  %v5206_v23 = vpop.f32.mrf.mxu1 }
 0x207   : > { %v5208_v26 = vpop.f32.mrf.mxu0 }
 0x208   : > { %5466 = vst [vmem:[#allocation3_spill] sm:$0xff] %v5208_v26  ;;  %v3761_v46 = vpop.f32.mrf.mxu1 }
 0x209   : > { %v5210_v54 = vpop.f32.mrf.mxu0 }
 0x20a   : > { %5467 = vst [vmem:[#allocation7_spill] sm:$0xff] %v5210_v54  ;;  %v2611_v12 = vpop.f32.mrf.mxu1 }
 0x20b   : > { %v5212_v60 = vpop.f32.mrf.mxu0 }
 0x20c   : > { %5468 = vst [vmem:[#allocation9_spill] sm:$0xff] %v5212_v60  ;;  %v3764_v43 = vpop.f32.mrf.mxu1  ;;  %v2236_v60 = vadd.f32 %v5122_v56, %v5049_v25  ;;  %v2652_v25 = vadd.f32 %v2563_v28, %v5101_v22 }
 0x20d   : > { %v5214_v21 = vpop.f32.mrf.mxu0  ;;  %v2669_v44 = vadd.f32 %v3764_v43, %v5142_v9 }
 0x20e   : > { %5469 = vst [vmem:[#allocation26_spill] sm:$0xff] %v5214_v21  ;;  %v2624_v19 = vpop.f32.mrf.mxu1  ;;  %v2442_v30 = vadd.f32 %v5148_v49, %v2236_v60  ;;  %v2651_v49 = vadd.f32 %v5172_v18, %v5095_v0  ;;  %v2665_v0 = vadd.f32 %v3760_v5, %v5130_v37  ;;  %v5475_v5 = vld [vmem:[#allocation25_spill] sm:$0xff] }
 0x20f   : > { %v5216_v27 = vpop.f32.mrf.mxu0 }
 0x210   : > { %5470 = vst [vmem:[#allocation27_spill] sm:$0xff] %v5216_v27  ;;  %v3765_v63 = vpop.f32.mrf.mxu1  ;;  %v2234_v27 = vadd.f32 %v5126_v7, %v5052_v17  ;;  %v5237_v17 = vld [vmem:[%s5334_s2] ss:$0 sm:$0xff]  ;;  %v2667_v7 = vadd.f32 %v2624_v19, %v5145_v51  ;;  %v2650_v51 = vadd.f32 %v5162_v52, %v5086_v20 }
 0x211   : > { %v5218_v47 = vpop.f32.mrf.mxu0  ;;  %v2670_v41 = vadd.f32 %v3765_v63, %v2442_v30  ;;  %v2864_v63 = vadd.f32 %v2775_v2, %v2652_v25  ;;  %v2666_v30 = vadd.f32 %v3761_v46, %v5136_v62  ;;  %v2649_v62 = vadd.f32 %v5154_v61, %v5080_v58  ;;  %v5474_v2 = vld [vmem:[#allocation8_spill] sm:$0xff] }
 0x212   : > { %5471 = vst [vmem:[#allocation28_spill] sm:$0xff] %v5218_v47  ;;  %v2627_v3 = vpop.f32.mrf.mxu1  ;;  %v2440_v50 = vadd.f32 %v5151_v35, %v2234_v27  ;;  %v2905_v27 = vadd.f32 %v5237_v17, %v2866_v24  ;;  %v2663_v61 = vadd.f32 %v5206_v23, %v5133_v32 }
 0x213   : > { %v5220_v55 = vpop.f32.mrf.mxu0  ;;  %v2861_v37 = vadd.f32 %v5182_v6, %v2649_v62  ;;  %v2662_v6 = vadd.f32 %v5200_v33, %v5124_v57  ;;  %v5485_v62 = vld [vmem:[#allocation13_spill] sm:$0xff] }
 0x214   : > { %5472 = vst [vmem:[#allocation29_spill] sm:$0xff] %v5220_v55  ;;  %v2653_v55 = vadd.f32 %v3748_v48, %v5092_v53  ;;  %v2668_v9 = vadd.f32 %v2627_v3, %v2440_v50  ;;  %v2937_v46 = vmax.f32 %v2905_v27, 0.0 }
 0x215   : > { %v3794_v40 = vpop.f32.mrf.mxu0  ;;  %v5476_v23 = vld [vmem:[#allocation26_spill] sm:$0xff] }
 0x216   : > { %v2865_v38 = vadd.f32 %v3782_v14, %v2653_v55  ;;  %v2877_v20 = vadd.f32 %v3794_v40, %v2665_v0  ;;  %v2660_v40 = vadd.f32 %v5475_v5, %v5474_v2  ;;  %v5498_v2 = vld [vmem:[#allocation14_spill] sm:$0xff] }
 0x217   : > { %v5222_v16 = vpop.f32.mrf.mxu0  ;;  %v2892_v5 = vadd.f32 %v5237_v17, %v5498_v2 }
 0x218   : > { %v2904_v3 = vadd.f32 %v5237_v17, %v2865_v38  ;;  %v2916_v14 = vadd.f32 %v5237_v17, %v2877_v20  ;;  %v2875_v32 = vadd.f32 %v5222_v16, %v2663_v61 }
 0x219   : > { %v3795_v26 = vpop.f32.mrf.mxu0 }
 0x21a   : > { %v2878_v39 = vadd.f32 %v3795_v26, %v2666_v30  ;;  %v2648_v26 = vadd.f32 %v5166_v11, %v5089_v59  ;;  %v2936_v19 = vmax.f32 %v2904_v3, 0.0  ;;  %v2948_v25 = vmax.f32 %v2916_v14, 0.0  ;;  %v5480_v30 = vld [vmem:[#allocation11_spill] sm:$0xff]  ;;  %v5494_v14 = vld [vmem:[#allocation20_spill] sm:$0xff] }
 0x21b   : > { %v2823_v54 = vpop.f32.mrf.mxu0  ;;  %v2914_v38 = vadd.f32 %v5237_v17, %v2875_v32  ;;  %v5483_v3 = vld [vmem:[#allocation27_spill] sm:$0xff] }
 0x21c   : > { %v2860_v59 = vadd.f32 %v5194_v36, %v2648_v26  ;;  %v5473_v36 = vld [vmem:[#allocation28_spill] sm:$0xff] }
 0x21d   : > { %v3798_v29 = vpop.f32.mrf.mxu0  ;;  %v2874_v10 = vadd.f32 %v5473_v36, %v2662_v6  ;;  %v2946_v0 = vmax.f32 %v2914_v38, 0.0  ;;  %v5488_v26 = vld [vmem:[#allocation16_spill] sm:$0xff]  ;;  %v5499_v38 = vld [vmem:[#allocation21_spill] sm:$0xff] }
 0x21e   : > { %v2881_v47 = vadd.f32 %v3798_v29, %v2669_v44  ;;  %v2664_v44 = vadd.f32 %v2611_v12, %v5139_v45  ;;  %v2917_v29 = vadd.f32 %v5237_v17, %v2878_v39  ;;  %v2899_v16 = vadd.f32 %v5237_v17, %v2860_v59  ;;  %v5484_v39 = vld [vmem:[#allocation23_spill] sm:$0xff]  ;;  %v5492_v59 = vld [vmem:[#allocation6_spill] sm:$0xff]  ;;  %v5493_v6 = vld [vmem:[#allocation12_spill] sm:$0xff] }
 0x21f   : > { %v2836_v21 = vpop.f32.mrf.mxu0  ;;  %v2655_v32 = vadd.f32 %v5494_v14, %v5493_v6 }
 0x220   : > { %v2920_v55 = vadd.f32 %v5237_v17, %v2881_v47  ;;  %v2879_v35 = vadd.f32 %v2836_v21, %v2667_v7  ;;  %v2862_v21 = vadd.f32 %v5190_v42, %v2650_v51  ;;  %v2903_v47 = vadd.f32 %v5237_v17, %v2864_v63  ;;  %v5478_v7 = vld [vmem:[#allocation2_spill] sm:$0xff] }
 0x221   : > { %v3799_v56 = vpop.f32.mrf.mxu0  ;;  %v2876_v45 = vadd.f32 %v2823_v54, %v2664_v44  ;;  %v2647_v42 = vadd.f32 %v5158_v34, %v5083_v15  ;;  %v2900_v54 = vadd.f32 %v5237_v17, %v2861_v37  ;;  %v2661_v34 = vadd.f32 %v5196_v13, %v5117_v8 }
 0x222   : > { %v2882_v53 = vadd.f32 %v3799_v56, %v2670_v41  ;;  %v2863_v41 = vadd.f32 %v2772_v31, %v2651_v49  ;;  %v2952_v52 = vmax.f32 %v2920_v55, 0.0  ;;  %v2918_v28 = vadd.f32 %v5237_v17, %v2879_v35  ;;  %v5477_v56 = vld [vmem:[#allocation15_spill] sm:$0xff]  ;;  %v5479_v49 = vld [vmem:[#allocation29_spill] sm:$0xff] }
 0x223   : > { %v2839_v22 = vpop.f32.mrf.mxu0  ;;  %v2901_v43 = vadd.f32 %v5237_v17, %v2862_v21  ;;  %v2935_v11 = vmax.f32 %v2903_v47, 0.0  ;;  %v2859_v31 = vadd.f32 %v5186_v1, %v2647_v42  ;;  %v2949_v50 = vmax.f32 %v2917_v29, 0.0  ;;  %v5481_v35 = vld [vmem:[#allocation5_spill] sm:$0xff]  ;;  %v5486_v21 = vld [vmem:[#allocation18_spill] sm:$0xff]  ;;  %v5487_v47 = vld [vmem:[#allocation7_spill] sm:$0xff] }
 0x224   : > { %v2921_v60 = vadd.f32 %v5237_v17, %v2882_v53  ;;  %v2880_v48 = vadd.f32 %v2839_v22, %v2668_v9  ;;  %v2902_v58 = vadd.f32 %v5237_v17, %v2863_v41  ;;  %v2950_v24 = vmax.f32 %v2918_v28, 0.0  ;;  %v5491_v29 = vld [vmem:[#allocation24_spill] sm:$0xff] }
 0x225   : > { %v2915_v57 = vadd.f32 %v5237_v17, %v2876_v45  ;;  %v2933_v33 = vmax.f32 %v2901_v43, 0.0  ;;  %v2873_v1 = vadd.f32 %v5476_v23, %v2661_v34  ;;  %v2932_v8 = vmax.f32 %v2900_v54, 0.0  ;;  %v5495_v54 = vld [vmem:[#allocation9_spill] sm:$0xff]  ;;  %v5496_v34 = vld [vmem:[#allocation19_spill] sm:$0xff] }
 0x226   : > { %v2953_v18 = vmax.f32 %v2921_v60, 0.0  ;;  %v2919_v4 = vadd.f32 %v5237_v17, %v2880_v48  ;;  %v2934_v15 = vmax.f32 %v2902_v58, 0.0  ;;  %v2898_v13 = vadd.f32 %v5237_v17, %v2859_v31  ;;  %v5482_v60 = vld [vmem:[#allocation22_spill] sm:$0xff]  ;;  %v5490_v58 = vld [vmem:[#allocation4_spill] sm:$0xff] }
 0x227   : > { %v2659_v9 = vadd.f32 %v5478_v7, %v5477_v56  ;;  %v2913_v53 = vadd.f32 %v5237_v17, %v2874_v10  ;;  %v2872_v27 = vadd.f32 %v5479_v49, %v2660_v40  ;;  %v2947_v63 = vmax.f32 %v2915_v57, 0.0  ;;  %v5497_v57 = vld [vmem:[#allocation3_spill] sm:$0xff] }
 0x228   : > { %3459 = vmatprep.subr.mxu1 %v2953_v18  ;;  %v2951_v12 = vmax.f32 %v2919_v4, 0.0  ;;  %v2897_v22 = vadd.f32 %v5237_v17, %v5480_v30  ;;  %v2931_v55 = vmax.f32 %v2899_v16, 0.0  ;;  %v2658_v48 = vadd.f32 %v5482_v60, %v5481_v35 }
 0x229   : > { %3460 = vmatpush3.msra.mxu1 %v2937_v46  ;;  %v2912_v51 = vadd.f32 %v5237_v17, %v2873_v1  ;;  %v2871_v41 = vadd.f32 %v5483_v3, %v2659_v9  ;;  %v2896_v18 = vadd.f32 %v5237_v17, %v5484_v39  ;;  %v2930_v4 = vmax.f32 %v2898_v13, 0.0  ;;  %v5500_v9 = vld [vmem:[#allocation17_spill] sm:$0xff] }
 0x22a   : > { %3461 = vmatprep.subr.mxu1 %v2952_v52  ;;  %v2657_v46 = vadd.f32 %v5486_v21, %v5485_v62  ;;  %v2870_v44 = vadd.f32 %v5487_v47, %v2658_v48  ;;  %v2945_v20 = vmax.f32 %v2913_v53, 0.0  ;;  %v2911_v52 = vadd.f32 %v5237_v17, %v2872_v27 }
 0x22b   : > { %3462 = vmatpush3.msra.mxu1 %v2936_v19  ;;  %v2929_v28 = vmax.f32 %v2897_v22, 0.0  ;;  %v2895_v37 = vadd.f32 %v5237_v17, %v5488_v26  ;;  %v5489_v19 = vld [vmem:[#allocation10_spill] sm:$0xff]  ;;  %v2910_v42 = vadd.f32 %v5237_v17, %v2871_v41  ;;  %v2928_v43 = vmax.f32 %v2896_v18, 0.0 }
 0x22c   : > { %3463 = vmatprep.subr.mxu1 %v2951_v12  ;;  %v2656_v61 = vadd.f32 %v5490_v58, %v5489_v19  ;;  %v2869_v45 = vadd.f32 %v5491_v29, %v2657_v46  ;;  %v2944_v12 = vmax.f32 %v2912_v51, 0.0  ;;  %v2893_v36 = vadd.f32 %v5237_v17, %v5496_v34 }
 0x22d   : > { %3464 = vmatpush3.msra.mxu1 %v2935_v11  ;;  %v2894_v11 = vadd.f32 %v5237_v17, %v5492_v59  ;;  %v2927_v10 = vmax.f32 %v2895_v37, 0.0  ;;  %v2942_v16 = vmax.f32 %v2910_v42, 0.0  ;;  %v2924_v7 = vmax.f32 %v2892_v5, 0.0 }
 0x22e   : > { %3465 = vmatprep.subr.mxu1 %v2950_v24  ;;  %v2909_v24 = vadd.f32 %v5237_v17, %v2870_v44  ;;  %v2868_v31 = vadd.f32 %v5495_v54, %v2656_v61  ;;  %v2890_v53 = vadd.f32 %v5237_v17, %v5500_v9  ;;  %v5501_v22 = vmov 0.00390625  }
 0x22f   : > { %3466 = vmatpush3.msra.mxu1 %v2934_v15  ;;  %v2943_v15 = vmax.f32 %v2911_v52, 0.0  ;;  %v2926_v40 = vmax.f32 %v2894_v11, 0.0 }
 0x230   : > { %3467 = vmatprep.subr.mxu1 %v2949_v50  ;;  %v2908_v50 = vadd.f32 %v5237_v17, %v2869_v45  ;;  %v2941_v23 = vmax.f32 %v2909_v24, 0.0  ;;  %v2907_v1 = vadd.f32 %v5237_v17, %v2868_v31  ;;  %v2922_v30 = vmax.f32 %v2890_v53, 0.0 }
 0x231   : > { %3468 = vmatpush3.msra.mxu1 %v2933_v33  ;;  %v2867_v33 = vadd.f32 %v5497_v57, %v2655_v32 }
 0x232   : > { %3469 = vmatprep.subr.mxu1 %v2948_v25  ;;  %v2925_v25 = vmax.f32 %v2893_v36, 0.0  ;;  %v2940_v13 = vmax.f32 %v2908_v50, 0.0  ;;  %v2939_v49 = vmax.f32 %v2907_v1, 0.0 }
 0x233   : > { %3470 = vmatpush3.msra.mxu1 %v2932_v8  ;;  %v2891_v8 = vadd.f32 %v5237_v17, %v5499_v38  ;;  %v2906_v56 = vadd.f32 %v5237_v17, %v2867_v33 }
 0x234   : > { %3471 = vmatprep.subr.mxu1 %v2947_v63 }
 0x235   : > { %3472 = vmatpush3.msra.mxu1 %v2931_v55  ;;  %v2923_v27 = vmax.f32 %v2891_v8, 0.0  ;;  %v2938_v63 = vmax.f32 %v2906_v56, 0.0 }
 0x236   : > { %3473 = vmatprep.subr.mxu1 %v2946_v0 }
 0x237   : > { %3474 = vmatpush3.msra.mxu1 %v2930_v4 }
 0x238   : > { %3475 = vmatprep.subr.mxu1 %v2945_v20 }
 0x239   : > { %3476 = vmatpush3.msra.mxu1 %v2929_v28 }
 0x23a   : > { %3477 = vmatprep.subr.mxu1 %v2944_v12 }
 0x23b   : > { %3478 = vmatpush3.msra.mxu1 %v2928_v43 }
 0x23c   : > { %3479 = vmatprep.subr.mxu1 %v2943_v15 }
 0x23d   : > { %3480 = vmatpush3.msra.mxu1 %v2927_v10 }
 0x23e   : > { %3481 = vmatprep.subr.mxu1 %v2942_v16 }
 0x23f   : > { %3482 = vmatpush3.msra.mxu1 %v2926_v40 }
 0x240   : > { %3483 = vmatprep.subr.mxu1 %v2941_v23 }
 0x241   : > { %3484 = vmatpush3.msra.mxu1 %v2925_v25 }
 0x242   : > { %3485 = vmatprep.subr.mxu1 %v2940_v13 }
 0x243   : > { %3486 = vmatpush3.msra.mxu1 %v2924_v7 }
 0x244   : > { %3487 = vmatprep.subr.mxu1 %v2939_v49 }
 0x245   : > { %3488 = vmatpush3.msra.mxu1 %v2923_v27 }
 0x246   : > { %3489 = vmatprep.subr.mxu1 %v2938_v63 }
 0x247   : > { %3490 = vmatpush3.msra.mxu1 %v2922_v30 }
 0x248   : > { %3019 = vmatmul.mubr.f32.vlgmr.msra.gmra.mxu1 %v5501_v22 }
 0x308   : > { %v3491_v55 = vpop.f32.mrf.mxu1 }
 0x30a   : > { %v3492_v35 = vpop.f32.mrf.mxu1 }
 0x30b   : > { %v3493_v17 = vadd.f32 %v3492_v35, %v3491_v55 }
 0x30d   : > { %3025 = vst.msk [vmem:[%s166_s15] sm:$0x1] %vm3024_vm8, %v3493_v17 }
 0x30e PF: > { %s13_s12 = sadd.s32 1, %s3846_s12  }
 0x30f   : > { %p10_p4 = scmp.ge.s32.totalorder %s13_s12, 4  }
 0x311   :  { %12 = sbr.rel (!%p10_p4) target bundleno = 1 (0x1), region = 70 }

// kernel: multimodal_forward.3
= control target key start
LH: loop header
LB: loop body
LE: loop exit
PB: predicated region body
PF: predicated region fallthrough
CT: control target
= control target key end

     0   :  { %v5827_v1 = vmov 0   ;;  %vm117_vm0 = vcmask 261120   ;;  %s7714_s1 = inlined_call_operand.vmem [shape: bf16[32,512], index: 1, kind: input, shape index: {}]   ;;  %s7715_s0 = inlined_call_operand.vmem [shape: f32[8,32], index: 0, kind: input, shape index: {}]   ;;  %s7716_s4 = inlined_call_operand.vmem [shape: bf16[1024,512], index: 4, kind: input, shape index: {}]   ;;  %s7717_s3 = inlined_call_operand.vmem [shape: bf16[8,1024], index: 3, kind: input, shape index: {}]   ;;  %s7718_s6 = inlined_call_operand.vmem [shape: bf16[512,256], index: 6, kind: input, shape index: {}]   ;;  %s7719_s5 = inlined_call_operand.vmem [shape: f32[1,512], index: 5, kind: input, shape index: {}]   ;;  %s7720_s9 = inlined_call_operand.vmem [shape: bf16[256,512], index: 9, kind: input, shape index: {}]   ;;  %s7721_s8 = inlined_call_operand.vmem [shape: bf16[512,512], index: 8, kind: input, shape index: {}]   ;;  %s7722_s7 = inlined_call_operand.vmem [shape: f32[1,256], index: 7, kind: input, shape index: {}]   ;;  %s7723_s2 = inlined_call_operand.vmem [shape: f32[1,512], index: 2, kind: input, shape index: {}]   ;;  %s7724_s11 = inlined_call_operand.vmem [shape: bf16[512,128], index: 11, kind: input, shape index: {}]   ;;  %s7725_s10 = inlined_call_operand.vmem [shape: f32[1,512], index: 10, kind: input, shape index: {}]   ;;  %s7726_s12 = inlined_call_operand.vmem [shape: f32[1,128], index: 12, kind: input, shape index: {}]   ;;  %s7727_s13 = inlined_call_operand.vmem [shape: f32[8,128], index: 13, kind: output, shape index: {}]  }
   0x1   :  { %v5007_v0 = vld [vmem:[%s7714_s1 + $0x24] ss:$16 sps:$4 sm:$0xff]   ;;  %153 = vmatprep.mubr.bf16.mxu0 %v5827_v1  ;;  %194 = vmatprep.mubr.bf16.mxu1 %v5827_v1  ;;  %v5009_v2 = vld [vmem:[%s7714_s1 + $0x2c] ss:$16 sps:$4 sm:$0xff]   ;;  %v5011_v3 = vld [vmem:[%s7714_s1 + $0x20] ss:$16 sps:$4 sm:$0xff]  }
   0x2   :  { %133 = vmatprep.subr.bf16.mxu0 %v5007_v0  ;;  %v5012_v4 = vld [vmem:[%s7714_s1 + $0x28] ss:$16 sps:$4 sm:$0xff]   ;;  %174 = vmatprep.subr.bf16.mxu1 %v5009_v2  ;;  %v5013_v5 = vld [vmem:[%s7714_s1 + $0x4] ss:$16 sps:$4 sm:$0xff]   ;;  %v5015_v6 = vld [vmem:[%s7714_s1 + $0xc] ss:$16 sps:$4 sm:$0xff]  }
   0x3   :  { %134 = vmatpush1.bf16.msra.mxu0 %v5011_v3  ;;  %175 = vmatpush1.bf16.msra.mxu1 %v5012_v4  ;;  %v5017_v7 = vld [vmem:[%s7714_s1] ss:$16 sps:$4 sm:$0xff]   ;;  %v5018_v8 = vld [vmem:[%s7714_s1 + $0x8] ss:$16 sps:$4 sm:$0xff]   ;;  %v5021_v11 = vld [vmem:[%s7716_s4 + $0xe4] ss:$16 sps:$4 sm:$0xff]  }
   0x4   :  { %135 = vmatprep.subr.bf16.mxu0 %v5013_v5  ;;  %v45_v9 = vld [vmem:[%s7715_s0] sm:$0xff]  ;;  %176 = vmatprep.subr.bf16.mxu1 %v5015_v6  ;;  %v208_v57 = vld [vmem:[%s7717_s3 + $0x8] sm:$0xff] }
   0x5   :  { %v5019_v10 = vld [vmem:[%s7716_s4 + $0xe0] ss:$16 sps:$4 sm:$0xff]   ;;  %v46_v12 = vpack.c.bf16 %v45_v9, %v45_v9  ;;  %v5024_v14 = vld [vmem:[%s7716_s4 + $0x2e4] ss:$16 sps:$4 sm:$0xff]   ;;  %v6071_v60 = vcombine.high %v208_v57, %v208_v57 }
   0x6   :  { %v5022_v13 = vld [vmem:[%s7716_s4 + $0x2e0] ss:$16 sps:$4 sm:$0xff]   ;;  %v5027_v15 = vld [vmem:[%s7716_s4 + $0xc4] ss:$16 sps:$4 sm:$0xff]  }
   0x7   :  { %136 = vmatpush1.bf16.msra.mxu0 %v5017_v7  ;;  %177 = vmatpush1.bf16.msra.mxu1 %v5018_v8  ;;  %v5030_v16 = vld [vmem:[%s7716_s4 + $0x2c4] ss:$16 sps:$4 sm:$0xff]   ;;  %v5025_v17 = vld [vmem:[%s7716_s4 + $0xc0] ss:$16 sps:$4 sm:$0xff]  }
   0x8   :  { %1797 = vmatprep.subr.bf16.mxu0 %v5021_v11  ;;  %1838 = vmatprep.subr.bf16.mxu1 %v5024_v14  ;;  %v5028_v18 = vld [vmem:[%s7716_s4 + $0x2c0] ss:$16 sps:$4 sm:$0xff]   ;;  %v5033_v19 = vld [vmem:[%s7716_s4 + $0xa4] ss:$16 sps:$4 sm:$0xff]  }
   0x9   :  { %v5036_v20 = vld [vmem:[%s7716_s4 + $0x2a4] ss:$16 sps:$4 sm:$0xff]   ;;  %v5031_v21 = vld [vmem:[%s7716_s4 + $0xa0] ss:$16 sps:$4 sm:$0xff]  }
   0xa   :  { %4407 = vmatmul.mubr.msk.bf16.vlgmr.msra.gmra.mxu0 %vm117_vm0, %v46_v12  ;;  %4408 = vmatmul.mubr.msk.bf16.vlgmr.msra.gmra.mxu1 %vm117_vm0, %v46_v12  ;;  %v5034_v22 = vld [vmem:[%s7716_s4 + $0x2a0] ss:$16 sps:$4 sm:$0xff]   ;;  %v5039_v23 = vld [vmem:[%s7716_s4 + $0x84] ss:$16 sps:$4 sm:$0xff]  }
   0xb   :  { %1798 = vmatpush1.bf16.msra.mxu0 %v5019_v10  ;;  %1839 = vmatpush1.bf16.msra.mxu1 %v5022_v13  ;;  %v5042_v24 = vld [vmem:[%s7716_s4 + $0x284] ss:$16 sps:$4 sm:$0xff]   ;;  %v5037_v25 = vld [vmem:[%s7716_s4 + $0x80] ss:$16 sps:$4 sm:$0xff]  }
   0xc   :  { %1799 = vmatprep.subr.bf16.mxu0 %v5027_v15  ;;  %1840 = vmatprep.subr.bf16.mxu1 %v5030_v16  ;;  %v5040_v26 = vld [vmem:[%s7716_s4 + $0x280] ss:$16 sps:$4 sm:$0xff]   ;;  %v5045_v27 = vld [vmem:[%s7716_s4 + $0x64] ss:$16 sps:$4 sm:$0xff]  }
   0xd   :  { %v5048_v28 = vld [vmem:[%s7716_s4 + $0x264] ss:$16 sps:$4 sm:$0xff]   ;;  %v5043_v29 = vld [vmem:[%s7716_s4 + $0x60] ss:$16 sps:$4 sm:$0xff]   ;;  %1870 = vmatprep.mubr.bf16.mxu1 %v6071_v60 }
   0xe   :  { %v5046_v30 = vld [vmem:[%s7716_s4 + $0x260] ss:$16 sps:$4 sm:$0xff]   ;;  %v5051_v31 = vld [vmem:[%s7716_s4 + $0x44] ss:$16 sps:$4 sm:$0xff]  }
   0xf   :  { %1800 = vmatpush1.bf16.msra.mxu0 %v5025_v17  ;;  %1841 = vmatpush1.bf16.msra.mxu1 %v5028_v18  ;;  %v5054_v32 = vld [vmem:[%s7716_s4 + $0x244] ss:$16 sps:$4 sm:$0xff]   ;;  %v5049_v33 = vld [vmem:[%s7716_s4 + $0x40] ss:$16 sps:$4 sm:$0xff]   ;;  %v6137_v18 = vcombine.low %v208_v57, %v208_v57 }
  0x10   :  { %1801 = vmatprep.subr.bf16.mxu0 %v5033_v19  ;;  %1842 = vmatprep.subr.bf16.mxu1 %v5036_v20  ;;  %v5052_v34 = vld [vmem:[%s7716_s4 + $0x240] ss:$16 sps:$4 sm:$0xff]   ;;  %v5057_v35 = vld [vmem:[%s7716_s4 + $0x24] ss:$16 sps:$4 sm:$0xff]  }
  0x11   :  { %v5060_v36 = vld [vmem:[%s7716_s4 + $0x224] ss:$16 sps:$4 sm:$0xff]   ;;  %v5055_v37 = vld [vmem:[%s7716_s4 + $0x20] ss:$16 sps:$4 sm:$0xff]  }
  0x12   :  { %v5058_v38 = vld [vmem:[%s7716_s4 + $0x220] ss:$16 sps:$4 sm:$0xff]   ;;  %v5063_v39 = vld [vmem:[%s7716_s4 + $0x4] ss:$16 sps:$4 sm:$0xff]  }
  0x13   :  { %1802 = vmatpush1.bf16.msra.mxu0 %v5031_v21  ;;  %1843 = vmatpush1.bf16.msra.mxu1 %v5034_v22  ;;  %v5066_v40 = vld [vmem:[%s7716_s4 + $0x204] ss:$16 sps:$4 sm:$0xff]   ;;  %v5061_v41 = vld [vmem:[%s7716_s4] ss:$16 sps:$4 sm:$0xff]  }
  0x14   :  { %1803 = vmatprep.subr.bf16.mxu0 %v5039_v23  ;;  %1844 = vmatprep.subr.bf16.mxu1 %v5042_v24  ;;  %v5064_v42 = vld [vmem:[%s7716_s4 + $0x200] ss:$16 sps:$4 sm:$0xff]   ;;  %v5069_v43 = vld [vmem:[%s7716_s4 + $0x1e4] ss:$16 sps:$4 sm:$0xff]  }
  0x15   :  { %v5072_v44 = vld [vmem:[%s7716_s4 + $0x3e4] ss:$16 sps:$4 sm:$0xff]   ;;  %v5067_v45 = vld [vmem:[%s7716_s4 + $0x1e0] ss:$16 sps:$4 sm:$0xff]  }
  0x16   :  { %v5070_v46 = vld [vmem:[%s7716_s4 + $0x3e0] ss:$16 sps:$4 sm:$0xff]   ;;  %v5075_v47 = vld [vmem:[%s7716_s4 + $0x1c4] ss:$16 sps:$4 sm:$0xff]  }
  0x17   :  { %1804 = vmatpush1.bf16.msra.mxu0 %v5037_v25  ;;  %1845 = vmatpush1.bf16.msra.mxu1 %v5040_v26  ;;  %v5078_v48 = vld [vmem:[%s7716_s4 + $0x3c4] ss:$16 sps:$4 sm:$0xff]   ;;  %v5073_v49 = vld [vmem:[%s7716_s4 + $0x1c0] ss:$16 sps:$4 sm:$0xff]  }
  0x18   :  { %1805 = vmatprep.subr.bf16.mxu0 %v5045_v27  ;;  %1846 = vmatprep.subr.bf16.mxu1 %v5048_v28  ;;  %v5076_v50 = vld [vmem:[%s7716_s4 + $0x3c0] ss:$16 sps:$4 sm:$0xff]   ;;  %v5081_v51 = vld [vmem:[%s7716_s4 + $0x1a4] ss:$16 sps:$4 sm:$0xff]  }
  0x19   :  { %v5084_v52 = vld [vmem:[%s7716_s4 + $0x3a4] ss:$16 sps:$4 sm:$0xff]   ;;  %v5079_v53 = vld [vmem:[%s7716_s4 + $0x1a0] ss:$16 sps:$4 sm:$0xff]  }
  0x1a   :  { %v5082_v54 = vld [vmem:[%s7716_s4 + $0x3a0] ss:$16 sps:$4 sm:$0xff]   ;;  %v5087_v55 = vld [vmem:[%s7716_s4 + $0x184] ss:$16 sps:$4 sm:$0xff]  }
  0x1b   :  { %1806 = vmatpush1.bf16.msra.mxu0 %v5043_v29  ;;  %1847 = vmatpush1.bf16.msra.mxu1 %v5046_v30  ;;  %v207_v56 = vld [vmem:[%s7717_s3] sm:$0xff] }
  0x1c   :  { %1807 = vmatprep.subr.bf16.mxu0 %v5051_v31  ;;  %1848 = vmatprep.subr.bf16.mxu1 %v5054_v32  ;;  %v5090_v58 = vld [vmem:[%s7716_s4 + $0x384] ss:$16 sps:$4 sm:$0xff]   ;;  %v6069_v59 = vcombine.high %v207_v56, %v207_v56  ;;  %v5085_v61 = vld [vmem:[%s7716_s4 + $0x180] ss:$16 sps:$4 sm:$0xff]   ;;  %v6135_v17 = vcombine.low %v207_v56, %v207_v56 }
  0x1d   :  { %v5088_v62 = vld [vmem:[%s7716_s4 + $0x380] ss:$16 sps:$4 sm:$0xff]   ;;  %v5093_v63 = vld [vmem:[%s7716_s4 + $0x164] ss:$16 sps:$4 sm:$0xff]  }
  0x1e   :  { %1829 = vmatprep.mubr.bf16.mxu0 %v6069_v59  ;;  %v5096_v0 = vld [vmem:[%s7716_s4 + $0x364] ss:$16 sps:$4 sm:$0xff]   ;;  %v5091_v1 = vld [vmem:[%s7716_s4 + $0x160] ss:$16 sps:$4 sm:$0xff]  }
  0x1f   :  { %1808 = vmatpush1.bf16.msra.mxu0 %v5049_v33  ;;  %1849 = vmatpush1.bf16.msra.mxu1 %v5052_v34  ;;  %v5094_v2 = vld [vmem:[%s7716_s4 + $0x360] ss:$16 sps:$4 sm:$0xff]   ;;  %v5099_v3 = vld [vmem:[%s7716_s4 + $0x144] ss:$16 sps:$4 sm:$0xff]  }
  0x20   :  { %1809 = vmatprep.subr.bf16.mxu0 %v5057_v35  ;;  %1850 = vmatprep.subr.bf16.mxu1 %v5060_v36  ;;  %v5102_v4 = vld [vmem:[%s7716_s4 + $0x344] ss:$16 sps:$4 sm:$0xff]   ;;  %v5097_v5 = vld [vmem:[%s7716_s4 + $0x140] ss:$16 sps:$4 sm:$0xff]  }
  0x21   :  { %v5100_v6 = vld [vmem:[%s7716_s4 + $0x340] ss:$16 sps:$4 sm:$0xff]   ;;  %v5105_v7 = vld [vmem:[%s7716_s4 + $0x124] ss:$16 sps:$4 sm:$0xff]  }
  0x22   :  { %v5108_v8 = vld [vmem:[%s7716_s4 + $0x324] ss:$16 sps:$4 sm:$0xff]   ;;  %v5103_v9 = vld [vmem:[%s7716_s4 + $0x120] ss:$16 sps:$4 sm:$0xff]  }
  0x23   :  { %1810 = vmatpush1.bf16.msra.mxu0 %v5055_v37  ;;  %1851 = vmatpush1.bf16.msra.mxu1 %v5058_v38  ;;  %v5106_v10 = vld [vmem:[%s7716_s4 + $0x320] ss:$16 sps:$4 sm:$0xff]   ;;  %v5111_v11 = vld [vmem:[%s7716_s4 + $0x104] ss:$16 sps:$4 sm:$0xff]  }
  0x24   :  { %1811 = vmatprep.subr.bf16.mxu0 %v5063_v39  ;;  %1852 = vmatprep.subr.bf16.mxu1 %v5066_v40  ;;  %v5114_v12 = vld [vmem:[%s7716_s4 + $0x304] ss:$16 sps:$4 sm:$0xff]   ;;  %v5109_v13 = vld [vmem:[%s7716_s4 + $0x100] ss:$16 sps:$4 sm:$0xff]  }
  0x25   :  { %v5112_v14 = vld [vmem:[%s7716_s4 + $0x300] ss:$16 sps:$4 sm:$0xff]   ;;  %v5121_v15 = vld [vmem:[%s7716_s4 + $0x4e4] ss:$16 sps:$4 sm:$0xff]  }
  0x26   :  { %v5124_v16 = vld [vmem:[%s7716_s4 + $0x6e4] ss:$16 sps:$4 sm:$0xff]   ;;  %v5119_v19 = vld [vmem:[%s7716_s4 + $0x4e0] ss:$16 sps:$4 sm:$0xff]  }
  0x27   :  { %1812 = vmatpush1.bf16.msra.mxu0 %v5061_v41  ;;  %1853 = vmatpush1.bf16.msra.mxu1 %v5064_v42  ;;  %v5122_v20 = vld [vmem:[%s7716_s4 + $0x6e0] ss:$16 sps:$4 sm:$0xff]   ;;  %v5127_v21 = vld [vmem:[%s7716_s4 + $0x4c4] ss:$16 sps:$4 sm:$0xff]  }
  0x28   :  { %1813 = vmatprep.subr.bf16.mxu0 %v5069_v43  ;;  %1854 = vmatprep.subr.bf16.mxu1 %v5072_v44  ;;  %v5130_v22 = vld [vmem:[%s7716_s4 + $0x6c4] ss:$16 sps:$4 sm:$0xff]   ;;  %v5125_v23 = vld [vmem:[%s7716_s4 + $0x4c0] ss:$16 sps:$4 sm:$0xff]   ;;  %v6219_v43 = vld [vmem:[%s7717_s3 + $0x18] sm:$0xff] }
  0x29   :  { %v5128_v24 = vld [vmem:[%s7716_s4 + $0x6c0] ss:$16 sps:$4 sm:$0xff]   ;;  %v5133_v25 = vld [vmem:[%s7716_s4 + $0x4a4] ss:$16 sps:$4 sm:$0xff]  }
  0x2a   :  { %v5136_v26 = vld [vmem:[%s7716_s4 + $0x6a4] ss:$16 sps:$4 sm:$0xff]   ;;  %v5131_v27 = vld [vmem:[%s7716_s4 + $0x4a0] ss:$16 sps:$4 sm:$0xff]  }
  0x2b   :  { %1814 = vmatpush2.bf16.msra.mxu0 %v5067_v45  ;;  %1855 = vmatpush2.bf16.msra.mxu1 %v5070_v46  ;;  %v5134_v28 = vld [vmem:[%s7716_s4 + $0x6a0] ss:$16 sps:$4 sm:$0xff]   ;;  %v5139_v29 = vld [vmem:[%s7716_s4 + $0x484] ss:$16 sps:$4 sm:$0xff]   ;;  %v6229_v46 = vcombine.high %v6219_v43, %v6219_v43 }
  0x2c   :  { %1815 = vmatprep.subr.bf16.mxu0 %v5075_v47  ;;  %1856 = vmatprep.subr.bf16.mxu1 %v5078_v48  ;;  %v5142_v30 = vld [vmem:[%s7716_s4 + $0x684] ss:$16 sps:$4 sm:$0xff]   ;;  %v5137_v31 = vld [vmem:[%s7716_s4 + $0x480] ss:$16 sps:$4 sm:$0xff]  }
  0x2d   :  { %v5140_v32 = vld [vmem:[%s7716_s4 + $0x680] ss:$16 sps:$4 sm:$0xff]   ;;  %v5145_v33 = vld [vmem:[%s7716_s4 + $0x464] ss:$16 sps:$4 sm:$0xff]  }
  0x2e   :  { %v5148_v34 = vld [vmem:[%s7716_s4 + $0x664] ss:$16 sps:$4 sm:$0xff]   ;;  %v5143_v35 = vld [vmem:[%s7716_s4 + $0x460] ss:$16 sps:$4 sm:$0xff]  }
  0x2f   :  { %1816 = vmatpush2.bf16.msra.mxu0 %v5073_v49  ;;  %1857 = vmatpush2.bf16.msra.mxu1 %v5076_v50  ;;  %v5146_v36 = vld [vmem:[%s7716_s4 + $0x660] ss:$16 sps:$4 sm:$0xff]   ;;  %v5151_v37 = vld [vmem:[%s7716_s4 + $0x444] ss:$16 sps:$4 sm:$0xff]  }
  0x30   :  { %1817 = vmatprep.subr.bf16.mxu0 %v5081_v51  ;;  %1858 = vmatprep.subr.bf16.mxu1 %v5084_v52  ;;  %v5154_v38 = vld [vmem:[%s7716_s4 + $0x644] ss:$16 sps:$4 sm:$0xff]   ;;  %v5149_v39 = vld [vmem:[%s7716_s4 + $0x440] ss:$16 sps:$4 sm:$0xff]  }
  0x31   :  { %v5152_v40 = vld [vmem:[%s7716_s4 + $0x640] ss:$16 sps:$4 sm:$0xff]   ;;  %v5157_v44 = vld [vmem:[%s7716_s4 + $0x424] ss:$16 sps:$4 sm:$0xff]  }
  0x32   :  { %v6210_v41 = vld [vmem:[%s7717_s3 + $0x10] sm:$0xff] }
  0x33   :  { %1818 = vmatpush2.bf16.msra.mxu0 %v5079_v53  ;;  %1859 = vmatpush2.bf16.msra.mxu1 %v5082_v54  ;;  %v6214_v42 = vcombine.high %v6210_v41, %v6210_v41  ;;  %v5160_v45 = vld [vmem:[%s7716_s4 + $0x624] ss:$16 sps:$4 sm:$0xff]   ;;  %v5155_v47 = vld [vmem:[%s7716_s4 + $0x420] ss:$16 sps:$4 sm:$0xff]  }
  0x34   :  { %1819 = vmatprep.subr.bf16.mxu0 %v5087_v55  ;;  %1860 = vmatprep.subr.bf16.mxu1 %v5090_v58  ;;  %v5158_v48 = vld [vmem:[%s7716_s4 + $0x620] ss:$16 sps:$4 sm:$0xff]   ;;  %v5163_v49 = vld [vmem:[%s7716_s4 + $0x404] ss:$16 sps:$4 sm:$0xff]  }
  0x35   :  { %v5166_v50 = vld [vmem:[%s7716_s4 + $0x604] ss:$16 sps:$4 sm:$0xff]   ;;  %v5161_v51 = vld [vmem:[%s7716_s4 + $0x400] ss:$16 sps:$4 sm:$0xff]  }
  0x36   :  { %v5164_v52 = vld [vmem:[%s7716_s4 + $0x600] ss:$16 sps:$4 sm:$0xff]   ;;  %v5169_v53 = vld [vmem:[%s7716_s4 + $0x5e4] ss:$16 sps:$4 sm:$0xff]  }
  0x37   :  { %1820 = vmatpush2.bf16.msra.mxu0 %v5085_v61  ;;  %1861 = vmatpush2.bf16.msra.mxu1 %v5088_v62  ;;  %v5172_v54 = vld [vmem:[%s7716_s4 + $0x7e4] ss:$16 sps:$4 sm:$0xff]   ;;  %v5167_v55 = vld [vmem:[%s7716_s4 + $0x5e0] ss:$16 sps:$4 sm:$0xff]  }
  0x38   :  { %1821 = vmatprep.subr.bf16.mxu0 %v5093_v63  ;;  %1862 = vmatprep.subr.bf16.mxu1 %v5096_v0  ;;  %v5170_v56 = vld [vmem:[%s7716_s4 + $0x7e0] ss:$16 sps:$4 sm:$0xff]   ;;  %v5175_v57 = vld [vmem:[%s7716_s4 + $0x5c4] ss:$16 sps:$4 sm:$0xff]  }
  0x39   :  { %v5178_v58 = vld [vmem:[%s7716_s4 + $0x7c4] ss:$16 sps:$4 sm:$0xff]   ;;  %v5173_v61 = vld [vmem:[%s7716_s4 + $0x5c0] ss:$16 sps:$4 sm:$0xff]  }
  0x3a   :  { %v5176_v62 = vld [vmem:[%s7716_s4 + $0x7c0] ss:$16 sps:$4 sm:$0xff]   ;;  %v5181_v63 = vld [vmem:[%s7716_s4 + $0x5a4] ss:$16 sps:$4 sm:$0xff]  }
  0x3b   :  { %1822 = vmatpush2.bf16.msra.mxu0 %v5091_v1  ;;  %1863 = vmatpush2.bf16.msra.mxu1 %v5094_v2  ;;  %v5184_v0 = vld [vmem:[%s7716_s4 + $0x7a4] ss:$16 sps:$4 sm:$0xff]   ;;  %v5179_v1 = vld [vmem:[%s7716_s4 + $0x5a0] ss:$16 sps:$4 sm:$0xff]  }
  0x3c   :  { %1823 = vmatprep.subr.bf16.mxu0 %v5099_v3  ;;  %1864 = vmatprep.subr.bf16.mxu1 %v5102_v4  ;;  %v5182_v2 = vld [vmem:[%s7716_s4 + $0x7a0] ss:$16 sps:$4 sm:$0xff]   ;;  %v5187_v3 = vld [vmem:[%s7716_s4 + $0x584] ss:$16 sps:$4 sm:$0xff]  }
  0x3d   :  { %v5190_v4 = vld [vmem:[%s7716_s4 + $0x784] ss:$16 sps:$4 sm:$0xff]  }
  0x3f   :  { %1824 = vmatpush2.bf16.msra.mxu0 %v5097_v5  ;;  %1865 = vmatpush2.bf16.msra.mxu1 %v5100_v6  ;;  %v5185_v5 = vld [vmem:[%s7716_s4 + $0x580] ss:$16 sps:$4 sm:$0xff]  }
  0x40   :  { %1825 = vmatprep.subr.bf16.mxu0 %v5105_v7  ;;  %1866 = vmatprep.subr.bf16.mxu1 %v5108_v8  ;;  %v5188_v6 = vld [vmem:[%s7716_s4 + $0x780] ss:$16 sps:$4 sm:$0xff]   ;;  %v5193_v7 = vld [vmem:[%s7716_s4 + $0x564] ss:$16 sps:$4 sm:$0xff]  }
  0x41   :  { %v5196_v8 = vld [vmem:[%s7716_s4 + $0x764] ss:$16 sps:$4 sm:$0xff]  }
  0x43   :  { %1826 = vmatpush2.bf16.msra.mxu0 %v5103_v9  ;;  %1867 = vmatpush2.bf16.msra.mxu1 %v5106_v10  ;;  %v5191_v9 = vld [vmem:[%s7716_s4 + $0x560] ss:$16 sps:$4 sm:$0xff]  }
  0x44   :  { %1827 = vmatprep.subr.bf16.mxu0 %v5111_v11  ;;  %1868 = vmatprep.subr.bf16.mxu1 %v5114_v12  ;;  %v5194_v10 = vld [vmem:[%s7716_s4 + $0x760] ss:$16 sps:$4 sm:$0xff]   ;;  %v5199_v11 = vld [vmem:[%s7716_s4 + $0x544] ss:$16 sps:$4 sm:$0xff]  }
  0x45   :  { %v5202_v12 = vld [vmem:[%s7716_s4 + $0x744] ss:$16 sps:$4 sm:$0xff]  }
  0x47   :  { %1828 = vmatpush2.bf16.msra.mxu0 %v5109_v13  ;;  %1869 = vmatpush2.bf16.msra.mxu1 %v5112_v14  ;;  %v5197_v13 = vld [vmem:[%s7716_s4 + $0x540] ss:$16 sps:$4 sm:$0xff]  }
  0x48   :  { %1879 = vmatprep.subr.bf16.mxu0 %v5121_v15  ;;  %1920 = vmatprep.subr.bf16.mxu1 %v5124_v16  ;;  %v5200_v14 = vld [vmem:[%s7716_s4 + $0x740] ss:$16 sps:$4 sm:$0xff]   ;;  %v5205_v15 = vld [vmem:[%s7716_s4 + $0x524] ss:$16 sps:$4 sm:$0xff]  }
  0x49   :  { %v5208_v16 = vld [vmem:[%s7716_s4 + $0x724] ss:$16 sps:$4 sm:$0xff]  }
  0x4a   :  { %1830 = vmatmul.mubr.bf16.vlgmr.msra.gmra.mxu0 %v6135_v17  ;;  %1871 = vmatmul.mubr.bf16.vlgmr.msra.gmra.mxu1 %v6137_v18 }
  0x4b   :  { %1880 = vmatpush1.bf16.msra.mxu0 %v5119_v19  ;;  %1921 = vmatpush1.bf16.msra.mxu1 %v5122_v20  ;;  %v5203_v19 = vld [vmem:[%s7716_s4 + $0x520] ss:$16 sps:$4 sm:$0xff]  }
  0x4c   :  { %1881 = vmatprep.subr.bf16.mxu0 %v5127_v21  ;;  %1922 = vmatprep.subr.bf16.mxu1 %v5130_v22  ;;  %v5206_v20 = vld [vmem:[%s7716_s4 + $0x720] ss:$16 sps:$4 sm:$0xff]   ;;  %v5211_v21 = vld [vmem:[%s7716_s4 + $0x504] ss:$16 sps:$4 sm:$0xff]  }
  0x4d   :  { %1911 = vmatprep.mubr.bf16.mxu0 %v6214_v42  ;;  %1952 = vmatprep.mubr.bf16.mxu1 %v6229_v46  ;;  %v5214_v22 = vld [vmem:[%s7716_s4 + $0x704] ss:$16 sps:$4 sm:$0xff]  }
  0x4f   :  { %1882 = vmatpush1.bf16.msra.mxu0 %v5125_v23  ;;  %1923 = vmatpush1.bf16.msra.mxu1 %v5128_v24  ;;  %v5209_v23 = vld [vmem:[%s7716_s4 + $0x500] ss:$16 sps:$4 sm:$0xff]  }
  0x50   :  { %1883 = vmatprep.subr.bf16.mxu0 %v5133_v25  ;;  %1924 = vmatprep.subr.bf16.mxu1 %v5136_v26  ;;  %v5212_v24 = vld [vmem:[%s7716_s4 + $0x700] ss:$16 sps:$4 sm:$0xff]   ;;  %v5221_v25 = vld [vmem:[%s7716_s4 + $0xec] ss:$16 sps:$4 sm:$0xff]  }
  0x51   :  { %v5224_v26 = vld [vmem:[%s7716_s4 + $0x2ec] ss:$16 sps:$4 sm:$0xff]  }
  0x53   :  { %1884 = vmatpush1.bf16.msra.mxu0 %v5131_v27  ;;  %1925 = vmatpush1.bf16.msra.mxu1 %v5134_v28  ;;  %v6355_v27 = vcombine.low %v6210_v41, %v6210_v41  ;;  %v6359_v28 = vcombine.low %v6219_v43, %v6219_v43  ;;  %v5245_v41 = vld [vmem:[%s7716_s4 + $0x6c] ss:$16 sps:$4 sm:$0xff]  }
  0x54   :  { %1885 = vmatprep.subr.bf16.mxu0 %v5139_v29  ;;  %1926 = vmatprep.subr.bf16.mxu1 %v5142_v30  ;;  %v5219_v29 = vld [vmem:[%s7716_s4 + $0xe8] ss:$16 sps:$4 sm:$0xff]   ;;  %v5248_v43 = vld [vmem:[%s7716_s4 + $0x26c] ss:$16 sps:$4 sm:$0xff]  }
  0x55   :  { %v5222_v30 = vld [vmem:[%s7716_s4 + $0x2e8] ss:$16 sps:$4 sm:$0xff]  }
  0x57   :  { %1886 = vmatpush1.bf16.msra.mxu0 %v5137_v31  ;;  %1927 = vmatpush1.bf16.msra.mxu1 %v5140_v32  ;;  %v5227_v31 = vld [vmem:[%s7716_s4 + $0xcc] ss:$16 sps:$4 sm:$0xff]  }
  0x58   :  { %1887 = vmatprep.subr.bf16.mxu0 %v5145_v33  ;;  %1928 = vmatprep.subr.bf16.mxu1 %v5148_v34  ;;  %v5230_v32 = vld [vmem:[%s7716_s4 + $0x2cc] ss:$16 sps:$4 sm:$0xff]   ;;  %v5225_v33 = vld [vmem:[%s7716_s4 + $0xc8] ss:$16 sps:$4 sm:$0xff]  }
  0x59   :  { %v5228_v34 = vld [vmem:[%s7716_s4 + $0x2c8] ss:$16 sps:$4 sm:$0xff]  }
  0x5b   :  { %1888 = vmatpush1.bf16.msra.mxu0 %v5143_v35  ;;  %1929 = vmatpush1.bf16.msra.mxu1 %v5146_v36  ;;  %v5233_v35 = vld [vmem:[%s7716_s4 + $0xac] ss:$16 sps:$4 sm:$0xff]  }
  0x5c   :  { %1889 = vmatprep.subr.bf16.mxu0 %v5151_v37  ;;  %1930 = vmatprep.subr.bf16.mxu1 %v5154_v38  ;;  %v5236_v36 = vld [vmem:[%s7716_s4 + $0x2ac] ss:$16 sps:$4 sm:$0xff]   ;;  %v5231_v37 = vld [vmem:[%s7716_s4 + $0xa8] ss:$16 sps:$4 sm:$0xff]  }
  0x5d   :  { %v5234_v38 = vld [vmem:[%s7716_s4 + $0x2a8] ss:$16 sps:$4 sm:$0xff]  }
  0x5f   :  { %1890 = vmatpush1.bf16.msra.mxu0 %v5149_v39  ;;  %1931 = vmatpush1.bf16.msra.mxu1 %v5152_v40  ;;  %v5239_v39 = vld [vmem:[%s7716_s4 + $0x8c] ss:$16 sps:$4 sm:$0xff]   ;;  %v5240_v40 = vld [vmem:[%s7716_s4 + $0x288] ss:$16 sps:$4 sm:$0xff]  }
  0x60   :  { %1891 = vmatprep.subr.bf16.mxu0 %v5157_v44  ;;  %1932 = vmatprep.subr.bf16.mxu1 %v5160_v45  ;;  %v5243_v44 = vld [vmem:[%s7716_s4 + $0x68] ss:$16 sps:$4 sm:$0xff]  }
  0x61   :  { %v5246_v45 = vld [vmem:[%s7716_s4 + $0x268] ss:$16 sps:$4 sm:$0xff]  }
  0x63   :  { %1892 = vmatpush1.bf16.msra.mxu0 %v5155_v47  ;;  %1933 = vmatpush1.bf16.msra.mxu1 %v5158_v48  ;;  %v5251_v47 = vld [vmem:[%s7716_s4 + $0x4c] ss:$16 sps:$4 sm:$0xff]  }
  0x64   :  { %1893 = vmatprep.subr.bf16.mxu0 %v5163_v49  ;;  %1934 = vmatprep.subr.bf16.mxu1 %v5166_v50  ;;  %v5254_v48 = vld [vmem:[%s7716_s4 + $0x24c] ss:$16 sps:$4 sm:$0xff]   ;;  %v5249_v49 = vld [vmem:[%s7716_s4 + $0x48] ss:$16 sps:$4 sm:$0xff]  }
  0x65   :  { %v5252_v50 = vld [vmem:[%s7716_s4 + $0x248] ss:$16 sps:$4 sm:$0xff]  }
  0x67   :  { %1894 = vmatpush1.bf16.msra.mxu0 %v5161_v51  ;;  %1935 = vmatpush1.bf16.msra.mxu1 %v5164_v52  ;;  %v5257_v51 = vld [vmem:[%s7716_s4 + $0x2c] ss:$16 sps:$4 sm:$0xff]  }
  0x68   :  { %1895 = vmatprep.subr.bf16.mxu0 %v5169_v53  ;;  %1936 = vmatprep.subr.bf16.mxu1 %v5172_v54  ;;  %v5260_v52 = vld [vmem:[%s7716_s4 + $0x22c] ss:$16 sps:$4 sm:$0xff]   ;;  %v5255_v53 = vld [vmem:[%s7716_s4 + $0x28] ss:$16 sps:$4 sm:$0xff]  }
  0x69   :  { %v5258_v54 = vld [vmem:[%s7716_s4 + $0x228] ss:$16 sps:$4 sm:$0xff]  }
  0x6b   :  { %1896 = vmatpush2.bf16.msra.mxu0 %v5167_v55  ;;  %1937 = vmatpush2.bf16.msra.mxu1 %v5170_v56  ;;  %v5263_v55 = vld [vmem:[%s7716_s4 + $0xc] ss:$16 sps:$4 sm:$0xff]  }
  0x6c   :  { %1897 = vmatprep.subr.bf16.mxu0 %v5175_v57  ;;  %1938 = vmatprep.subr.bf16.mxu1 %v5178_v58  ;;  %v5266_v56 = vld [vmem:[%s7716_s4 + $0x20c] ss:$16 sps:$4 sm:$0xff]   ;;  %v5261_v57 = vld [vmem:[%s7716_s4 + $0x8] ss:$16 sps:$4 sm:$0xff]  }
  0x6d   :  { %v5264_v58 = vld [vmem:[%s7716_s4 + $0x208] ss:$16 sps:$4 sm:$0xff]  }
  0x6f   :  { %1898 = vmatpush2.bf16.msra.mxu0 %v5173_v61  ;;  %1939 = vmatpush2.bf16.msra.mxu1 %v5176_v62  ;;  %v5269_v61 = vld [vmem:[%s7716_s4 + $0x1ec] ss:$16 sps:$4 sm:$0xff]  }
  0x70   :  { %1899 = vmatprep.subr.bf16.mxu0 %v5181_v63  ;;  %1940 = vmatprep.subr.bf16.mxu1 %v5184_v0  ;;  %v5272_v62 = vld [vmem:[%s7716_s4 + $0x3ec] ss:$16 sps:$4 sm:$0xff]   ;;  %v5267_v63 = vld [vmem:[%s7716_s4 + $0x1e8] ss:$16 sps:$4 sm:$0xff]  }
  0x71   :  { %v5270_v0 = vld [vmem:[%s7716_s4 + $0x3e8] ss:$16 sps:$4 sm:$0xff]  }
  0x73   :  { %1900 = vmatpush2.bf16.msra.mxu0 %v5179_v1  ;;  %1941 = vmatpush2.bf16.msra.mxu1 %v5182_v2  ;;  %v5275_v1 = vld [vmem:[%s7716_s4 + $0x1cc] ss:$16 sps:$4 sm:$0xff]  }
  0x74   :  { %1901 = vmatprep.subr.bf16.mxu0 %v5187_v3  ;;  %1942 = vmatprep.subr.bf16.mxu1 %v5190_v4  ;;  %v5278_v2 = vld [vmem:[%s7716_s4 + $0x3cc] ss:$16 sps:$4 sm:$0xff]   ;;  %v5273_v3 = vld [vmem:[%s7716_s4 + $0x1c8] ss:$16 sps:$4 sm:$0xff]  }
  0x75   :  { %v5276_v4 = vld [vmem:[%s7716_s4 + $0x3c8] ss:$16 sps:$4 sm:$0xff]  }
  0x77   :  { %1902 = vmatpush2.bf16.msra.mxu0 %v5185_v5  ;;  %1943 = vmatpush2.bf16.msra.mxu1 %v5188_v6  ;;  %v5281_v5 = vld [vmem:[%s7716_s4 + $0x1ac] ss:$16 sps:$4 sm:$0xff]  }
  0x78   :  { %1903 = vmatprep.subr.bf16.mxu0 %v5193_v7  ;;  %1944 = vmatprep.subr.bf16.mxu1 %v5196_v8  ;;  %v5284_v6 = vld [vmem:[%s7716_s4 + $0x3ac] ss:$16 sps:$4 sm:$0xff]   ;;  %v5279_v7 = vld [vmem:[%s7716_s4 + $0x1a8] ss:$16 sps:$4 sm:$0xff]  }
  0x79   :  { %v5282_v8 = vld [vmem:[%s7716_s4 + $0x3a8] ss:$16 sps:$4 sm:$0xff]  }
  0x7b   :  { %1904 = vmatpush2.bf16.msra.mxu0 %v5191_v9  ;;  %1945 = vmatpush2.bf16.msra.mxu1 %v5194_v10  ;;  %v5287_v9 = vld [vmem:[%s7716_s4 + $0x18c] ss:$16 sps:$4 sm:$0xff]  }
  0x7c   :  { %1905 = vmatprep.subr.bf16.mxu0 %v5199_v11  ;;  %1946 = vmatprep.subr.bf16.mxu1 %v5202_v12  ;;  %v5290_v10 = vld [vmem:[%s7716_s4 + $0x38c] ss:$16 sps:$4 sm:$0xff]   ;;  %v5285_v11 = vld [vmem:[%s7716_s4 + $0x188] ss:$16 sps:$4 sm:$0xff]  }
  0x7d   :  { %v5288_v12 = vld [vmem:[%s7716_s4 + $0x388] ss:$16 sps:$4 sm:$0xff]  }
  0x7f   :  { %1906 = vmatpush2.bf16.msra.mxu0 %v5197_v13  ;;  %1947 = vmatpush2.bf16.msra.mxu1 %v5200_v14  ;;  %v5293_v13 = vld [vmem:[%s7716_s4 + $0x16c] ss:$16 sps:$4 sm:$0xff]  }
  0x80   :  { %1907 = vmatprep.subr.bf16.mxu0 %v5205_v15  ;;  %1948 = vmatprep.subr.bf16.mxu1 %v5208_v16  ;;  %v5296_v14 = vld [vmem:[%s7716_s4 + $0x36c] ss:$16 sps:$4 sm:$0xff]   ;;  %v5291_v15 = vld [vmem:[%s7716_s4 + $0x168] ss:$16 sps:$4 sm:$0xff]  }
  0x81   :  { %v5294_v16 = vld [vmem:[%s7716_s4 + $0x368] ss:$16 sps:$4 sm:$0xff]  }
  0x83   :  { %1908 = vmatpush2.bf16.msra.mxu0 %v5203_v19  ;;  %1949 = vmatpush2.bf16.msra.mxu1 %v5206_v20  ;;  %v5299_v19 = vld [vmem:[%s7716_s4 + $0x14c] ss:$16 sps:$4 sm:$0xff]  }
  0x84   :  { %1909 = vmatprep.subr.bf16.mxu0 %v5211_v21  ;;  %1950 = vmatprep.subr.bf16.mxu1 %v5214_v22  ;;  %v5302_v20 = vld [vmem:[%s7716_s4 + $0x34c] ss:$16 sps:$4 sm:$0xff]   ;;  %v5297_v21 = vld [vmem:[%s7716_s4 + $0x148] ss:$16 sps:$4 sm:$0xff]  }
  0x85   :  { %v5300_v22 = vld [vmem:[%s7716_s4 + $0x348] ss:$16 sps:$4 sm:$0xff]  }
  0x87   :  { %1910 = vmatpush2.bf16.msra.mxu0 %v5209_v23  ;;  %1951 = vmatpush2.bf16.msra.mxu1 %v5212_v24  ;;  %v5305_v23 = vld [vmem:[%s7716_s4 + $0x12c] ss:$16 sps:$4 sm:$0xff]  }
  0x88   :  { %1961 = vmatprep.subr.bf16.mxu0 %v5221_v25  ;;  %2002 = vmatprep.subr.bf16.mxu1 %v5224_v26  ;;  %v5308_v24 = vld [vmem:[%s7716_s4 + $0x32c] ss:$16 sps:$4 sm:$0xff]   ;;  %v5303_v25 = vld [vmem:[%s7716_s4 + $0x128] ss:$16 sps:$4 sm:$0xff]  }
  0x89   :  { %v5306_v26 = vld [vmem:[%s7716_s4 + $0x328] ss:$16 sps:$4 sm:$0xff]  }
  0x8a   :  { %1912 = vmatmul.mubr.bf16.vlgmr.msra.gmra.mxu0 %v6355_v27  ;;  %1953 = vmatmul.mubr.bf16.vlgmr.msra.gmra.mxu1 %v6359_v28 }
  0x8b   :  { %1962 = vmatpush1.bf16.msra.mxu0 %v5219_v29  ;;  %2003 = vmatpush1.bf16.msra.mxu1 %v5222_v30  ;;  %v5311_v29 = vld [vmem:[%s7716_s4 + $0x10c] ss:$16 sps:$4 sm:$0xff]  }
  0x8c   :  { %1963 = vmatprep.subr.bf16.mxu0 %v5227_v31  ;;  %2004 = vmatprep.subr.bf16.mxu1 %v5230_v32  ;;  %v5314_v30 = vld [vmem:[%s7716_s4 + $0x30c] ss:$16 sps:$4 sm:$0xff]   ;;  %v5309_v31 = vld [vmem:[%s7716_s4 + $0x108] ss:$16 sps:$4 sm:$0xff]  }
  0x8d   :  { %1993 = vmatprep.mubr.bf16.mxu0 %v6069_v59  ;;  %2034 = vmatprep.mubr.bf16.mxu1 %v6071_v60  ;;  %v5242_v59 = vld [vmem:[%s7716_s4 + $0x28c] ss:$16 sps:$4 sm:$0xff]   ;;  %v5237_v60 = vld [vmem:[%s7716_s4 + $0x88] ss:$16 sps:$4 sm:$0xff]  }
  0x8e   :  { %v5312_v32 = vld [vmem:[%s7716_s4 + $0x308] ss:$16 sps:$4 sm:$0xff]  }
  0x8f   :  { %1964 = vmatpush1.bf16.msra.mxu0 %v5225_v33  ;;  %2005 = vmatpush1.bf16.msra.mxu1 %v5228_v34  ;;  %v5317_v33 = vld [vmem:[%s7716_s4 + $0x4ec] ss:$16 sps:$4 sm:$0xff]  }
  0x90   :  { %1965 = vmatprep.subr.bf16.mxu0 %v5233_v35  ;;  %2006 = vmatprep.subr.bf16.mxu1 %v5236_v36  ;;  %v5320_v34 = vld [vmem:[%s7716_s4 + $0x6ec] ss:$16 sps:$4 sm:$0xff]   ;;  %v5315_v35 = vld [vmem:[%s7716_s4 + $0x4e8] ss:$16 sps:$4 sm:$0xff]  }
  0x91   :  { %v5318_v36 = vld [vmem:[%s7716_s4 + $0x6e8] ss:$16 sps:$4 sm:$0xff]  }
  0x93   :  { %1966 = vmatpush1.bf16.msra.mxu0 %v5231_v37  ;;  %2007 = vmatpush1.bf16.msra.mxu1 %v5234_v38  ;;  %v5323_v37 = vld [vmem:[%s7716_s4 + $0x4cc] ss:$16 sps:$4 sm:$0xff]  }
  0x94   :  { %1967 = vmatprep.subr.bf16.mxu0 %v5239_v39  ;;  %2008 = vmatprep.subr.bf16.mxu1 %v5242_v59  ;;  %v5326_v38 = vld [vmem:[%s7716_s4 + $0x6cc] ss:$16 sps:$4 sm:$0xff]   ;;  %v5321_v39 = vld [vmem:[%s7716_s4 + $0x4c8] ss:$16 sps:$4 sm:$0xff]  }
  0x95   :  { %v5324_v59 = vld [vmem:[%s7716_s4 + $0x6c8] ss:$16 sps:$4 sm:$0xff]  }
  0x97   :  { %1968 = vmatpush1.bf16.msra.mxu0 %v5237_v60  ;;  %2009 = vmatpush1.bf16.msra.mxu1 %v5240_v40 }
  0x98   :  { %1969 = vmatprep.subr.bf16.mxu0 %v5245_v41  ;;  %2010 = vmatprep.subr.bf16.mxu1 %v5248_v43  ;;  %v5329_v41 = vld [vmem:[%s7716_s4 + $0x4ac] ss:$16 sps:$4 sm:$0xff]  }
  0x9b   :  { %1970 = vmatpush1.bf16.msra.mxu0 %v5243_v44  ;;  %2011 = vmatpush1.bf16.msra.mxu1 %v5246_v45  ;;  %v5332_v45 = vld [vmem:[%s7716_s4 + $0x6ac] ss:$16 sps:$4 sm:$0xff]  }
  0x9c   :  { %1971 = vmatprep.subr.bf16.mxu0 %v5251_v47  ;;  %2012 = vmatprep.subr.bf16.mxu1 %v5254_v48 }
  0x9f   :  { %1972 = vmatpush1.bf16.msra.mxu0 %v5249_v49  ;;  %2013 = vmatpush1.bf16.msra.mxu1 %v5252_v50  ;;  %v5335_v49 = vld [vmem:[%s7716_s4 + $0x48c] ss:$16 sps:$4 sm:$0xff]  }
  0xa0   :  { %1973 = vmatprep.subr.bf16.mxu0 %v5257_v51  ;;  %2014 = vmatprep.subr.bf16.mxu1 %v5260_v52  ;;  %v5338_v52 = vld [vmem:[%s7716_s4 + $0x68c] ss:$16 sps:$4 sm:$0xff]  }
  0xa3   :  { %1974 = vmatpush1.bf16.msra.mxu0 %v5255_v53  ;;  %2015 = vmatpush1.bf16.msra.mxu1 %v5258_v54  ;;  %v5341_v53 = vld [vmem:[%s7716_s4 + $0x46c] ss:$16 sps:$4 sm:$0xff]  }
  0xa4   :  { %1975 = vmatprep.subr.bf16.mxu0 %v5263_v55  ;;  %2016 = vmatprep.subr.bf16.mxu1 %v5266_v56  ;;  %v5344_v54 = vld [vmem:[%s7716_s4 + $0x66c] ss:$16 sps:$4 sm:$0xff]   ;;  %v5339_v55 = vld [vmem:[%s7716_s4 + $0x468] ss:$16 sps:$4 sm:$0xff]  }
  0xa5   :  { %v5342_v56 = vld [vmem:[%s7716_s4 + $0x668] ss:$16 sps:$4 sm:$0xff]  }
  0xa7   :  { %1976 = vmatpush1.bf16.msra.mxu0 %v5261_v57  ;;  %2017 = vmatpush1.bf16.msra.mxu1 %v5264_v58  ;;  %v5347_v57 = vld [vmem:[%s7716_s4 + $0x44c] ss:$16 sps:$4 sm:$0xff]  }
  0xa8   :  { %1977 = vmatprep.subr.bf16.mxu0 %v5269_v61  ;;  %2018 = vmatprep.subr.bf16.mxu1 %v5272_v62  ;;  %v5350_v58 = vld [vmem:[%s7716_s4 + $0x64c] ss:$16 sps:$4 sm:$0xff]   ;;  %v5345_v61 = vld [vmem:[%s7716_s4 + $0x448] ss:$16 sps:$4 sm:$0xff]  }
  0xa9   :  { %v5348_v62 = vld [vmem:[%s7716_s4 + $0x648] ss:$16 sps:$4 sm:$0xff]  }
  0xab   :  { %1978 = vmatpush2.bf16.msra.mxu0 %v5267_v63  ;;  %2019 = vmatpush2.bf16.msra.mxu1 %v5270_v0  ;;  %v5353_v63 = vld [vmem:[%s7716_s4 + $0x42c] ss:$16 sps:$4 sm:$0xff]  }
  0xac   :  { %1979 = vmatprep.subr.bf16.mxu0 %v5275_v1  ;;  %2020 = vmatprep.subr.bf16.mxu1 %v5278_v2  ;;  %v5356_v0 = vld [vmem:[%s7716_s4 + $0x62c] ss:$16 sps:$4 sm:$0xff]   ;;  %v5351_v1 = vld [vmem:[%s7716_s4 + $0x428] ss:$16 sps:$4 sm:$0xff]  }
  0xad   :  { %v5354_v2 = vld [vmem:[%s7716_s4 + $0x628] ss:$16 sps:$4 sm:$0xff]  }
  0xaf   :  { %1980 = vmatpush2.bf16.msra.mxu0 %v5273_v3  ;;  %2021 = vmatpush2.bf16.msra.mxu1 %v5276_v4  ;;  %v5359_v3 = vld [vmem:[%s7716_s4 + $0x40c] ss:$16 sps:$4 sm:$0xff]  }
  0xb0   :  { %1981 = vmatprep.subr.bf16.mxu0 %v5281_v5  ;;  %2022 = vmatprep.subr.bf16.mxu1 %v5284_v6  ;;  %v5362_v4 = vld [vmem:[%s7716_s4 + $0x60c] ss:$16 sps:$4 sm:$0xff]   ;;  %v5357_v5 = vld [vmem:[%s7716_s4 + $0x408] ss:$16 sps:$4 sm:$0xff]  }
  0xb1   :  { %v5360_v6 = vld [vmem:[%s7716_s4 + $0x608] ss:$16 sps:$4 sm:$0xff]  }
  0xb3   :  { %1982 = vmatpush2.bf16.msra.mxu0 %v5279_v7  ;;  %2023 = vmatpush2.bf16.msra.mxu1 %v5282_v8  ;;  %v5365_v7 = vld [vmem:[%s7716_s4 + $0x5ec] ss:$16 sps:$4 sm:$0xff]  }
  0xb4   :  { %1983 = vmatprep.subr.bf16.mxu0 %v5287_v9  ;;  %2024 = vmatprep.subr.bf16.mxu1 %v5290_v10  ;;  %v5368_v8 = vld [vmem:[%s7716_s4 + $0x7ec] ss:$16 sps:$4 sm:$0xff]   ;;  %v5363_v9 = vld [vmem:[%s7716_s4 + $0x5e8] ss:$16 sps:$4 sm:$0xff]  }
  0xb5   :  { %v5366_v10 = vld [vmem:[%s7716_s4 + $0x7e8] ss:$16 sps:$4 sm:$0xff]  }
  0xb7   :  { %1984 = vmatpush2.bf16.msra.mxu0 %v5285_v11  ;;  %2025 = vmatpush2.bf16.msra.mxu1 %v5288_v12  ;;  %v5371_v11 = vld [vmem:[%s7716_s4 + $0x5cc] ss:$16 sps:$4 sm:$0xff]  }
  0xb8   :  { %1985 = vmatprep.subr.bf16.mxu0 %v5293_v13  ;;  %2026 = vmatprep.subr.bf16.mxu1 %v5296_v14  ;;  %v5374_v12 = vld [vmem:[%s7716_s4 + $0x7cc] ss:$16 sps:$4 sm:$0xff]   ;;  %v5369_v13 = vld [vmem:[%s7716_s4 + $0x5c8] ss:$16 sps:$4 sm:$0xff]  }
  0xb9   :  { %v5372_v14 = vld [vmem:[%s7716_s4 + $0x7c8] ss:$16 sps:$4 sm:$0xff]  }
  0xbb   :  { %1986 = vmatpush2.bf16.msra.mxu0 %v5291_v15  ;;  %2027 = vmatpush2.bf16.msra.mxu1 %v5294_v16  ;;  %v5377_v15 = vld [vmem:[%s7716_s4 + $0x5ac] ss:$16 sps:$4 sm:$0xff]  }
  0xbc   :  { %1987 = vmatprep.subr.bf16.mxu0 %v5299_v19  ;;  %2028 = vmatprep.subr.bf16.mxu1 %v5302_v20  ;;  %v5380_v16 = vld [vmem:[%s7716_s4 + $0x7ac] ss:$16 sps:$4 sm:$0xff]   ;;  %v5375_v19 = vld [vmem:[%s7716_s4 + $0x5a8] ss:$16 sps:$4 sm:$0xff]  }
  0xbd   :  { %v5378_v20 = vld [vmem:[%s7716_s4 + $0x7a8] ss:$16 sps:$4 sm:$0xff]  }
  0xbf   :  { %1988 = vmatpush2.bf16.msra.mxu0 %v5297_v21  ;;  %2029 = vmatpush2.bf16.msra.mxu1 %v5300_v22  ;;  %v5383_v21 = vld [vmem:[%s7716_s4 + $0x58c] ss:$16 sps:$4 sm:$0xff]  }
  0xc0   :  { %1989 = vmatprep.subr.bf16.mxu0 %v5305_v23  ;;  %2030 = vmatprep.subr.bf16.mxu1 %v5308_v24  ;;  %v5386_v22 = vld [vmem:[%s7716_s4 + $0x78c] ss:$16 sps:$4 sm:$0xff]   ;;  %v5381_v23 = vld [vmem:[%s7716_s4 + $0x588] ss:$16 sps:$4 sm:$0xff]  }
  0xc1   :  { %v5384_v24 = vld [vmem:[%s7716_s4 + $0x788] ss:$16 sps:$4 sm:$0xff]  }
  0xc3   :  { %1990 = vmatpush2.bf16.msra.mxu0 %v5303_v25  ;;  %2031 = vmatpush2.bf16.msra.mxu1 %v5306_v26  ;;  %v5389_v25 = vld [vmem:[%s7716_s4 + $0x56c] ss:$16 sps:$4 sm:$0xff]  }
  0xc4   :  { %1991 = vmatprep.subr.bf16.mxu0 %v5311_v29  ;;  %2032 = vmatprep.subr.bf16.mxu1 %v5314_v30  ;;  %v5392_v26 = vld [vmem:[%s7716_s4 + $0x76c] ss:$16 sps:$4 sm:$0xff]   ;;  %v5387_v29 = vld [vmem:[%s7716_s4 + $0x568] ss:$16 sps:$4 sm:$0xff]  }
  0xc5   :  { %v5390_v30 = vld [vmem:[%s7716_s4 + $0x768] ss:$16 sps:$4 sm:$0xff]  }
  0xc7   :  { %1992 = vmatpush2.bf16.msra.mxu0 %v5309_v31  ;;  %2033 = vmatpush2.bf16.msra.mxu1 %v5312_v32  ;;  %v5395_v31 = vld [vmem:[%s7716_s4 + $0x54c] ss:$16 sps:$4 sm:$0xff]  }
  0xc8   :  { %2043 = vmatprep.subr.bf16.mxu0 %v5317_v33  ;;  %2084 = vmatprep.subr.bf16.mxu1 %v5320_v34  ;;  %v5398_v32 = vld [vmem:[%s7716_s4 + $0x74c] ss:$16 sps:$4 sm:$0xff]   ;;  %v5393_v33 = vld [vmem:[%s7716_s4 + $0x548] ss:$16 sps:$4 sm:$0xff]  }
  0xc9   :  { %v5396_v34 = vld [vmem:[%s7716_s4 + $0x748] ss:$16 sps:$4 sm:$0xff]  }
  0xca   :  { %v6575_v60 = vpop.f32.mrf.mxu0  ;;  %v6577_v40 = vpop.f32.mrf.mxu1  ;;  %1994 = vmatmul.mubr.bf16.vlgmr.msra.gmra.mxu0 %v6135_v17  ;;  %2035 = vmatmul.mubr.bf16.vlgmr.msra.gmra.mxu1 %v6137_v18  ;;  %v5327_v17 = vld [vmem:[%s7716_s4 + $0x4a8] ss:$16 sps:$4 sm:$0xff]  }
  0xcb   :  { %2044 = vmatpush1.bf16.msra.mxu0 %v5315_v35  ;;  %2085 = vmatpush1.bf16.msra.mxu1 %v5318_v36  ;;  %v5330_v18 = vld [vmem:[%s7716_s4 + $0x6a8] ss:$16 sps:$4 sm:$0xff]   ;;  %v5401_v35 = vld [vmem:[%s7716_s4 + $0x52c] ss:$16 sps:$4 sm:$0xff]  }
  0xcc   :  { %v6584_v43 = vpop.f32.mrf.mxu0  ;;  %v6586_v44 = vpop.f32.mrf.mxu1  ;;  %2045 = vmatprep.subr.bf16.mxu0 %v5323_v37  ;;  %2086 = vmatprep.subr.bf16.mxu1 %v5326_v38  ;;  %v5404_v36 = vld [vmem:[%s7716_s4 + $0x72c] ss:$16 sps:$4 sm:$0xff]   ;;  %v5399_v37 = vld [vmem:[%s7716_s4 + $0x528] ss:$16 sps:$4 sm:$0xff]  }
  0xcd   :  { %2075 = vmatprep.mubr.bf16.mxu0 %v6214_v42  ;;  %2116 = vmatprep.mubr.bf16.mxu1 %v6229_v46  ;;  %v5333_v42 = vld [vmem:[%s7716_s4 + $0x488] ss:$16 sps:$4 sm:$0xff]  }
  0xce   :  { %v159_v47 = vpop.f32.mrf.mxu0  ;;  %v200_v48 = vpop.f32.mrf.mxu1  ;;  %v5336_v46 = vld [vmem:[%s7716_s4 + $0x688] ss:$16 sps:$4 sm:$0xff]  }
  0xcf   :  { %2046 = vmatpush1.bf16.msra.mxu0 %v5321_v39  ;;  %2087 = vmatpush1.bf16.msra.mxu1 %v5324_v59  ;;  %v5402_v38 = vld [vmem:[%s7716_s4 + $0x728] ss:$16 sps:$4 sm:$0xff]   ;;  %v5407_v39 = vld [vmem:[%s7716_s4 + $0x50c] ss:$16 sps:$4 sm:$0xff]  }
  0xd0   :  { %v160_v50 = vpop.f32.mrf.mxu0  ;;  %v201_v51 = vpop.f32.mrf.mxu1  ;;  %2047 = vmatprep.subr.bf16.mxu0 %v5329_v41  ;;  %2088 = vmatprep.subr.bf16.mxu1 %v5332_v45  ;;  %v5410_v59 = vld [vmem:[%s7716_s4 + $0x70c] ss:$16 sps:$4 sm:$0xff]   ;;  %v5405_v41 = vld [vmem:[%s7716_s4 + $0x508] ss:$16 sps:$4 sm:$0xff]  }
  0xd1   :  { %v5408_v45 = vld [vmem:[%s7716_s4 + $0x708] ss:$16 sps:$4 sm:$0xff]   ;;  %v5416_v47 = vld [vmem:[%s7718_s6 + $0x64] ss:$8 sps:$4 sm:$0xff]  }
  0xd2   :  { %v5414_v50 = vld [vmem:[%s7718_s6 + $0x60] ss:$8 sps:$4 sm:$0xff]  }
  0xd3   :  { %2048 = vmatpush1.bf16.msra.mxu0 %v5327_v17  ;;  %2089 = vmatpush1.bf16.msra.mxu1 %v5330_v18  ;;  %v5413_v17 = vld [vmem:[%s7718_s6 + $0x74] ss:$8 sps:$4 sm:$0xff]   ;;  %v5411_v18 = vld [vmem:[%s7718_s6 + $0x70] ss:$8 sps:$4 sm:$0xff]  }
  0xd4   :  { %2049 = vmatprep.subr.bf16.mxu0 %v5335_v49  ;;  %2090 = vmatprep.subr.bf16.mxu1 %v5338_v52 }
  0xd7   :  { %2050 = vmatpush1.bf16.msra.mxu0 %v5333_v42  ;;  %2091 = vmatpush1.bf16.msra.mxu1 %v5336_v46  ;;  %v5419_v42 = vld [vmem:[%s7718_s6 + $0x54] ss:$8 sps:$4 sm:$0xff]  }
  0xd8   :  { %2051 = vmatprep.subr.bf16.mxu0 %v5341_v53  ;;  %2092 = vmatprep.subr.bf16.mxu1 %v5344_v54 }
  0xdb   :  { %2052 = vmatpush1.bf16.msra.mxu0 %v5339_v55  ;;  %2093 = vmatpush1.bf16.msra.mxu1 %v5342_v56  ;;  %v5422_v55 = vld [vmem:[%s7718_s6 + $0x44] ss:$8 sps:$4 sm:$0xff]   ;;  %v5459_v56 = vld [vmem:[%s7718_s6 + $0x170] ss:$8 sps:$4 sm:$0xff]  }
  0xdc   :  { %2053 = vmatprep.subr.bf16.mxu0 %v5347_v57  ;;  %2094 = vmatprep.subr.bf16.mxu1 %v5350_v58  ;;  %v5461_v57 = vld [vmem:[%s7718_s6 + $0x174] ss:$8 sps:$4 sm:$0xff]   ;;  %v5464_v58 = vld [vmem:[%s7718_s6 + $0x164] ss:$8 sps:$4 sm:$0xff]  }
  0xdf   :  { %2054 = vmatpush1.bf16.msra.mxu0 %v5345_v61  ;;  %2095 = vmatpush1.bf16.msra.mxu1 %v5348_v62  ;;  %v5420_v61 = vld [vmem:[%s7718_s6 + $0x40] ss:$8 sps:$4 sm:$0xff]  }
  0xe0   :  { %2055 = vmatprep.subr.bf16.mxu0 %v5353_v63  ;;  %2096 = vmatprep.subr.bf16.mxu1 %v5356_v0  ;;  %v5462_v62 = vld [vmem:[%s7718_s6 + $0x160] ss:$8 sps:$4 sm:$0xff]   ;;  %v5425_v63 = vld [vmem:[%s7718_s6 + $0x34] ss:$8 sps:$4 sm:$0xff]  }
  0xe1   :  { %v5467_v0 = vld [vmem:[%s7718_s6 + $0x154] ss:$8 sps:$4 sm:$0xff]  }
  0xe3   :  { %2056 = vmatpush1.bf16.msra.mxu0 %v5351_v1  ;;  %2097 = vmatpush1.bf16.msra.mxu1 %v5354_v2  ;;  %v5423_v1 = vld [vmem:[%s7718_s6 + $0x30] ss:$8 sps:$4 sm:$0xff]  }
  0xe4   :  { %2057 = vmatprep.subr.bf16.mxu0 %v5359_v3  ;;  %2098 = vmatprep.subr.bf16.mxu1 %v5362_v4  ;;  %v5465_v2 = vld [vmem:[%s7718_s6 + $0x150] ss:$8 sps:$4 sm:$0xff]   ;;  %v5428_v3 = vld [vmem:[%s7718_s6 + $0x24] ss:$8 sps:$4 sm:$0xff]  }
  0xe5   :  { %v5470_v4 = vld [vmem:[%s7718_s6 + $0x144] ss:$8 sps:$4 sm:$0xff]  }
  0xe7   :  { %2058 = vmatpush1.bf16.msra.mxu0 %v5357_v5  ;;  %2099 = vmatpush1.bf16.msra.mxu1 %v5360_v6  ;;  %v5426_v5 = vld [vmem:[%s7718_s6 + $0x20] ss:$8 sps:$4 sm:$0xff]  }
  0xe8   :  { %2059 = vmatprep.subr.bf16.mxu0 %v5365_v7  ;;  %2100 = vmatprep.subr.bf16.mxu1 %v5368_v8  ;;  %v5468_v6 = vld [vmem:[%s7718_s6 + $0x140] ss:$8 sps:$4 sm:$0xff]   ;;  %v5431_v7 = vld [vmem:[%s7718_s6 + $0x14] ss:$8 sps:$4 sm:$0xff]  }
  0xe9   :  { %v5473_v8 = vld [vmem:[%s7718_s6 + $0x134] ss:$8 sps:$4 sm:$0xff]  }
  0xeb   :  { %2060 = vmatpush2.bf16.msra.mxu0 %v5363_v9  ;;  %2101 = vmatpush2.bf16.msra.mxu1 %v5366_v10  ;;  %v5429_v9 = vld [vmem:[%s7718_s6 + $0x10] ss:$8 sps:$4 sm:$0xff]  }
  0xec   :  { %2061 = vmatprep.subr.bf16.mxu0 %v5371_v11  ;;  %2102 = vmatprep.subr.bf16.mxu1 %v5374_v12  ;;  %v5471_v10 = vld [vmem:[%s7718_s6 + $0x130] ss:$8 sps:$4 sm:$0xff]   ;;  %v5434_v11 = vld [vmem:[%s7718_s6 + $0x4] ss:$8 sps:$4 sm:$0xff]  }
  0xed   :  { %v5476_v12 = vld [vmem:[%s7718_s6 + $0x124] ss:$8 sps:$4 sm:$0xff]  }
  0xef   :  { %2062 = vmatpush2.bf16.msra.mxu0 %v5369_v13  ;;  %2103 = vmatpush2.bf16.msra.mxu1 %v5372_v14  ;;  %v5432_v13 = vld [vmem:[%s7718_s6] ss:$8 sps:$4 sm:$0xff]  }
  0xf0   :  { %2063 = vmatprep.subr.bf16.mxu0 %v5377_v15  ;;  %2104 = vmatprep.subr.bf16.mxu1 %v5380_v16  ;;  %v5474_v14 = vld [vmem:[%s7718_s6 + $0x120] ss:$8 sps:$4 sm:$0xff]   ;;  %v5437_v15 = vld [vmem:[%s7718_s6 + $0xf4] ss:$8 sps:$4 sm:$0xff]  }
  0xf1   :  { %v5479_v16 = vld [vmem:[%s7718_s6 + $0x114] ss:$8 sps:$4 sm:$0xff]  }
  0xf3   :  { %2064 = vmatpush2.bf16.msra.mxu0 %v5375_v19  ;;  %2105 = vmatpush2.bf16.msra.mxu1 %v5378_v20  ;;  %v5435_v19 = vld [vmem:[%s7718_s6 + $0xf0] ss:$8 sps:$4 sm:$0xff]  }
  0xf4   :  { %2065 = vmatprep.subr.bf16.mxu0 %v5383_v21  ;;  %2106 = vmatprep.subr.bf16.mxu1 %v5386_v22  ;;  %v5477_v20 = vld [vmem:[%s7718_s6 + $0x110] ss:$8 sps:$4 sm:$0xff]   ;;  %v5440_v21 = vld [vmem:[%s7718_s6 + $0xe4] ss:$8 sps:$4 sm:$0xff]  }
  0xf5   :  { %v5482_v22 = vld [vmem:[%s7718_s6 + $0x104] ss:$8 sps:$4 sm:$0xff]  }
  0xf7   :  { %2066 = vmatpush2.bf16.msra.mxu0 %v5381_v23  ;;  %2107 = vmatpush2.bf16.msra.mxu1 %v5384_v24  ;;  %v5438_v23 = vld [vmem:[%s7718_s6 + $0xe0] ss:$8 sps:$4 sm:$0xff]  }
  0xf8   :  { %2067 = vmatprep.subr.bf16.mxu0 %v5389_v25  ;;  %2108 = vmatprep.subr.bf16.mxu1 %v5392_v26  ;;  %v5480_v24 = vld [vmem:[%s7718_s6 + $0x100] ss:$8 sps:$4 sm:$0xff]   ;;  %v5443_v25 = vld [vmem:[%s7718_s6 + $0xd4] ss:$8 sps:$4 sm:$0xff]  }
  0xf9   :  { %v5485_v26 = vld [vmem:[%s7718_s6 + $0x1f4] ss:$8 sps:$4 sm:$0xff]  }
  0xfb   :  { %2068 = vmatpush2.bf16.msra.mxu0 %v5387_v29  ;;  %2109 = vmatpush2.bf16.msra.mxu1 %v5390_v30  ;;  %v5441_v29 = vld [vmem:[%s7718_s6 + $0xd0] ss:$8 sps:$4 sm:$0xff]  }
  0xfc   :  { %2069 = vmatprep.subr.bf16.mxu0 %v5395_v31  ;;  %2110 = vmatprep.subr.bf16.mxu1 %v5398_v32  ;;  %v5483_v30 = vld [vmem:[%s7718_s6 + $0x1f0] ss:$8 sps:$4 sm:$0xff]   ;;  %v5446_v31 = vld [vmem:[%s7718_s6 + $0xc4] ss:$8 sps:$4 sm:$0xff]  }
  0xfd   :  { %v5488_v32 = vld [vmem:[%s7718_s6 + $0x1e4] ss:$8 sps:$4 sm:$0xff]  }
  0xff   :  { %2070 = vmatpush2.bf16.msra.mxu0 %v5393_v33  ;;  %2111 = vmatpush2.bf16.msra.mxu1 %v5396_v34  ;;  %v5444_v33 = vld [vmem:[%s7718_s6 + $0xc0] ss:$8 sps:$4 sm:$0xff]  }
 0x100   :  { %2071 = vmatprep.subr.bf16.mxu0 %v5401_v35  ;;  %2112 = vmatprep.subr.bf16.mxu1 %v5404_v36  ;;  %v5486_v34 = vld [vmem:[%s7718_s6 + $0x1e0] ss:$8 sps:$4 sm:$0xff]   ;;  %v5449_v35 = vld [vmem:[%s7718_s6 + $0xb4] ss:$8 sps:$4 sm:$0xff]  }
 0x101   :  { %v5491_v36 = vld [vmem:[%s7718_s6 + $0x1d4] ss:$8 sps:$4 sm:$0xff]  }
 0x103   :  { %2072 = vmatpush2.bf16.msra.mxu0 %v5399_v37  ;;  %2113 = vmatpush2.bf16.msra.mxu1 %v5402_v38  ;;  %v57_v37 = vlaneseq  ;;  %v5447_v38 = vld [vmem:[%s7718_s6 + $0xb0] ss:$8 sps:$4 sm:$0xff]  }
 0x104   :  { %2073 = vmatprep.subr.bf16.mxu0 %v5407_v39  ;;  %2114 = vmatprep.subr.bf16.mxu1 %v5410_v59  ;;  %v5489_v39 = vld [vmem:[%s7718_s6 + $0x1d0] ss:$8 sps:$4 sm:$0xff]   ;;  %v5452_v59 = vld [vmem:[%s7718_s6 + $0xa4] ss:$8 sps:$4 sm:$0xff]  }
 0x107   :  { %2074 = vmatpush2.bf16.msra.mxu0 %v5405_v41  ;;  %2115 = vmatpush2.bf16.msra.mxu1 %v5408_v45  ;;  %v5494_v41 = vld [vmem:[%s7718_s6 + $0x1c4] ss:$8 sps:$4 sm:$0xff]   ;;  %v6915_v45 = vshrl.u32 %v57_v37, 7 }
 0x108   :  { %2529 = vmatprep.subr.bf16.mxu0 %v5413_v17  ;;  %2570 = vmatprep.subr.bf16.mxu1 %v5461_v57  ;;  %v5450_v17 = vld [vmem:[%s7718_s6 + $0xa0] ss:$8 sps:$4 sm:$0xff]   ;;  %v5527_v37 = vld [vmem:[%s7720_s9 + $0x84] ss:$16 sps:$4 sm:$0xff]  }
 0x109   :  { %v5456_v57 = vld [vmem:[%s7718_s6 + $0x80] ss:$8 sps:$4 sm:$0xff]  }
 0x10a   :  { %v6764_v48 = vpop.f32.mrf.mxu0  ;;  %v6766_v49 = vpop.f32.mrf.mxu1  ;;  %2076 = vmatmul.mubr.bf16.vlgmr.msra.gmra.mxu0 %v6355_v27  ;;  %2117 = vmatmul.mubr.bf16.vlgmr.msra.gmra.mxu1 %v6359_v28  ;;  %v5417_v27 = vld [vmem:[%s7718_s6 + $0x50] ss:$8 sps:$4 sm:$0xff]  }
 0x10b   :  { %2530 = vmatpush1.bf16.msra.mxu0 %v5411_v18  ;;  %2571 = vmatpush1.bf16.msra.mxu1 %v5459_v56  ;;  %v5492_v18 = vld [vmem:[%s7718_s6 + $0x1c0] ss:$8 sps:$4 sm:$0xff]  }
 0x10c   :  { %v6773_v51 = vpop.f32.mrf.mxu0  ;;  %v6775_v52 = vpop.f32.mrf.mxu1  ;;  %2531 = vmatprep.subr.bf16.mxu0 %v5416_v47  ;;  %2572 = vmatprep.subr.bf16.mxu1 %v5464_v58  ;;  %v5455_v47 = vld [vmem:[%s7718_s6 + $0x94] ss:$8 sps:$4 sm:$0xff]  }
 0x10e   :  { %v1835_v46 = vpop.f32.mrf.mxu0  ;;  %v1876_v53 = vpop.f32.mrf.mxu1 }
 0x10f   :  { %2532 = vmatpush1.bf16.msra.mxu0 %v5414_v50  ;;  %2573 = vmatpush1.bf16.msra.mxu1 %v5462_v62  ;;  %v5497_v50 = vld [vmem:[%s7718_s6 + $0x1b4] ss:$8 sps:$4 sm:$0xff]   ;;  %v6935_v46 = vsub.s32 0, %v6915_v45  ;;  %v5453_v53 = vld [vmem:[%s7718_s6 + $0x90] ss:$8 sps:$4 sm:$0xff]  }
 0x110   :  { %v1836_v28 = vpop.f32.mrf.mxu0  ;;  %v1877_v54 = vpop.f32.mrf.mxu1  ;;  %2533 = vmatprep.subr.bf16.mxu0 %v5419_v42  ;;  %2574 = vmatprep.subr.bf16.mxu1 %v5467_v0  ;;  %v6932_v42 = vld [vmem:[%s7719_s5] sm:$0xf]  ;;  %v5500_v62 = vld [vmem:[%s7718_s6 + $0x1a4] ss:$8 sps:$4 sm:$0xff]  }
 0x111   :  { %v5458_v28 = vld [vmem:[%s7718_s6 + $0x84] ss:$8 sps:$4 sm:$0xff]   ;;  %v6947_v54 = vsub.s32 1, %v6915_v45  ;;  %v5498_v0 = vld [vmem:[%s7718_s6 + $0x1a0] ss:$8 sps:$4 sm:$0xff]  }
 0x113   :  { %2534 = vmatpush1.bf16.msra.mxu0 %v5417_v27  ;;  %2575 = vmatpush1.bf16.msra.mxu1 %v5465_v2  ;;  %v5495_v27 = vld [vmem:[%s7718_s6 + $0x1b0] ss:$8 sps:$4 sm:$0xff]   ;;  %v476_v56 = vrot.slane %v6932_v42, %v6947_v54 }
 0x114   :  { %2535 = vmatprep.subr.bf16.mxu0 %v5422_v55  ;;  %2576 = vmatprep.subr.bf16.mxu1 %v5470_v4  ;;  %v472_v55 = vrot.slane %v6932_v42, %v6935_v46 }
 0x116   :  { %v1832_v58 = vadd.f32 %v6764_v48, %v472_v55  ;;  %v5563_v55 = vld [vmem:[%s7720_s9 + $0x1c4] ss:$16 sps:$4 sm:$0xff]  }
 0x117   :  { %2536 = vmatpush1.bf16.msra.mxu0 %v5420_v61  ;;  %2577 = vmatpush1.bf16.msra.mxu1 %v5468_v6  ;;  %v1834_v61 = vadd.f32 %v6773_v51, %v476_v56  ;;  %v7041_v56 = vsub.s32 2, %v6915_v45 }
 0x118   :  { %2537 = vmatprep.subr.bf16.mxu0 %v5425_v63  ;;  %2578 = vmatprep.subr.bf16.mxu1 %v5473_v8  ;;  %v1873_v63 = vadd.f32 %v6766_v49, %v1832_v58  ;;  %v5501_v49 = vld [vmem:[%s7718_s6 + $0x190] ss:$8 sps:$4 sm:$0xff]  }
 0x119   :  { %v480_v58 = vrot.slane %v6932_v42, %v7041_v56 }
 0x11b   :  { %2538 = vmatpush1.bf16.msra.mxu0 %v5423_v1  ;;  %2579 = vmatpush1.bf16.msra.mxu1 %v5471_v10 }
 0x11c   :  { %2539 = vmatprep.subr.bf16.mxu0 %v5428_v3  ;;  %2580 = vmatprep.subr.bf16.mxu1 %v5476_v12  ;;  %v1875_v3 = vadd.f32 %v6775_v52, %v1834_v61  ;;  %v5561_v61 = vld [vmem:[%s7720_s9 + $0x1c0] ss:$16 sps:$4 sm:$0xff]  }
 0x11f   :  { %2540 = vmatpush1.bf16.msra.mxu0 %v5426_v5  ;;  %2581 = vmatpush1.bf16.msra.mxu1 %v5474_v14  ;;  %v5503_v5 = vld [vmem:[%s7718_s6 + $0x194] ss:$8 sps:$4 sm:$0xff]  }
 0x120   :  { %2541 = vmatprep.subr.bf16.mxu0 %v5431_v7  ;;  %2582 = vmatprep.subr.bf16.mxu1 %v5479_v16 }
 0x123   :  { %2542 = vmatpush1.bf16.msra.mxu0 %v5429_v9  ;;  %2583 = vmatpush1.bf16.msra.mxu1 %v5477_v20 }
 0x124   :  { %2543 = vmatprep.subr.bf16.mxu0 %v5434_v11  ;;  %2584 = vmatprep.subr.bf16.mxu1 %v5482_v22 }
 0x127   :  { %2544 = vmatpush1.bf16.msra.mxu0 %v5432_v13  ;;  %2585 = vmatpush1.bf16.msra.mxu1 %v5480_v24  ;;  %v5506_v13 = vld [vmem:[%s7718_s6 + $0x184] ss:$8 sps:$4 sm:$0xff]  }
 0x128   :  { %2545 = vmatprep.subr.bf16.mxu0 %v5437_v15  ;;  %2586 = vmatprep.subr.bf16.mxu1 %v5485_v26  ;;  %v5504_v15 = vld [vmem:[%s7718_s6 + $0x180] ss:$8 sps:$4 sm:$0xff]  }
 0x12b   :  { %2546 = vmatpush2.bf16.msra.mxu0 %v5435_v19  ;;  %2587 = vmatpush2.bf16.msra.mxu1 %v5483_v30  ;;  %v5507_v30 = vld [vmem:[%s7720_s9 + $0xe0] ss:$16 sps:$4 sm:$0xff]  }
 0x12c   :  { %2547 = vmatprep.subr.bf16.mxu0 %v5440_v21  ;;  %2588 = vmatprep.subr.bf16.mxu1 %v5488_v32  ;;  %v5512_v32 = vld [vmem:[%s7720_s9 + $0xec] ss:$16 sps:$4 sm:$0xff]  }
 0x12f   :  { %2548 = vmatpush2.bf16.msra.mxu0 %v5438_v23  ;;  %2589 = vmatpush2.bf16.msra.mxu1 %v5486_v34  ;;  %v5513_v34 = vld [vmem:[%s7720_s9 + $0xc0] ss:$16 sps:$4 sm:$0xff]  }
 0x130   :  { %2549 = vmatprep.subr.bf16.mxu0 %v5443_v25  ;;  %2590 = vmatprep.subr.bf16.mxu1 %v5491_v36  ;;  %v5519_v36 = vld [vmem:[%s7720_s9 + $0xa0] ss:$16 sps:$4 sm:$0xff]  }
 0x133   :  { %2550 = vmatpush2.bf16.msra.mxu0 %v5441_v29  ;;  %2591 = vmatpush2.bf16.msra.mxu1 %v5489_v39  ;;  %v5533_v39 = vld [vmem:[%s7720_s9 + $0x64] ss:$16 sps:$4 sm:$0xff]  }
 0x134   :  { %2551 = vmatprep.subr.bf16.mxu0 %v5446_v31  ;;  %2592 = vmatprep.subr.bf16.mxu1 %v5494_v41  ;;  %v5509_v31 = vld [vmem:[%s7720_s9 + $0xe4] ss:$16 sps:$4 sm:$0xff]  }
 0x135   :  { %v5539_v41 = vld [vmem:[%s7720_s9 + $0x44] ss:$16 sps:$4 sm:$0xff]  }
 0x137   :  { %2552 = vmatpush2.bf16.msra.mxu0 %v5444_v33  ;;  %2593 = vmatpush2.bf16.msra.mxu1 %v5492_v18  ;;  %v5515_v33 = vld [vmem:[%s7720_s9 + $0xc4] ss:$16 sps:$4 sm:$0xff]  }
 0x138   :  { %2553 = vmatprep.subr.bf16.mxu0 %v5449_v35  ;;  %2594 = vmatprep.subr.bf16.mxu1 %v5497_v50  ;;  %v5521_v35 = vld [vmem:[%s7720_s9 + $0xa4] ss:$16 sps:$4 sm:$0xff]  }
 0x139   :  { %v5545_v18 = vld [vmem:[%s7720_s9 + $0x24] ss:$16 sps:$4 sm:$0xff]  }
 0x13a   :  { %v5551_v50 = vld [vmem:[%s7720_s9 + $0x4] ss:$16 sps:$4 sm:$0xff]  }
 0x13b   :  { %2554 = vmatpush2.bf16.msra.mxu0 %v5447_v38  ;;  %2595 = vmatpush2.bf16.msra.mxu1 %v5495_v27  ;;  %v5525_v38 = vld [vmem:[%s7720_s9 + $0x80] ss:$16 sps:$4 sm:$0xff]   ;;  %v5557_v27 = vld [vmem:[%s7720_s9 + $0x1e4] ss:$16 sps:$4 sm:$0xff]  }
 0x13c   :  { %2555 = vmatprep.subr.bf16.mxu0 %v5452_v59  ;;  %2596 = vmatprep.subr.bf16.mxu1 %v5500_v62  ;;  %v5531_v59 = vld [vmem:[%s7720_s9 + $0x60] ss:$16 sps:$4 sm:$0xff]   ;;  %v5569_v62 = vld [vmem:[%s7720_s9 + $0x1a4] ss:$16 sps:$4 sm:$0xff]  }
 0x13f   :  { %2556 = vmatpush2.bf16.msra.mxu0 %v5450_v17  ;;  %2597 = vmatpush2.bf16.msra.mxu1 %v5498_v0  ;;  %v5537_v17 = vld [vmem:[%s7720_s9 + $0x40] ss:$16 sps:$4 sm:$0xff]  }
 0x140   :  { %2557 = vmatprep.subr.bf16.mxu0 %v5455_v47  ;;  %2598 = vmatprep.subr.bf16.mxu1 %v5503_v5  ;;  %v5543_v47 = vld [vmem:[%s7720_s9 + $0x20] ss:$16 sps:$4 sm:$0xff]  }
 0x143   :  { %2558 = vmatpush2.bf16.msra.mxu0 %v5453_v53  ;;  %2599 = vmatpush2.bf16.msra.mxu1 %v5501_v49  ;;  %v5549_v53 = vld [vmem:[%s7720_s9] ss:$16 sps:$4 sm:$0xff]  }
 0x144   :  { %2559 = vmatprep.subr.bf16.mxu0 %v5458_v28  ;;  %2600 = vmatprep.subr.bf16.mxu1 %v5506_v13  ;;  %v5555_v28 = vld [vmem:[%s7720_s9 + $0x1e0] ss:$16 sps:$4 sm:$0xff]  }
 0x147   :  { %2560 = vmatpush2.bf16.msra.mxu0 %v5456_v57  ;;  %2601 = vmatpush2.bf16.msra.mxu1 %v5504_v15  ;;  %v7044_v57 = vsub.s32 3, %v6915_v45  ;;  %v5567_v45 = vld [vmem:[%s7720_s9 + $0x1a0] ss:$16 sps:$4 sm:$0xff]  }
 0x148   :  { %3131 = vmatprep.subr.bf16.mxu0 %v5509_v31  ;;  %3172 = vmatprep.subr.bf16.mxu1 %v5512_v32  ;;  %v5528_v31 = vld [vmem:[%s7720_s9 + $0x88] ss:$16 sps:$4 sm:$0xff]   ;;  %v5536_v32 = vld [vmem:[%s7720_s9 + $0x6c] ss:$16 sps:$4 sm:$0xff]  }
 0x14a   :  { %v1913_v1 = vpop.f32.mrf.mxu0  ;;  %v1954_v2 = vpop.f32.mrf.mxu1 }
 0x14b   :  { %v1914_v4 = vadd.f32 %v1913_v1, %v1873_v63  ;;  %v484_v63 = vrot.slane %v6932_v42, %v7044_v57  ;;  %v5575_v1 = vld [vmem:[%s7720_s9 + $0x184] ss:$16 sps:$4 sm:$0xff]  }
 0x14c   :  { %v1915_v48 = vpop.f32.mrf.mxu0  ;;  %v1956_v51 = vpop.f32.mrf.mxu1 }
 0x14d   :  { %v1955_v6 = vadd.f32 %v1954_v2, %v1914_v4  ;;  %v1916_v7 = vadd.f32 %v1915_v48, %v1875_v3  ;;  %v5573_v4 = vld [vmem:[%s7720_s9 + $0x180] ss:$16 sps:$4 sm:$0xff]  }
 0x14e   :  { %v1917_v8 = vpop.f32.mrf.mxu0  ;;  %v1958_v9 = vpop.f32.mrf.mxu1 }
 0x14f   :  { %v1957_v10 = vadd.f32 %v1956_v51, %v1916_v7  ;;  %v2125_v52 = vmax.f32 %v1955_v6, 0.0  ;;  %v5581_v51 = vld [vmem:[%s7720_s9 + $0x164] ss:$16 sps:$4 sm:$0xff]  }
 0x150   :  { %v1918_v11 = vpop.f32.mrf.mxu0  ;;  %v1959_v12 = vpop.f32.mrf.mxu1 }
 0x151   :  { %v2126_v14 = vmax.f32 %v1957_v10, 0.0  ;;  %v2129_v19 = vpack.c.bf16 %v2125_v52, %v2125_v52  ;;  %v5579_v10 = vld [vmem:[%s7720_s9 + $0x160] ss:$16 sps:$4 sm:$0xff]   ;;  %v5587_v12 = vld [vmem:[%s7720_s9 + $0x144] ss:$16 sps:$4 sm:$0xff]  }
 0x153   :  { %v2130_v16 = vpack.c.bf16 %v2126_v14, %v2126_v14 }
 0x155   :  { %2561 = vmatprep.mubr.bf16.mxu0 %v2130_v16 }
 0x156   :  { %2562 = vmatmul.mubr.bf16.vlgmr.msra.gmra.mxu0 %v2129_v19 }
 0x157   :  { %3132 = vmatpush1.bf16.msra.mxu0 %v5507_v30  ;;  %v5530_v30 = vld [vmem:[%s7720_s9 + $0x8c] ss:$16 sps:$4 sm:$0xff]  }
 0x158   :  { %3133 = vmatprep.subr.bf16.mxu0 %v5515_v33  ;;  %v5534_v33 = vld [vmem:[%s7720_s9 + $0x68] ss:$16 sps:$4 sm:$0xff]  }
 0x15b   :  { %3134 = vmatpush1.bf16.msra.mxu0 %v5513_v34  ;;  %v5542_v34 = vld [vmem:[%s7720_s9 + $0x4c] ss:$16 sps:$4 sm:$0xff]  }
 0x15c   :  { %3135 = vmatprep.subr.bf16.mxu0 %v5521_v35  ;;  %v5540_v35 = vld [vmem:[%s7720_s9 + $0x48] ss:$16 sps:$4 sm:$0xff]  }
 0x15f   :  { %3136 = vmatpush1.bf16.msra.mxu0 %v5519_v36  ;;  %v5548_v36 = vld [vmem:[%s7720_s9 + $0x2c] ss:$16 sps:$4 sm:$0xff]  }
 0x160   :  { %3137 = vmatprep.subr.bf16.mxu0 %v5527_v37  ;;  %v5546_v37 = vld [vmem:[%s7720_s9 + $0x28] ss:$16 sps:$4 sm:$0xff]  }
 0x163   :  { %3138 = vmatpush1.bf16.msra.mxu0 %v5525_v38  ;;  %v5554_v38 = vld [vmem:[%s7720_s9 + $0xc] ss:$16 sps:$4 sm:$0xff]  }
 0x164   :  { %3139 = vmatprep.subr.bf16.mxu0 %v5533_v39  ;;  %v5552_v39 = vld [vmem:[%s7720_s9 + $0x8] ss:$16 sps:$4 sm:$0xff]  }
 0x167   :  { %3140 = vmatpush1.bf16.msra.mxu0 %v5531_v59  ;;  %v5560_v59 = vld [vmem:[%s7720_s9 + $0x1ec] ss:$16 sps:$4 sm:$0xff]  }
 0x168   :  { %3141 = vmatprep.subr.bf16.mxu0 %v5539_v41  ;;  %v5558_v41 = vld [vmem:[%s7720_s9 + $0x1e8] ss:$16 sps:$4 sm:$0xff]  }
 0x16b   :  { %3142 = vmatpush1.bf16.msra.mxu0 %v5537_v17  ;;  %v5566_v17 = vld [vmem:[%s7720_s9 + $0x1cc] ss:$16 sps:$4 sm:$0xff]  }
 0x16c   :  { %3143 = vmatprep.subr.bf16.mxu0 %v5545_v18  ;;  %v5564_v18 = vld [vmem:[%s7720_s9 + $0x1c8] ss:$16 sps:$4 sm:$0xff]  }
 0x16f   :  { %3144 = vmatpush1.bf16.msra.mxu0 %v5543_v47  ;;  %v5572_v47 = vld [vmem:[%s7720_s9 + $0x1ac] ss:$16 sps:$4 sm:$0xff]  }
 0x170   :  { %3145 = vmatprep.subr.bf16.mxu0 %v5551_v50  ;;  %v5570_v50 = vld [vmem:[%s7720_s9 + $0x1a8] ss:$16 sps:$4 sm:$0xff]  }
 0x173   :  { %3146 = vmatpush1.bf16.msra.mxu0 %v5549_v53  ;;  %v5578_v53 = vld [vmem:[%s7720_s9 + $0x18c] ss:$16 sps:$4 sm:$0xff]  }
 0x174   :  { %3147 = vmatprep.subr.bf16.mxu0 %v5557_v27  ;;  %v5576_v27 = vld [vmem:[%s7720_s9 + $0x188] ss:$16 sps:$4 sm:$0xff]  }
 0x177   :  { %3148 = vmatpush2.bf16.msra.mxu0 %v5555_v28  ;;  %v5584_v28 = vld [vmem:[%s7720_s9 + $0x16c] ss:$16 sps:$4 sm:$0xff]  }
 0x178   :  { %3149 = vmatprep.subr.bf16.mxu0 %v5563_v55  ;;  %v5582_v55 = vld [vmem:[%s7720_s9 + $0x168] ss:$16 sps:$4 sm:$0xff]  }
 0x17b   :  { %3150 = vmatpush2.bf16.msra.mxu0 %v5561_v61  ;;  %v5588_v61 = vld [vmem:[%s7720_s9 + $0x148] ss:$16 sps:$4 sm:$0xff]  }
 0x17c   :  { %3151 = vmatprep.subr.bf16.mxu0 %v5569_v62  ;;  %v5593_v62 = vld [vmem:[%s7720_s9 + $0x124] ss:$16 sps:$4 sm:$0xff]  }
 0x17f   :  { %3152 = vmatpush2.bf16.msra.mxu0 %v5567_v45  ;;  %v5591_v45 = vld [vmem:[%s7720_s9 + $0x120] ss:$16 sps:$4 sm:$0xff]  }
 0x180   :  { %3153 = vmatprep.subr.bf16.mxu0 %v5575_v1  ;;  %v5594_v1 = vld [vmem:[%s7720_s9 + $0x128] ss:$16 sps:$4 sm:$0xff]  }
 0x183   :  { %3154 = vmatpush2.bf16.msra.mxu0 %v5573_v4  ;;  %v5602_v4 = vld [vmem:[%s7720_s9 + $0x10c] ss:$16 sps:$4 sm:$0xff]  }
 0x184   :  { %3155 = vmatprep.subr.bf16.mxu0 %v5581_v51  ;;  %v5600_v51 = vld [vmem:[%s7720_s9 + $0x108] ss:$16 sps:$4 sm:$0xff]  }
 0x187   :  { %3156 = vmatpush2.bf16.msra.mxu0 %v5579_v10 }
 0x188   :  { %3157 = vmatprep.subr.bf16.mxu0 %v5587_v12 }
 0x18a   :  { %v1995_v20 = vpop.f32.mrf.mxu0  ;;  %v2036_v21 = vpop.f32.mrf.mxu1 }
 0x18b   :  { %v1996_v0 = vadd.f32 %v1995_v20, %v480_v58  ;;  %v5585_v20 = vld [vmem:[%s7720_s9 + $0x140] ss:$16 sps:$4 sm:$0xff]   ;;  %v5590_v58 = vld [vmem:[%s7720_s9 + $0x14c] ss:$16 sps:$4 sm:$0xff]  }
 0x18c   :  { %v1997_v22 = vpop.f32.mrf.mxu0  ;;  %v6978_v23 = vpop.f32.mrf.mxu1  ;;  %3158 = vmatpush2.bf16.msra.mxu0 %v5585_v20 }
 0x18d   :  { %v1998_v2 = vadd.f32 %v1997_v22, %v484_v63  ;;  %v2037_v3 = vadd.f32 %v2036_v21, %v1996_v0  ;;  %v5510_v22 = vld [vmem:[%s7720_s9 + $0xe8] ss:$16 sps:$4 sm:$0xff]   ;;  %v5596_v63 = vld [vmem:[%s7720_s9 + $0x12c] ss:$16 sps:$4 sm:$0xff]   ;;  %3159 = vmatprep.subr.bf16.mxu0 %v5593_v62  ;;  %v5633_v62 = vld [vmem:[%s7721_s8 + $0x40] ss:$16 sps:$4 sm:$0xff]  }
 0x18e   :  { %v1999_v24 = vpop.f32.mrf.mxu0  ;;  %v2040_v25 = vpop.f32.mrf.mxu1 }
 0x18f   :  { %v2039_v5 = vadd.f32 %v6978_v23, %v1998_v2  ;;  %v5518_v24 = vld [vmem:[%s7720_s9 + $0xcc] ss:$16 sps:$4 sm:$0xff]   ;;  %v5516_v25 = vld [vmem:[%s7720_s9 + $0xc8] ss:$16 sps:$4 sm:$0xff]  }
 0x190   :  { %v2000_v26 = vpop.f32.mrf.mxu0  ;;  %v2041_v29 = vpop.f32.mrf.mxu1  ;;  %3160 = vmatpush2.bf16.msra.mxu0 %v5591_v45  ;;  %v5644_v45 = vld [vmem:[%s7721_s8 + $0x224] ss:$16 sps:$4 sm:$0xff]  }
 0x191   :  { %v5524_v26 = vld [vmem:[%s7720_s9 + $0xac] ss:$16 sps:$4 sm:$0xff]   ;;  %v5522_v29 = vld [vmem:[%s7720_s9 + $0xa8] ss:$16 sps:$4 sm:$0xff]  }
 0x1ca   :  { %v2077_v48 = vpop.f32.mrf.mxu0  ;;  %v2118_v42 = vpop.f32.mrf.mxu1 }
 0x1cb   :  { %v2078_v6 = vadd.f32 %v2077_v48, %v2037_v3  ;;  %v5599_v3 = vld [vmem:[%s7720_s9 + $0x104] ss:$16 sps:$4 sm:$0xff]  }
 0x1cc   :  { %v2079_v7 = vpop.f32.mrf.mxu0  ;;  %v2120_v49 = vpop.f32.mrf.mxu1  ;;  %3161 = vmatprep.subr.bf16.mxu0 %v5599_v3  ;;  %v5647_v3 = vld [vmem:[%s7721_s8 + $0x4] ss:$16 sps:$4 sm:$0xff]  }
 0x1cd   :  { %v2119_v8 = vadd.f32 %v2118_v42, %v2078_v6  ;;  %v2080_v9 = vadd.f32 %v2079_v7, %v2039_v5  ;;  %v5597_v42 = vld [vmem:[%s7720_s9 + $0x100] ss:$16 sps:$4 sm:$0xff]   ;;  %v5605_v6 = vld [vmem:[%s7721_s8 + $0xe4] ss:$16 sps:$4 sm:$0xff]  }
 0x1ce   :  { %v2081_v52 = vpop.f32.mrf.mxu0  ;;  %v2122_v11 = vpop.f32.mrf.mxu1  ;;  %3162 = vmatpush2.bf16.msra.mxu0 %v5597_v42  ;;  %v5608_v7 = vld [vmem:[%s7721_s8 + $0x2e4] ss:$16 sps:$4 sm:$0xff]   ;;  %v5648_v42 = vld [vmem:[%s7721_s8 + $0x200] ss:$16 sps:$4 sm:$0xff]  }
 0x1cf   :  { %v2121_v13 = vadd.f32 %v2120_v49, %v2080_v9  ;;  %v2127_v14 = vmax.f32 %v2119_v8, 0.0  ;;  %3853 = vmatprep.subr.bf16.mxu0 %v5605_v6  ;;  %v2197_v49 = vld [vmem:[%s7722_s7] sm:$0x3] }
 0x1d0   :  { %v2082_v15 = vpop.f32.mrf.mxu0  ;;  %v2123_v16 = vpop.f32.mrf.mxu1  ;;  %v7195_v8 = vld [vmem:[%s7723_s2] sm:$0xf]  ;;  %v2202_v9 = vrot.slane %v2197_v49, %v6935_v46  ;;  %v2206_v10 = vrot.slane %v2197_v49, %v6947_v54  ;;  %v5659_v49 = vld [vmem:[%s7721_s8 + $0x1c4] ss:$16 sps:$4 sm:$0xff]  }
 0x1d1   :  { %v2128_v19 = vmax.f32 %v2121_v13, 0.0  ;;  %v2131_v23 = vpack.c.bf16 %v2127_v14, %v2127_v14  ;;  %v64_v52 = vrot.slane %v7195_v8, %v6947_v54  ;;  %v72_v11 = vrot.slane %v7195_v8, %v7044_v57  ;;  %v5651_v6 = vld [vmem:[%s7721_s8 + $0x1e0] ss:$16 sps:$4 sm:$0xff]  }
 0x1d3   :  { %v2132_v21 = vpack.c.bf16 %v2128_v19, %v2128_v19  ;;  %v158_v16 = vadd.f32 %v6584_v43, %v64_v52  ;;  %v199_v19 = vadd.f32 %v6586_v44, %v72_v11  ;;  %v5611_v44 = vld [vmem:[%s7721_s8 + $0xc4] ss:$16 sps:$4 sm:$0xff]   ;;  %v5660_v52 = vld [vmem:[%s7721_s8 + $0x3c0] ss:$16 sps:$4 sm:$0xff]  }
 0x1d4   :  { %v5665_v11 = vld [vmem:[%s7721_s8 + $0x1a4] ss:$16 sps:$4 sm:$0xff]  }
 0x1d5   :  { %2602 = vmatprep.mubr.bf16.mxu1 %v2132_v21 }
 0x1d6   :  { %2603 = vmatmul.mubr.bf16.vlgmr.msra.gmra.mxu1 %v2131_v23 }
 0x1d7   :  { %3173 = vmatpush1.bf16.msra.mxu1 %v5510_v22 }
 0x1d8   :  { %3174 = vmatprep.subr.bf16.mxu1 %v5518_v24 }
 0x1db   :  { %3175 = vmatpush1.bf16.msra.mxu1 %v5516_v25  ;;  %v204_v25 = vmax.f32 %v158_v16, 0.0  ;;  %v5674_v16 = vld [vmem:[%s7721_s8 + $0x384] ss:$16 sps:$4 sm:$0xff]  }
 0x1dc   :  { %3176 = vmatprep.subr.bf16.mxu1 %v5524_v26  ;;  %v206_v26 = vmax.f32 %v199_v19, 0.0  ;;  %v5669_v19 = vld [vmem:[%s7721_s8 + $0x180] ss:$16 sps:$4 sm:$0xff]  }
 0x1df   :  { %3177 = vmatpush1.bf16.msra.mxu1 %v5522_v29 }
 0x1e0   :  { %3178 = vmatprep.subr.bf16.mxu1 %v5530_v30 }
 0x1e3   :  { %3179 = vmatpush1.bf16.msra.mxu1 %v5528_v31  ;;  %v5603_v31 = vld [vmem:[%s7721_s8 + $0xe0] ss:$16 sps:$4 sm:$0xff]  }
 0x1e4   :  { %3180 = vmatprep.subr.bf16.mxu1 %v5536_v32  ;;  %v5606_v32 = vld [vmem:[%s7721_s8 + $0x2e0] ss:$16 sps:$4 sm:$0xff]  }
 0x1e7   :  { %3181 = vmatpush1.bf16.msra.mxu1 %v5534_v33  ;;  %v5614_v33 = vld [vmem:[%s7721_s8 + $0x2c4] ss:$16 sps:$4 sm:$0xff]  }
 0x1e8   :  { %3182 = vmatprep.subr.bf16.mxu1 %v5542_v34  ;;  %v7217_v34 = vpack.c.bf16 %v204_v25, %v204_v25  ;;  %v5683_v25 = vld [vmem:[%s7721_s8 + $0x144] ss:$16 sps:$4 sm:$0xff]  }
 0x1eb   :  { %3183 = vmatpush1.bf16.msra.mxu1 %v5540_v35  ;;  %v7219_v35 = vpack.c.bf16 %v206_v26, %v206_v26  ;;  %v5686_v26 = vld [vmem:[%s7721_s8 + $0x344] ss:$16 sps:$4 sm:$0xff]  }
 0x1ec   :  { %3184 = vmatprep.subr.bf16.mxu1 %v5548_v36  ;;  %v5609_v36 = vld [vmem:[%s7721_s8 + $0xc0] ss:$16 sps:$4 sm:$0xff]  }
 0x1ef   :  { %3185 = vmatpush1.bf16.msra.mxu1 %v5546_v37  ;;  %v5612_v37 = vld [vmem:[%s7721_s8 + $0x2c0] ss:$16 sps:$4 sm:$0xff]  }
 0x1f0   :  { %3186 = vmatprep.subr.bf16.mxu1 %v5554_v38  ;;  %v5617_v38 = vld [vmem:[%s7721_s8 + $0xa4] ss:$16 sps:$4 sm:$0xff]  }
 0x1f3   :  { %3187 = vmatpush1.bf16.msra.mxu1 %v5552_v39  ;;  %v5620_v39 = vld [vmem:[%s7721_s8 + $0x2a4] ss:$16 sps:$4 sm:$0xff]  }
 0x1f4   :  { %3188 = vmatprep.subr.bf16.mxu1 %v5560_v59  ;;  %v5615_v59 = vld [vmem:[%s7721_s8 + $0xa0] ss:$16 sps:$4 sm:$0xff]  }
 0x1f7   :  { %3189 = vmatpush2.bf16.msra.mxu1 %v5558_v41  ;;  %v5618_v41 = vld [vmem:[%s7721_s8 + $0x2a0] ss:$16 sps:$4 sm:$0xff]  }
 0x1f8   :  { %3190 = vmatprep.subr.bf16.mxu1 %v5566_v17  ;;  %v5623_v17 = vld [vmem:[%s7721_s8 + $0x84] ss:$16 sps:$4 sm:$0xff]  }
 0x1fb   :  { %3191 = vmatpush2.bf16.msra.mxu1 %v5564_v18  ;;  %v5626_v18 = vld [vmem:[%s7721_s8 + $0x284] ss:$16 sps:$4 sm:$0xff]  }
 0x1fc   :  { %3192 = vmatprep.subr.bf16.mxu1 %v5572_v47  ;;  %v5621_v47 = vld [vmem:[%s7721_s8 + $0x80] ss:$16 sps:$4 sm:$0xff]  }
 0x1ff   :  { %3193 = vmatpush2.bf16.msra.mxu1 %v5570_v50  ;;  %v5624_v50 = vld [vmem:[%s7721_s8 + $0x280] ss:$16 sps:$4 sm:$0xff]  }
 0x200   :  { %3194 = vmatprep.subr.bf16.mxu1 %v5578_v53  ;;  %v5629_v53 = vld [vmem:[%s7721_s8 + $0x64] ss:$16 sps:$4 sm:$0xff]  }
 0x203   :  { %3195 = vmatpush2.bf16.msra.mxu1 %v5576_v27  ;;  %v5632_v27 = vld [vmem:[%s7721_s8 + $0x264] ss:$16 sps:$4 sm:$0xff]  }
 0x204   :  { %3196 = vmatprep.subr.bf16.mxu1 %v5584_v28  ;;  %v5627_v28 = vld [vmem:[%s7721_s8 + $0x60] ss:$16 sps:$4 sm:$0xff]  }
 0x207   :  { %3197 = vmatpush2.bf16.msra.mxu1 %v5582_v55  ;;  %v5630_v55 = vld [vmem:[%s7721_s8 + $0x260] ss:$16 sps:$4 sm:$0xff]  }
 0x208   :  { %3198 = vmatprep.subr.bf16.mxu1 %v5590_v58  ;;  %v5635_v58 = vld [vmem:[%s7721_s8 + $0x44] ss:$16 sps:$4 sm:$0xff]  }
 0x20b   :  { %3199 = vmatpush2.bf16.msra.mxu1 %v5588_v61  ;;  %v5638_v61 = vld [vmem:[%s7721_s8 + $0x244] ss:$16 sps:$4 sm:$0xff]  }
 0x20c   :  { %3200 = vmatprep.subr.bf16.mxu1 %v5596_v63  ;;  %v5636_v63 = vld [vmem:[%s7721_s8 + $0x240] ss:$16 sps:$4 sm:$0xff]  }
 0x20f   :  { %3201 = vmatpush2.bf16.msra.mxu1 %v5594_v1  ;;  %v5639_v1 = vld [vmem:[%s7721_s8 + $0x20] ss:$16 sps:$4 sm:$0xff]  }
 0x210   :  { %3202 = vmatprep.subr.bf16.mxu1 %v5602_v4  ;;  %v5650_v4 = vld [vmem:[%s7721_s8 + $0x204] ss:$16 sps:$4 sm:$0xff]  }
 0x213   :  { %3203 = vmatpush2.bf16.msra.mxu1 %v5600_v51  ;;  %v5653_v51 = vld [vmem:[%s7721_s8 + $0x1e4] ss:$16 sps:$4 sm:$0xff]  }
 0x214   :  { %3894 = vmatprep.subr.bf16.mxu1 %v5608_v7  ;;  %v5654_v7 = vld [vmem:[%s7721_s8 + $0x3e0] ss:$16 sps:$4 sm:$0xff]  }
 0x216   :  { %v2563_v0 = vpop.f32.mrf.mxu0 }
 0x217   :  { %v2564_v12 = vadd.f32 %v2563_v0, %v2202_v9  ;;  %v5641_v0 = vld [vmem:[%s7721_s8 + $0x24] ss:$16 sps:$4 sm:$0xff]  }
 0x218   :  { %v2565_v2 = vpop.f32.mrf.mxu0  ;;  %v5662_v9 = vld [vmem:[%s7721_s8 + $0x3c4] ss:$16 sps:$4 sm:$0xff]  }
 0x219   :  { %v2566_v14 = vadd.f32 %v2565_v2, %v2206_v10  ;;  %v5642_v2 = vld [vmem:[%s7721_s8 + $0x220] ss:$16 sps:$4 sm:$0xff]  }
 0x21a   :  { %v2567_v48 = vpop.f32.mrf.mxu0  ;;  %v5657_v10 = vld [vmem:[%s7721_s8 + $0x1c0] ss:$16 sps:$4 sm:$0xff]  }
 0x21b   :  { %v5645_v48 = vld [vmem:[%s7721_s8] ss:$16 sps:$4 sm:$0xff]  }
 0x21c   :  { %v2568_v5 = vpop.f32.mrf.mxu0 }
 0x21d   :  { %v5656_v5 = vld [vmem:[%s7721_s8 + $0x3e4] ss:$16 sps:$4 sm:$0xff]  }
 0x296   :  { %v2604_v13 = vpop.f32.mrf.mxu1 }
 0x297   :  { %v2605_v15 = vadd.f32 %v2604_v13, %v2564_v12  ;;  %v5668_v12 = vld [vmem:[%s7721_s8 + $0x3a4] ss:$16 sps:$4 sm:$0xff]   ;;  %v5663_v13 = vld [vmem:[%s7721_s8 + $0x1a0] ss:$16 sps:$4 sm:$0xff]  }
 0x298   :  { %v2606_v20 = vpop.f32.mrf.mxu1 }
 0x299   :  { %v2607_v21 = vadd.f32 %v2606_v20, %v2566_v14  ;;  %v2611_v22 = vmax.f32 %v2605_v15, 0.0  ;;  %v5666_v14 = vld [vmem:[%s7721_s8 + $0x3a0] ss:$16 sps:$4 sm:$0xff]   ;;  %v5671_v15 = vld [vmem:[%s7721_s8 + $0x184] ss:$16 sps:$4 sm:$0xff]  }
 0x29a   :  { %v2608_v23 = vpop.f32.mrf.mxu1  ;;  %v5672_v20 = vld [vmem:[%s7721_s8 + $0x380] ss:$16 sps:$4 sm:$0xff]  }
 0x29b   :  { %v2612_v24 = vmax.f32 %v2607_v21, 0.0  ;;  %v2745_v43 = vpack.c.bf16 %v2611_v22, %v2611_v22  ;;  %v5677_v21 = vld [vmem:[%s7721_s8 + $0x164] ss:$16 sps:$4 sm:$0xff]   ;;  %v5675_v23 = vld [vmem:[%s7721_s8 + $0x160] ss:$16 sps:$4 sm:$0xff]  }
 0x29c   :  { %v2609_v29 = vpop.f32.mrf.mxu1  ;;  %v5680_v22 = vld [vmem:[%s7721_s8 + $0x364] ss:$16 sps:$4 sm:$0xff]  }
 0x29d   :  { %v2746_v30 = vpack.c.bf16 %v2612_v24, %v2612_v24  ;;  %v5678_v24 = vld [vmem:[%s7721_s8 + $0x360] ss:$16 sps:$4 sm:$0xff]  }
 0x29e   :  { %v5681_v29 = vld [vmem:[%s7721_s8 + $0x140] ss:$16 sps:$4 sm:$0xff]  }
 0x29f   :  { %3163 = vmatprep.mubr.bf16.mxu0 %v2746_v30  ;;  %3204 = vmatprep.mubr.bf16.mxu1 %v2746_v30  ;;  %v5684_v30 = vld [vmem:[%s7721_s8 + $0x340] ss:$16 sps:$4 sm:$0xff]  }
 0x2a0   :  { %3164 = vmatmul.mubr.bf16.vlgmr.msra.gmra.mxu0 %v2745_v43  ;;  %3205 = vmatmul.mubr.bf16.vlgmr.msra.gmra.mxu1 %v2745_v43  ;;  %v5689_v43 = vld [vmem:[%s7721_s8 + $0x124] ss:$16 sps:$4 sm:$0xff]  }
 0x2a1   :  { %3854 = vmatpush1.bf16.msra.mxu0 %v5603_v31  ;;  %3895 = vmatpush1.bf16.msra.mxu1 %v5606_v32  ;;  %v60_v31 = vrot.slane %v7195_v8, %v6935_v46  ;;  %v68_v32 = vrot.slane %v7195_v8, %v7041_v56  ;;  %v5690_v8 = vld [vmem:[%s7721_s8 + $0x320] ss:$16 sps:$4 sm:$0xff]  }
 0x2a2   :  { %3885 = vmatprep.mubr.bf16.mxu0 %v7217_v34  ;;  %3926 = vmatprep.mubr.bf16.mxu1 %v7219_v35 }
 0x2a3   :  { %3855 = vmatprep.subr.bf16.mxu0 %v5611_v44  ;;  %3896 = vmatprep.subr.bf16.mxu1 %v5614_v33  ;;  %v5692_v44 = vld [vmem:[%s7721_s8 + $0x324] ss:$16 sps:$4 sm:$0xff]   ;;  %v5687_v33 = vld [vmem:[%s7721_s8 + $0x120] ss:$16 sps:$4 sm:$0xff]  }
 0x2a5   :  { %3856 = vmatpush1.bf16.msra.mxu0 %v5609_v36  ;;  %3897 = vmatpush1.bf16.msra.mxu1 %v5612_v37  ;;  %v156_v36 = vadd.f32 %v6575_v60, %v60_v31  ;;  %v197_v37 = vadd.f32 %v6577_v40, %v68_v32  ;;  %v5696_v60 = vld [vmem:[%s7721_s8 + $0x300] ss:$16 sps:$4 sm:$0xff]   ;;  %v5767_v31 = vld [vmem:[%s7721_s8 + $0x18c] ss:$16 sps:$4 sm:$0xff]  }
 0x2a6   :  { %3857 = vmatprep.subr.bf16.mxu0 %v5617_v38  ;;  %3898 = vmatprep.subr.bf16.mxu1 %v5620_v39  ;;  %v5695_v38 = vld [vmem:[%s7721_s8 + $0x104] ss:$16 sps:$4 sm:$0xff]   ;;  %v5770_v32 = vld [vmem:[%s7721_s8 + $0x38c] ss:$16 sps:$4 sm:$0xff]  }
 0x2a7   :  { %v5698_v39 = vld [vmem:[%s7721_s8 + $0x304] ss:$16 sps:$4 sm:$0xff]   ;;  %v203_v40 = vmax.f32 %v156_v36, 0.0  ;;  %v5771_v36 = vld [vmem:[%s7721_s8 + $0x168] ss:$16 sps:$4 sm:$0xff]  }
 0x2a9   :  { %3858 = vmatpush1.bf16.msra.mxu0 %v5615_v59  ;;  %3899 = vmatpush1.bf16.msra.mxu1 %v5618_v41  ;;  %v5693_v59 = vld [vmem:[%s7721_s8 + $0x100] ss:$16 sps:$4 sm:$0xff]   ;;  %v205_v41 = vmax.f32 %v197_v37, 0.0  ;;  %v5774_v37 = vld [vmem:[%s7721_s8 + $0x368] ss:$16 sps:$4 sm:$0xff]  }
 0x2aa   :  { %3859 = vmatprep.subr.bf16.mxu0 %v5623_v17  ;;  %3900 = vmatprep.subr.bf16.mxu1 %v5626_v18  ;;  %v5701_v17 = vld [vmem:[%s7721_s8 + $0xec] ss:$16 sps:$4 sm:$0xff]  }
 0x2ab   :  { %v5704_v18 = vld [vmem:[%s7721_s8 + $0x2ec] ss:$16 sps:$4 sm:$0xff]  }
 0x2ad   :  { %3860 = vmatpush1.bf16.msra.mxu0 %v5621_v47  ;;  %3901 = vmatpush1.bf16.msra.mxu1 %v5624_v50  ;;  %v5699_v47 = vld [vmem:[%s7721_s8 + $0xe8] ss:$16 sps:$4 sm:$0xff]   ;;  %v7412_v50 = vpack.c.bf16 %v203_v40, %v203_v40  ;;  %v5785_v40 = vld [vmem:[%s7721_s8 + $0x12c] ss:$16 sps:$4 sm:$0xff]  }
 0x2ae   :  { %3861 = vmatprep.subr.bf16.mxu0 %v5629_v53  ;;  %3902 = vmatprep.subr.bf16.mxu1 %v5632_v27  ;;  %v7414_v53 = vpack.c.bf16 %v205_v41, %v205_v41  ;;  %v5702_v27 = vld [vmem:[%s7721_s8 + $0x2e8] ss:$16 sps:$4 sm:$0xff]   ;;  %v5788_v41 = vld [vmem:[%s7721_s8 + $0x32c] ss:$16 sps:$4 sm:$0xff]  }
 0x2b1   :  { %3862 = vmatpush1.bf16.msra.mxu0 %v5627_v28  ;;  %3903 = vmatpush1.bf16.msra.mxu1 %v5630_v55  ;;  %v5707_v28 = vld [vmem:[%s7721_s8 + $0xcc] ss:$16 sps:$4 sm:$0xff]  }
 0x2b2   :  { %3863 = vmatprep.subr.bf16.mxu0 %v5635_v58  ;;  %3904 = vmatprep.subr.bf16.mxu1 %v5638_v61  ;;  %v5710_v55 = vld [vmem:[%s7721_s8 + $0x2cc] ss:$16 sps:$4 sm:$0xff]   ;;  %v5705_v58 = vld [vmem:[%s7721_s8 + $0xc8] ss:$16 sps:$4 sm:$0xff]  }
 0x2b3   :  { %v5708_v61 = vld [vmem:[%s7721_s8 + $0x2c8] ss:$16 sps:$4 sm:$0xff]  }
 0x2b5   :  { %3864 = vmatpush1.bf16.msra.mxu0 %v5633_v62  ;;  %3905 = vmatpush1.bf16.msra.mxu1 %v5636_v63  ;;  %v5713_v62 = vld [vmem:[%s7721_s8 + $0xac] ss:$16 sps:$4 sm:$0xff]   ;;  %v5711_v63 = vld [vmem:[%s7721_s8 + $0xa8] ss:$16 sps:$4 sm:$0xff]  }
 0x2b6   :  { %3865 = vmatprep.subr.bf16.mxu0 %v5641_v0  ;;  %3906 = vmatprep.subr.bf16.mxu1 %v5644_v45  ;;  %v5719_v0 = vld [vmem:[%s7721_s8 + $0x8c] ss:$16 sps:$4 sm:$0xff]  }
 0x2b7   :  { %v5722_v45 = vld [vmem:[%s7721_s8 + $0x28c] ss:$16 sps:$4 sm:$0xff]  }
 0x2b9   :  { %3866 = vmatpush1.bf16.msra.mxu0 %v5639_v1  ;;  %3907 = vmatpush1.bf16.msra.mxu1 %v5642_v2  ;;  %v5717_v1 = vld [vmem:[%s7721_s8 + $0x88] ss:$16 sps:$4 sm:$0xff]  }
 0x2ba   :  { %3867 = vmatprep.subr.bf16.mxu0 %v5647_v3  ;;  %3908 = vmatprep.subr.bf16.mxu1 %v5650_v4  ;;  %v5720_v2 = vld [vmem:[%s7721_s8 + $0x288] ss:$16 sps:$4 sm:$0xff]   ;;  %v5725_v3 = vld [vmem:[%s7721_s8 + $0x6c] ss:$16 sps:$4 sm:$0xff]  }
 0x2bb   :  { %v5728_v4 = vld [vmem:[%s7721_s8 + $0x26c] ss:$16 sps:$4 sm:$0xff]  }
 0x2bd   :  { %3868 = vmatpush1.bf16.msra.mxu0 %v5645_v48  ;;  %3909 = vmatpush1.bf16.msra.mxu1 %v5648_v42  ;;  %v5723_v48 = vld [vmem:[%s7721_s8 + $0x68] ss:$16 sps:$4 sm:$0xff]  }
 0x2be   :  { %3869 = vmatprep.subr.bf16.mxu0 %v5653_v51  ;;  %3910 = vmatprep.subr.bf16.mxu1 %v5656_v5  ;;  %v5726_v42 = vld [vmem:[%s7721_s8 + $0x268] ss:$16 sps:$4 sm:$0xff]   ;;  %v5731_v51 = vld [vmem:[%s7721_s8 + $0x4c] ss:$16 sps:$4 sm:$0xff]  }
 0x2bf   :  { %v5729_v5 = vld [vmem:[%s7721_s8 + $0x48] ss:$16 sps:$4 sm:$0xff]  }
 0x2c1   :  { %3870 = vmatpush2.bf16.msra.mxu0 %v5651_v6  ;;  %3911 = vmatpush2.bf16.msra.mxu1 %v5654_v7  ;;  %v5734_v6 = vld [vmem:[%s7721_s8 + $0x24c] ss:$16 sps:$4 sm:$0xff]   ;;  %v5732_v7 = vld [vmem:[%s7721_s8 + $0x248] ss:$16 sps:$4 sm:$0xff]  }
 0x2c2   :  { %3871 = vmatprep.subr.bf16.mxu0 %v5659_v49  ;;  %3912 = vmatprep.subr.bf16.mxu1 %v5662_v9  ;;  %v5737_v49 = vld [vmem:[%s7721_s8 + $0x2c] ss:$16 sps:$4 sm:$0xff]  }
 0x2c3   :  { %v5740_v9 = vld [vmem:[%s7721_s8 + $0x22c] ss:$16 sps:$4 sm:$0xff]  }
 0x2c5   :  { %3872 = vmatpush2.bf16.msra.mxu0 %v5657_v10  ;;  %3913 = vmatpush2.bf16.msra.mxu1 %v5660_v52  ;;  %v5735_v10 = vld [vmem:[%s7721_s8 + $0x28] ss:$16 sps:$4 sm:$0xff]  }
 0x2c6   :  { %3873 = vmatprep.subr.bf16.mxu0 %v5665_v11  ;;  %3914 = vmatprep.subr.bf16.mxu1 %v5668_v12  ;;  %v5738_v52 = vld [vmem:[%s7721_s8 + $0x228] ss:$16 sps:$4 sm:$0xff]   ;;  %v5743_v11 = vld [vmem:[%s7721_s8 + $0xc] ss:$16 sps:$4 sm:$0xff]  }
 0x2c7   :  { %v5746_v12 = vld [vmem:[%s7721_s8 + $0x20c] ss:$16 sps:$4 sm:$0xff]  }
 0x2c9   :  { %3874 = vmatpush2.bf16.msra.mxu0 %v5663_v13  ;;  %3915 = vmatpush2.bf16.msra.mxu1 %v5666_v14  ;;  %v5741_v13 = vld [vmem:[%s7721_s8 + $0x8] ss:$16 sps:$4 sm:$0xff]  }
 0x2ca   :  { %3875 = vmatprep.subr.bf16.mxu0 %v5671_v15  ;;  %3916 = vmatprep.subr.bf16.mxu1 %v5674_v16  ;;  %v5744_v14 = vld [vmem:[%s7721_s8 + $0x208] ss:$16 sps:$4 sm:$0xff]   ;;  %v5749_v15 = vld [vmem:[%s7721_s8 + $0x1ec] ss:$16 sps:$4 sm:$0xff]  }
 0x2cb   :  { %v5752_v16 = vld [vmem:[%s7721_s8 + $0x3ec] ss:$16 sps:$4 sm:$0xff]  }
 0x2cd   :  { %3876 = vmatpush2.bf16.msra.mxu0 %v5669_v19  ;;  %3917 = vmatpush2.bf16.msra.mxu1 %v5672_v20  ;;  %v5747_v19 = vld [vmem:[%s7721_s8 + $0x1e8] ss:$16 sps:$4 sm:$0xff]  }
 0x2ce   :  { %3877 = vmatprep.subr.bf16.mxu0 %v5677_v21  ;;  %3918 = vmatprep.subr.bf16.mxu1 %v5680_v22  ;;  %v5750_v20 = vld [vmem:[%s7721_s8 + $0x3e8] ss:$16 sps:$4 sm:$0xff]   ;;  %v5755_v21 = vld [vmem:[%s7721_s8 + $0x1cc] ss:$16 sps:$4 sm:$0xff]  }
 0x2cf   :  { %v5758_v22 = vld [vmem:[%s7721_s8 + $0x3cc] ss:$16 sps:$4 sm:$0xff]  }
 0x2d1   :  { %3878 = vmatpush2.bf16.msra.mxu0 %v5675_v23  ;;  %3919 = vmatpush2.bf16.msra.mxu1 %v5678_v24  ;;  %v5753_v23 = vld [vmem:[%s7721_s8 + $0x1c8] ss:$16 sps:$4 sm:$0xff]  }
 0x2d2   :  { %3879 = vmatprep.subr.bf16.mxu0 %v5683_v25  ;;  %3920 = vmatprep.subr.bf16.mxu1 %v5686_v26  ;;  %v5756_v24 = vld [vmem:[%s7721_s8 + $0x3c8] ss:$16 sps:$4 sm:$0xff]   ;;  %v5761_v25 = vld [vmem:[%s7721_s8 + $0x1ac] ss:$16 sps:$4 sm:$0xff]  }
 0x2d3   :  { %v5764_v26 = vld [vmem:[%s7721_s8 + $0x3ac] ss:$16 sps:$4 sm:$0xff]  }
 0x2d5   :  { %3880 = vmatpush2.bf16.msra.mxu0 %v5681_v29  ;;  %3921 = vmatpush2.bf16.msra.mxu1 %v5684_v30  ;;  %v5759_v29 = vld [vmem:[%s7721_s8 + $0x1a8] ss:$16 sps:$4 sm:$0xff]  }
 0x2d6   :  { %3881 = vmatprep.subr.bf16.mxu0 %v5689_v43  ;;  %3922 = vmatprep.subr.bf16.mxu1 %v5692_v44  ;;  %v5762_v30 = vld [vmem:[%s7721_s8 + $0x3a8] ss:$16 sps:$4 sm:$0xff]  }
 0x2d7   :  { %v5765_v43 = vld [vmem:[%s7721_s8 + $0x188] ss:$16 sps:$4 sm:$0xff]  }
 0x2d8   :  { %v5768_v44 = vld [vmem:[%s7721_s8 + $0x388] ss:$16 sps:$4 sm:$0xff]  }
 0x2d9   :  { %3882 = vmatpush2.bf16.msra.mxu0 %v5687_v33  ;;  %3923 = vmatpush2.bf16.msra.mxu1 %v5690_v8  ;;  %v5773_v33 = vld [vmem:[%s7721_s8 + $0x16c] ss:$16 sps:$4 sm:$0xff]  }
 0x2da   :  { %3883 = vmatprep.subr.bf16.mxu0 %v5695_v38  ;;  %3924 = vmatprep.subr.bf16.mxu1 %v5698_v39  ;;  %v5776_v8 = vld [vmem:[%s7721_s8 + $0x36c] ss:$16 sps:$4 sm:$0xff]  }
 0x2db   :  { %v5779_v38 = vld [vmem:[%s7721_s8 + $0x14c] ss:$16 sps:$4 sm:$0xff]  }
 0x2dc   :  { %v5782_v39 = vld [vmem:[%s7721_s8 + $0x34c] ss:$16 sps:$4 sm:$0xff]  }
 0x2dd   :  { %3884 = vmatpush2.bf16.msra.mxu0 %v5693_v59  ;;  %3925 = vmatpush2.bf16.msra.mxu1 %v5696_v60  ;;  %v5777_v59 = vld [vmem:[%s7721_s8 + $0x148] ss:$16 sps:$4 sm:$0xff]  }
 0x2de   :  { %3935 = vmatprep.subr.bf16.mxu0 %v5701_v17  ;;  %3976 = vmatprep.subr.bf16.mxu1 %v5704_v18  ;;  %v5780_v60 = vld [vmem:[%s7721_s8 + $0x348] ss:$16 sps:$4 sm:$0xff]  }
 0x2df   :  { %v5783_v17 = vld [vmem:[%s7721_s8 + $0x128] ss:$16 sps:$4 sm:$0xff]  }
 0x2e0   :  { %3886 = vmatmul.mubr.bf16.vlgmr.msra.gmra.mxu0 %v7412_v50  ;;  %3927 = vmatmul.mubr.bf16.vlgmr.msra.gmra.mxu1 %v7414_v53  ;;  %v5786_v18 = vld [vmem:[%s7721_s8 + $0x328] ss:$16 sps:$4 sm:$0xff]  }
 0x2e1   :  { %3936 = vmatpush1.bf16.msra.mxu0 %v5699_v47  ;;  %3967 = vmatprep.mubr.bf16.mxu0 %v7217_v34  ;;  %v5716_v34 = vld [vmem:[%s7721_s8 + $0x2ac] ss:$16 sps:$4 sm:$0xff]  }
 0x2e2   :  { %3977 = vmatpush1.bf16.msra.mxu1 %v5702_v27  ;;  %4008 = vmatprep.mubr.bf16.mxu1 %v7219_v35  ;;  %v5714_v35 = vld [vmem:[%s7721_s8 + $0x2a8] ss:$16 sps:$4 sm:$0xff]   ;;  %v5791_v47 = vld [vmem:[%s7721_s8 + $0x10c] ss:$16 sps:$4 sm:$0xff]  }
 0x2e3   :  { %3937 = vmatprep.subr.bf16.mxu0 %v5707_v28  ;;  %3978 = vmatprep.subr.bf16.mxu1 %v5710_v55  ;;  %v5794_v27 = vld [vmem:[%s7721_s8 + $0x30c] ss:$16 sps:$4 sm:$0xff]   ;;  %v5789_v28 = vld [vmem:[%s7721_s8 + $0x108] ss:$16 sps:$4 sm:$0xff]  }
 0x2e4   :  { %v5792_v55 = vld [vmem:[%s7721_s8 + $0x308] ss:$16 sps:$4 sm:$0xff]  }
 0x2e5   :  { %3938 = vmatpush1.bf16.msra.mxu0 %v5705_v58  ;;  %v5795_v58 = vld [vmem:[%s7724_s11 + $0x78] sm:$0xff]  }
 0x2e6   :  { %3979 = vmatpush1.bf16.msra.mxu1 %v5708_v61  ;;  %3939 = vmatprep.subr.bf16.mxu0 %v5713_v62  ;;  %v5796_v61 = vld [vmem:[%s7724_s11 + $0x38] sm:$0xff]   ;;  %v5797_v62 = vld [vmem:[%s7724_s11 + $0x70] sm:$0xff]  }
 0x2e7   :  { %3980 = vmatprep.subr.bf16.mxu1 %v5716_v34  ;;  %v5798_v34 = vld [vmem:[%s7724_s11 + $0x30] sm:$0xff]  }
 0x2e9   :  { %3940 = vmatpush1.bf16.msra.mxu0 %v5711_v63  ;;  %v5799_v63 = vld [vmem:[%s7724_s11 + $0x68] sm:$0xff]  }
 0x2ea   :  { %3981 = vmatpush1.bf16.msra.mxu1 %v5714_v35  ;;  %3941 = vmatprep.subr.bf16.mxu0 %v5719_v0  ;;  %v5800_v35 = vld [vmem:[%s7724_s11 + $0x28] sm:$0xff]   ;;  %v5803_v0 = vld [vmem:[%s7724_s11 + $0x58] sm:$0xff]  }
 0x2eb   :  { %3982 = vmatprep.subr.bf16.mxu1 %v5722_v45  ;;  %v5804_v45 = vld [vmem:[%s7724_s11 + $0x18] sm:$0xff]  }
 0x2ed   :  { %3942 = vmatpush1.bf16.msra.mxu0 %v5717_v1  ;;  %v5805_v1 = vld [vmem:[%s7724_s11 + $0x50] sm:$0xff]  }
 0x2ee   :  { %3983 = vmatpush1.bf16.msra.mxu1 %v5720_v2  ;;  %3943 = vmatprep.subr.bf16.mxu0 %v5725_v3  ;;  %v5811_v2 = vld [vmem:[%s7724_s11 + $0xf8] sm:$0xff]  }
 0x2ef   :  { %3984 = vmatprep.subr.bf16.mxu1 %v5728_v4  ;;  %v5812_v3 = vld [vmem:[%s7724_s11 + $0xb8] sm:$0xff]   ;;  %v5813_v4 = vld [vmem:[%s7724_s11 + $0xf0] sm:$0xff]  }
 0x2f1   :  { %3944 = vmatpush1.bf16.msra.mxu0 %v5723_v48  ;;  %v5806_v48 = vld [vmem:[%s7724_s11 + $0x10] sm:$0xff]  }
 0x2f2   :  { %3985 = vmatpush1.bf16.msra.mxu1 %v5726_v42  ;;  %3945 = vmatprep.subr.bf16.mxu0 %v5731_v51  ;;  %v5814_v42 = vld [vmem:[%s7724_s11 + $0xb0] sm:$0xff]   ;;  %v5807_v51 = vld [vmem:[%s7724_s11 + $0x48] sm:$0xff]  }
 0x2f3   :  { %3986 = vmatprep.subr.bf16.mxu1 %v5734_v6  ;;  %v5808_v6 = vld [vmem:[%s7724_s11 + $0x8] sm:$0xff]  }
 0x2f5   :  { %3946 = vmatpush1.bf16.msra.mxu0 %v5729_v5  ;;  %v5815_v5 = vld [vmem:[%s7724_s11 + $0xe8] sm:$0xff]  }
 0x2f6   :  { %3987 = vmatpush1.bf16.msra.mxu1 %v5732_v7  ;;  %3947 = vmatprep.subr.bf16.mxu0 %v5737_v49  ;;  %v5816_v7 = vld [vmem:[%s7724_s11 + $0xa8] sm:$0xff]   ;;  %v5809_v49 = vld [vmem:[%s7724_s11 + $0x40] sm:$0xff]  }
 0x2f7   :  { %3988 = vmatprep.subr.bf16.mxu1 %v5740_v9  ;;  %v5817_v9 = vld [vmem:[%s7724_s11 + $0xe0] sm:$0xff]  }
 0x2f9   :  { %3948 = vmatpush1.bf16.msra.mxu0 %v5735_v10  ;;  %v5810_v10 = vld [vmem:[%s7724_s11] sm:$0xff]  }
 0x2fa   :  { %3989 = vmatpush1.bf16.msra.mxu1 %v5738_v52  ;;  %3949 = vmatprep.subr.bf16.mxu0 %v5743_v11  ;;  %v5818_v52 = vld [vmem:[%s7724_s11 + $0xa0] sm:$0xff]   ;;  %v5819_v11 = vld [vmem:[%s7724_s11 + $0xd8] sm:$0xff]  }
 0x2fb   :  { %3990 = vmatprep.subr.bf16.mxu1 %v5746_v12  ;;  %v5820_v12 = vld [vmem:[%s7724_s11 + $0x98] sm:$0xff]  }
 0x2fd   :  { %3950 = vmatpush1.bf16.msra.mxu0 %v5741_v13 }
 0x2fe   :  { %3991 = vmatpush1.bf16.msra.mxu1 %v5744_v14  ;;  %3951 = vmatprep.subr.bf16.mxu0 %v5749_v15  ;;  %v5821_v15 = vld [vmem:[%s7724_s11 + $0xd0] sm:$0xff]  }
 0x2ff   :  { %3992 = vmatprep.subr.bf16.mxu1 %v5752_v16 }
 0x301   :  { %3952 = vmatpush2.bf16.msra.mxu0 %v5747_v19 }
 0x302   :  { %3993 = vmatpush2.bf16.msra.mxu1 %v5750_v20  ;;  %3953 = vmatprep.subr.bf16.mxu0 %v5755_v21  ;;  %v5822_v20 = vld [vmem:[%s7724_s11 + $0x90] sm:$0xff]  }
 0x303   :  { %3994 = vmatprep.subr.bf16.mxu1 %v5758_v22 }
 0x305   :  { %3954 = vmatpush2.bf16.msra.mxu0 %v5753_v23  ;;  %v5823_v23 = vld [vmem:[%s7724_s11 + $0xc8] sm:$0xff]  }
 0x306   :  { %3995 = vmatpush2.bf16.msra.mxu1 %v5756_v24  ;;  %3955 = vmatprep.subr.bf16.mxu0 %v5761_v25 }
 0x307   :  { %3996 = vmatprep.subr.bf16.mxu1 %v5764_v26  ;;  %v5824_v26 = vld [vmem:[%s7724_s11 + $0x88] sm:$0xff]  }
 0x309   :  { %3956 = vmatpush2.bf16.msra.mxu0 %v5759_v29  ;;  %v5825_v29 = vld [vmem:[%s7724_s11 + $0xc0] sm:$0xff]  }
 0x30a   :  { %3997 = vmatpush2.bf16.msra.mxu1 %v5762_v30  ;;  %3957 = vmatprep.subr.bf16.mxu0 %v5767_v31  ;;  %v5826_v30 = vld [vmem:[%s7724_s11 + $0x80] sm:$0xff]  }
 0x30b   :  { %3998 = vmatprep.subr.bf16.mxu1 %v5770_v32  ;;  %v4017_v31 = vld [vmem:[%s7725_s10] sm:$0xf] }
 0x30d   :  { %3958 = vmatpush2.bf16.msra.mxu0 %v5765_v43 }
 0x30e   :  { %3999 = vmatpush2.bf16.msra.mxu1 %v5768_v44  ;;  %3959 = vmatprep.subr.bf16.mxu0 %v5773_v33  ;;  %v4022_v33 = vrot.slane %v4017_v31, %v6935_v46 }
 0x30f   :  { %4000 = vmatprep.subr.bf16.mxu1 %v5776_v8 }
 0x311   :  { %3960 = vmatpush2.bf16.msra.mxu0 %v5771_v36 }
 0x312   :  { %4001 = vmatpush2.bf16.msra.mxu1 %v5774_v37  ;;  %3961 = vmatprep.subr.bf16.mxu0 %v5779_v38 }
 0x313   :  { %4002 = vmatprep.subr.bf16.mxu1 %v5782_v39  ;;  %v4026_v39 = vrot.slane %v4017_v31, %v6947_v54 }
 0x315   :  { %3962 = vmatpush2.bf16.msra.mxu0 %v5777_v59 }
 0x316   :  { %4003 = vmatpush2.bf16.msra.mxu1 %v5780_v60  ;;  %3963 = vmatprep.subr.bf16.mxu0 %v5785_v40 }
 0x317   :  { %4004 = vmatprep.subr.bf16.mxu1 %v5788_v41 }
 0x319   :  { %3964 = vmatpush2.bf16.msra.mxu0 %v5783_v17 }
 0x31a   :  { %4005 = vmatpush2.bf16.msra.mxu1 %v5786_v18  ;;  %3965 = vmatprep.subr.bf16.mxu0 %v5791_v47 }
 0x31b   :  { %4006 = vmatprep.subr.bf16.mxu1 %v5794_v27 }
 0x31d   :  { %3966 = vmatpush2.bf16.msra.mxu0 %v5789_v28 }
 0x31e   :  { %4007 = vmatpush2.bf16.msra.mxu1 %v5792_v55  ;;  %4962 = vmatprep.subr.bf16.mxu0 %v5795_v58 }
 0x31f   :  { %4984 = vmatprep.subr.bf16.mxu1 %v5811_v2 }
 0x320   :  { %3968 = vmatmul.mubr.bf16.vlgmr.msra.gmra.mxu0 %v7412_v50  ;;  %v5801_v50 = vld [vmem:[%s7724_s11 + $0x60] sm:$0xff]  }
 0x321   :  { %4009 = vmatmul.mubr.bf16.vlgmr.msra.gmra.mxu1 %v7414_v53  ;;  %4963 = vmatpush3.bf16.msra.mxu0 %v5796_v61  ;;  %v5802_v53 = vld [vmem:[%s7724_s11 + $0x20] sm:$0xff]  }
 0x322   :  { %4964 = vmatprep.subr.bf16.mxu0 %v5797_v62  ;;  %4985 = vmatpush3.bf16.msra.mxu1 %v5812_v3 }
 0x323   :  { %4986 = vmatprep.subr.bf16.mxu1 %v5813_v4 }
 0x325   :  { %4965 = vmatpush3.bf16.msra.mxu0 %v5798_v34  ;;  %v4030_v34 = vrot.slane %v4017_v31, %v7041_v56 }
 0x326   :  { %4966 = vmatprep.subr.bf16.mxu0 %v5799_v63  ;;  %4987 = vmatpush3.bf16.msra.mxu1 %v5814_v42 }
 0x327   :  { %4988 = vmatprep.subr.bf16.mxu1 %v5815_v5 }
 0x329   :  { %4967 = vmatpush3.bf16.msra.mxu0 %v5800_v35 }
 0x32a   :  { %4968 = vmatprep.subr.bf16.mxu0 %v5801_v50  ;;  %4989 = vmatpush3.bf16.msra.mxu1 %v5816_v7 }
 0x32b   :  { %4990 = vmatprep.subr.bf16.mxu1 %v5817_v9 }
 0x32d   :  { %4969 = vmatpush3.bf16.msra.mxu0 %v5802_v53  ;;  %v4034_v53 = vrot.slane %v4017_v31, %v7044_v57  ;;  %v4929_v57 = vld [vmem:[%s7726_s12] ss:$0 sm:$0xff] }
 0x32e   :  { %4970 = vmatprep.subr.bf16.mxu0 %v5803_v0  ;;  %4991 = vmatpush3.bf16.msra.mxu1 %v5818_v52 }
 0x32f   :  { %4992 = vmatprep.subr.bf16.mxu1 %v5819_v11 }
 0x331   :  { %4971 = vmatpush3.bf16.msra.mxu0 %v5804_v45 }
 0x332   :  { %4972 = vmatprep.subr.bf16.mxu0 %v5805_v1  ;;  %4993 = vmatpush3.bf16.msra.mxu1 %v5820_v12 }
 0x333   :  { %4994 = vmatprep.subr.bf16.mxu1 %v5821_v15 }
 0x335   :  { %4973 = vmatpush3.bf16.msra.mxu0 %v5806_v48 }
 0x336   :  { %4974 = vmatprep.subr.bf16.mxu0 %v5807_v51  ;;  %4995 = vmatpush3.bf16.msra.mxu1 %v5822_v20 }
 0x337   :  { %4996 = vmatprep.subr.bf16.mxu1 %v5823_v23 }
 0x339   :  { %4975 = vmatpush3.bf16.msra.mxu0 %v5808_v6 }
 0x33a   :  { %4976 = vmatprep.subr.bf16.mxu0 %v5809_v49  ;;  %4997 = vmatpush3.bf16.msra.mxu1 %v5824_v26 }
 0x33b   :  { %4998 = vmatprep.subr.bf16.mxu1 %v5825_v29 }
 0x33d   :  { %4977 = vmatpush3.bf16.msra.mxu0 %v5810_v10 }
 0x33e   :  { %4999 = vmatpush3.bf16.msra.mxu1 %v5826_v30 }
 0x360   :  { %v3165_v13 = vpop.f32.mrf.mxu0  ;;  %v3206_v14 = vpop.f32.mrf.mxu1 }
 0x362   :  { %v3167_v16 = vpop.f32.mrf.mxu0  ;;  %v3208_v19 = vpop.f32.mrf.mxu1 }
 0x364   :  { %v3169_v21 = vpop.f32.mrf.mxu0  ;;  %v3210_v22 = vpop.f32.mrf.mxu1 }
 0x366   :  { %v3170_v24 = vpop.f32.mrf.mxu0  ;;  %v3211_v25 = vpop.f32.mrf.mxu1 }
 0x3a0   :  { %v3887_v32 = vpop.f32.mrf.mxu0  ;;  %v3928_v43 = vpop.f32.mrf.mxu1 }
 0x3a1   :  { %v3888_v44 = vadd.f32 %v3887_v32, %v3165_v13 }
 0x3a2   :  { %v3889_v8 = vpop.f32.mrf.mxu0  ;;  %v3930_v36 = vpop.f32.mrf.mxu1 }
 0x3a3   :  { %v3929_v37 = vadd.f32 %v3928_v43, %v3888_v44  ;;  %v3890_v38 = vadd.f32 %v3889_v8, %v3167_v16 }
 0x3a4   :  { %v3891_v59 = vpop.f32.mrf.mxu0  ;;  %v3932_v60 = vpop.f32.mrf.mxu1 }
 0x3a5   :  { %v4039_v40 = vadd.f32 %v4022_v33, %v3929_v37  ;;  %v3931_v41 = vadd.f32 %v3930_v36, %v3890_v38 }
 0x3a6   :  { %v3892_v17 = vpop.f32.mrf.mxu0  ;;  %v3933_v18 = vpop.f32.mrf.mxu1 }
 0x3a7   :  { %v4040_v47 = vadd.f32 %v4026_v39, %v3931_v41  ;;  %v4043_v27 = vmax.f32 %v4039_v40, 0.0 }
 0x3a9   :  { %v4044_v28 = vmax.f32 %v4040_v47, 0.0  ;;  %v4047_v58 = vpack.c.bf16 %v4043_v27, %v4043_v27 }
 0x3ab   :  { %v4048_v55 = vpack.c.bf16 %v4044_v28, %v4044_v28 }
 0x3ad   :  { %4346 = vmatprep.mubr.bf16.mxu0 %v4048_v55 }
 0x3ae   :  { %4347 = vmatmul.mubr.bf16.vlgmr.msra.gmra.mxu0 %v4047_v58 }
 0x3e0   :  { %v3969_v46 = vpop.f32.mrf.mxu0 }
 0x3e1   :  { %v3970_v61 = vadd.f32 %v3969_v46, %v3206_v14  ;;  %v4010_v62 = vpop.f32.mrf.mxu1 }
 0x3e2   :  { %v3971_v63 = vpop.f32.mrf.mxu0 }
 0x3e3   :  { %v4011_v54 = vadd.f32 %v4010_v62, %v3970_v61  ;;  %v3972_v35 = vadd.f32 %v3971_v63, %v3208_v19  ;;  %v4012_v50 = vpop.f32.mrf.mxu1 }
 0x3e4   :  { %v3973_v0 = vpop.f32.mrf.mxu0 }
 0x3e5   :  { %v4041_v45 = vadd.f32 %v4030_v34, %v4011_v54  ;;  %v4013_v1 = vadd.f32 %v4012_v50, %v3972_v35  ;;  %v4014_v2 = vpop.f32.mrf.mxu1 }
 0x3e6   :  { %v3974_v3 = vpop.f32.mrf.mxu0 }
 0x3e7   :  { %v4042_v4 = vadd.f32 %v4034_v53, %v4013_v1  ;;  %v4015_v48 = vpop.f32.mrf.mxu1  ;;  %v4045_v42 = vmax.f32 %v4041_v45, 0.0 }
 0x3e9   :  { %v4046_v51 = vmax.f32 %v4042_v4, 0.0  ;;  %v4049_v6 = vpack.c.bf16 %v4045_v42, %v4045_v42 }
 0x3eb   :  { %v4050_v5 = vpack.c.bf16 %v4046_v51, %v4046_v51 }
 0x3ed   :  { %4386 = vmatprep.mubr.bf16.mxu1 %v4050_v5 }
 0x3ee   :  { %4387 = vmatmul.mubr.bf16.vlgmr.msra.gmra.mxu1 %v4049_v6 }
 0x46e   :  { %v4978_v56 = vpop.f32.mrf.mxu0 }
 0x470   :  { %v4979_v7 = vpop.f32.mrf.mxu0 }
 0x471   :  { %v4980_v10 = vadd.f32 %v4979_v7, %v4978_v56 }
 0x472   :  { %v4981_v49 = vpop.f32.mrf.mxu0 }
 0x473   :  { %v4349_v12 = vadd.f32 %v4980_v10, %v4929_v57 }
 0x474   :  { %v4982_v9 = vpop.f32.mrf.mxu0 }
 0x4ae   :  { %v5000_v52 = vpop.f32.mrf.mxu1 }
 0x4b0   :  { %v5001_v11 = vpop.f32.mrf.mxu1 }
 0x4b1   :  { %v5002_v13 = vadd.f32 %v5001_v11, %v5000_v52 }
 0x4b2   :  { %v5003_v14 = vpop.f32.mrf.mxu1 }
 0x4b3   :  { %v4389_v15 = vadd.f32 %v5002_v13, %v4349_v12 }
 0x4b4   :  { %v5004_v16 = vpop.f32.mrf.mxu1 }
 0x4b5   :  { %4394 = vst [vmem:[%s7727_s13] sm:$0xff] %v4389_v15 }

</bundles_post_ra>
